<compile_context>
chip_gen: v6e
topology: v6e:2x2x1
jax: 0.10.0
libtpu: 0.0.40
codegen_flags: <defaults>
</compile_context>

<pallas_src>
import functools

import jax
import jax.numpy as jnp
from jax import lax
from jax.experimental import pallas as pl
from jax.experimental.pallas import tpu as pltpu

NUM_CLASSES = 2
IN_DIM = 4096
H1 = 512
H2 = 32
PAD = 128          # lane padding for the small class dim
NEG_BIG = -1e30    # finite "-inf" so 0 * NEG_BIG stays finite (no NaNs)


def _mlp_softmax_kernel(x_ref, w1_ref, b1_ref, w23_ref, b23_ref, out_ref):
    # bf16 cast in-kernel (VPU work hidden under the MXU pass); the wrapper
    # passes x straight from HBM with no standalone cast/pad passes.
    x = x_ref[...].astype(jnp.bfloat16)                                # (TM, 4096)

    # Linear(4096, 512) + ReLU     (Dropout == identity at inference)
    h1 = jnp.dot(x, w1_ref[...], preferred_element_type=jnp.float32) + b1_ref[...]
    h1 = jnp.maximum(h1, 0.0)                                          # (TM, 512) f32

    # Folded Linear(512,32) @ Linear(32,2) == Linear(512,2), padded to 128 lanes.
    z = jnp.dot(h1.astype(jnp.bfloat16), w23_ref[...],
                preferred_element_type=jnp.float32) + b23_ref[...]     # (TM, 128) f32

    # Masked softmax over the 2 valid class lanes. Pad lanes get NEG_BIG so
    # exp underflows to exactly 0 -- no second select needed.
    lane = lax.broadcasted_iota(jnp.int32, z.shape, dimension=1)
    zm = jnp.where(lane < NUM_CLASSES, z, NEG_BIG)
    m = jnp.max(zm, axis=-1, keepdims=True)
    zc = zm - m                                    # <= 0 everywhere
    e = jnp.exp(zc)                                # pad lanes -> exactly 0
    s = jnp.sum(e, axis=-1, keepdims=True)         # >= 1
    inv = pl.reciprocal(s)                         # exact: calibrated probs
    p = e * inv                                    # pad lanes exactly 0

    # entropy = -p*log(p), with log(p) = (z - m) - log(s): one EUP log per row
    # instead of 128; pad lanes have p == 0 so the product is exactly 0.
    logp = zc - jnp.log(s)
    ent = -p * logp                                # >= 0 by construction

    # Pack probs (lanes 0..1) and entropy (lanes 2..3) into one lane-dense
    # 128-wide store; the lane rotation runs on the otherwise-idle XLU slot.
    out_ref[...] = jnp.where(lane < NUM_CLASSES, p,
                             pltpu.roll(ent, shift=NUM_CLASSES, axis=1))


def _pick_tm(B, tm_req):
    """Batch tile: multiple of 16 (bf16 sublane packing), <= B; for large
    batches keep >= 2 grid steps so v7x's two TensorCores both get work."""
    if B < 16:
        return B                            # full-dim block (always legal)
    tm = min(tm_req, (B // 16) * 16)
    if B > 256 and pl.cdiv(B, tm) < 2:
        tm = max(16, ((B // 2) // 16) * 16)
    return tm


def regressor_forward(x, params, *, tm=512):
    """MLP + softmax + entropy Pallas kernel.

    x: (B, 4096) float array (f32 or bf16). Returns (probs, entropy), (B, 2) f32.
    """
    B, D = x.shape
    assert D == IN_DIM
    w1, b1, w23p, b23p = params

    tm = _pick_tm(B, tm)
    grid = (pl.cdiv(B, tm),)                # ragged last block padded by Pallas
    const = lambda i: (0, 0)

    # Actual VMEM budget (double-buffered tiles, constant weight blocks) + headroom.
    itemsize = jnp.dtype(x.dtype).itemsize
    vmem_bytes = (2 * tm * IN_DIM * itemsize     # x tiles
                  + 2 * IN_DIM * H1 * 2          # w1 (bf16, constant block)
                  + 2 * H1 * PAD * 2             # folded w23 (bf16)
                  + 2 * (H1 + PAD) * 4           # biases (f32)
                  + 2 * tm * PAD * 4)            # packed output tiles
    vmem_limit = min(vmem_bytes + 4 * 1024 * 1024, 64 * 1024 * 1024)

    packed = pl.pallas_call(
        _mlp_softmax_kernel,
        out_shape=jax.ShapeDtypeStruct((B, PAD), jnp.float32),
        grid_spec=pltpu.PrefetchScalarGridSpec(
            num_scalar_prefetch=0,
            grid=grid,
            in_specs=[
                pl.BlockSpec((tm, IN_DIM), lambda i: (i, 0)),   # x (cast in-kernel)
                pl.BlockSpec((IN_DIM, H1), const),              # w1 resident (bf16)
                pl.BlockSpec((1, H1), const),                   # b1 (f32)
                pl.BlockSpec((H1, PAD), const),                 # folded w23 (bf16)
                pl.BlockSpec((1, PAD), const),                  # folded b23 (f32)
            ],
            out_specs=pl.BlockSpec((tm, PAD), lambda i: (i, 0)),
        ),
        compiler_params=pltpu.CompilerParams(
            dimension_semantics=("parallel",),      # megacore-shardable on v7x
            vmem_limit_bytes=int(vmem_limit),
        ),
    )(x, w1, b1, w23p, b23p)

    probs = packed[:, :NUM_CLASSES]
    ent = packed[:, NUM_CLASSES:2 * NUM_CLASSES]
    return probs, ent


def init_params(key):
    """Deterministic synthetic parameters matching the PyTorch Linear shapes."""
    k1, k2, k3, k4, k5, k6 = jax.random.split(key, 6)
    w1 = jax.random.normal(k1, (IN_DIM, H1), jnp.float32) * (1.0 / IN_DIM ** 0.5)
    b1 = jax.random.normal(k2, (1, H1), jnp.float32) * 0.01
    w2 = jax.random.normal(k3, (H1, H2), jnp.float32) * (1.0 / H1 ** 0.5)
    b2 = jax.random.normal(k4, (1, H2), jnp.float32) * 0.01
    w3 = jax.random.normal(k5, (H2, NUM_CLASSES), jnp.float32) * (1.0 / H2 ** 0.5)
    b3 = jax.random.normal(k6, (1, NUM_CLASSES), jnp.float32) * 0.01

    # Fold Linear(512,32) -> Linear(32,2) into one Linear(512,2): there is no
    # nonlinearity between them and Dropout is identity at inference.
    w23 = w2 @ w3                      # (512, 2)
    b23 = b2 @ w3 + b3                 # (1, 2)

    # Zero-pad the class dim to 128 lanes (pads contribute exact zeros);
    # MXU operands stored as bf16, biases kept in f32.
    w23p = jnp.zeros((H1, PAD), jnp.float32).at[:, :NUM_CLASSES].set(w23)
    b23p = jnp.zeros((1, PAD), jnp.float32).at[:, :NUM_CLASSES].set(b23)
    params = (w1.astype(jnp.bfloat16), b1, w23p.astype(jnp.bfloat16), b23p)
    raw = (w1, b1, w2, b2, w3, b3)
    return params, raw


@functools.partial(jax.jit, static_argnames=("k", "tm"))
def temporal_i3d_sga_std_forward(x, params, k=1, tm=512):
    """Mirrors Temporal_I3D_SGA_STD.forward(x, act=True) with soft_voting=True.

    Returns (pseudo_labels, uncertainty_all):
      pseudo_labels:   (B,)      int32
      uncertainty_all: (k, B, 2) float32
    """
    probs, ent = regressor_forward(x, params, tm=tm)       # (B, 2), (B, 2)

    # k == 1: the PyTorch module builds k heads; here they share one param set.
    logits_all = jnp.stack([probs] * k, axis=1)            # (B, k, 2)
    uncertainty_all = jnp.stack([ent] * k, axis=0)         # (k, B, 2)

    # NOTE: replicates the reference soft-voting glue *verbatim*:
    # mean over the CLASS axis, then argmax over the k heads (trivial for k=1).
    logits_final = logits_all.mean(axis=-1)                # (B, k)
    pseudo_labels = jnp.argmax(logits_final, axis=1)       # (B,)
    return pseudo_labels, uncertainty_all


def _reference_probs_entropy(x, params):
    """Pure-JAX reference mirroring the kernel's bf16 operand rounding."""
    w1, b1, w23p, b23p = params
    f32 = lambda a: a.astype(jnp.float32)
    xf = f32(x.astype(jnp.bfloat16))
    h1 = jnp.maximum(xf @ f32(w1) + b1, 0.0)
    z = f32(h1.astype(jnp.bfloat16)) @ f32(w23p) + b23p
    logits = z[:, :NUM_CLASSES]
    p = jax.nn.softmax(logits, axis=-1)
    return p, -p * jnp.log(p)


def _reference_unfused_f32(x, raw):
    """Unfused f32 path with the original three Linear layers (module spec)."""
    w1, b1, w2, b2, w3, b3 = raw
    h1 = jnp.maximum(x @ w1 + b1, 0.0)
    h2 = h1 @ w2 + b2
    logits = h2 @ w3 + b3
    p = jax.nn.softmax(logits, axis=-1)
    return p, -p * jnp.log(p)


if __name__ == "__main__":
    key = jax.random.PRNGKey(0)
    kx, kp = jax.random.split(key)
    params, raw = init_params(kp)

    # --- small demo batch (module input is (B, 4096)) ---
    B_small = 8
    x_small = jax.random.normal(kx, (B_small, IN_DIM), jnp.float32)
    pseudo_labels, uncertainty_all = temporal_i3d_sga_std_forward(x_small, params)
    jax.block_until_ready((pseudo_labels, uncertainty_all))
    assert pseudo_labels.shape == (B_small,)
    assert uncertainty_all.shape == (1, B_small, 2)

    probs_s, ent_s = regressor_forward(x_small, params)
    p_ref, e_ref = _reference_probs_entropy(x_small, params)
    assert float(jnp.max(jnp.abs(probs_s - p_ref))) < 1e-2
    assert float(jnp.max(jnp.abs(ent_s - e_ref))) < 2e-2

    # Fold faithfulness: folded bf16 kernel vs. the original three-Linear f32 path.
    p_uf, _ = _reference_unfused_f32(x_small, raw)
    assert float(jnp.max(jnp.abs(probs_s - p_uf))) < 3e-2

    # --- larger, non-tile-aligned batch: tm=288, grid=2 (megacore-shardable on
    #     v7x); the ragged last block is padded by Pallas automatically ---
    B_big = 300
    x_big = jax.random.normal(kx, (B_big, IN_DIM), jnp.float32)
    pl_big, unc_big = temporal_i3d_sga_std_forward(x_big, params)
    jax.block_until_ready((pl_big, unc_big))
    assert pl_big.shape == (B_big,)
    assert unc_big.shape == (1, B_big, 2)
    # sanity: exact reciprocal -> entropy of a 2-class softmax is in [0, log 2]
    assert bool(jnp.all(unc_big >= 0.0))
    assert bool(jnp.all(unc_big.sum(-1) <= jnp.log(2.0) + 1e-5))

    p_big, e_big = regressor_forward(x_big, params)
    pr_big, er_big = _reference_probs_entropy(x_big, params)
    assert float(jnp.max(jnp.abs(p_big - pr_big))) < 1e-2
    assert float(jnp.max(jnp.abs(e_big - er_big))) < 2e-2

    print("KERNEL_OK")
</pallas_src>

<mosaic_0001>
module attributes {stable_mosaic.version = 11 : i64} {
  func.func @_mlp_softmax_kernel(%arg0: i32, %arg1: memref<8x4096xf32, #tpu.memory_space<vmem>>, %arg2: memref<4096x512xbf16, #tpu.memory_space<vmem>>, %arg3: memref<1x512xf32, #tpu.memory_space<vmem>>, %arg4: memref<512x128xbf16, #tpu.memory_space<vmem>>, %arg5: memref<1x128xf32, #tpu.memory_space<vmem>>, %arg6: memref<8x128xf32, #tpu.memory_space<vmem>>) attributes {dimension_semantics = [#tpu.dimension_semantics<parallel>], iteration_bounds = array<i64: 1>, scalar_prefetch = 0 : i64, scratch_operands = 0 : i64, tpu.core_type = #tpu.core_type<tc>, window_params = [{transform_indices = @transform_0, window_bounds = array<i64: 8, 4096>}, {pipeline_mode = #tpu.pipeline_mode<synchronous>, transform_indices = @transform_1, window_bounds = array<i64: 4096, 512>}, {pipeline_mode = #tpu.pipeline_mode<synchronous>, transform_indices = @transform_2, window_bounds = array<i64: 1, 512>}, {pipeline_mode = #tpu.pipeline_mode<synchronous>, transform_indices = @transform_3, window_bounds = array<i64: 512, 128>}, {pipeline_mode = #tpu.pipeline_mode<synchronous>, transform_indices = @transform_4, window_bounds = array<i64: 1, 128>}, {transform_indices = @transform_5, window_bounds = array<i64: 8, 128>}]} {
    %c0 = arith.constant 0 : index
    %c0_0 = arith.constant 0 : index
    %0 = vector.load %arg1[%c0, %c0_0] : memref<8x4096xf32, #tpu.memory_space<vmem>>, vector<8x4096xf32>
    %1 = arith.truncf %0 : vector<8x4096xf32> to vector<8x4096xbf16>
    %c0_1 = arith.constant 0 : index
    %c0_2 = arith.constant 0 : index
    %2 = vector.load %arg2[%c0_1, %c0_2] : memref<4096x512xbf16, #tpu.memory_space<vmem>>, vector<4096x512xbf16>
    %cst = arith.constant dense<0.000000e+00> : vector<8x512xf32>
    %3 = tpu.matmul %1, %2, %cst {dimension_numbers = #tpu.dot_dimension_numbers<[1], [0], [0], [1], [0, 0, 1, 1], [], []>} : vector<8x4096xbf16>, vector<4096x512xbf16>, vector<8x512xf32> -> vector<8x512xf32>
    %c0_3 = arith.constant 0 : index
    %c0_4 = arith.constant 0 : index
    %4 = vector.load %arg3[%c0_3, %c0_4] : memref<1x512xf32, #tpu.memory_space<vmem>>, vector<1x512xf32>
    %5 = vector.broadcast %4 : vector<1x512xf32> to vector<8x512xf32>
    %6 = arith.addf %3, %5 : vector<8x512xf32>
    %cst_5 = arith.constant 0.000000e+00 : f32
    %7 = vector.broadcast %cst_5 : f32 to vector<8x512xf32>
    %8 = arith.maximumf %6, %7 : vector<8x512xf32>
    %9 = arith.truncf %8 : vector<8x512xf32> to vector<8x512xbf16>
    %c0_6 = arith.constant 0 : index
    %c0_7 = arith.constant 0 : index
    %10 = vector.load %arg4[%c0_6, %c0_7] : memref<512x128xbf16, #tpu.memory_space<vmem>>, vector<512x128xbf16>
    %cst_8 = arith.constant dense<0.000000e+00> : vector<8x128xf32>
    %11 = tpu.matmul %9, %10, %cst_8 {dimension_numbers = #tpu.dot_dimension_numbers<[1], [0], [0], [1], [0, 0, 1, 1], [], []>} : vector<8x512xbf16>, vector<512x128xbf16>, vector<8x128xf32> -> vector<8x128xf32>
    %c0_9 = arith.constant 0 : index
    %c0_10 = arith.constant 0 : index
    %12 = vector.load %arg5[%c0_9, %c0_10] : memref<1x128xf32, #tpu.memory_space<vmem>>, vector<1x128xf32>
    %13 = vector.broadcast %12 : vector<1x128xf32> to vector<8x128xf32>
    %14 = arith.addf %11, %13 : vector<8x128xf32>
    %15 = tpu.iota {dimensions = array<i32: 1>} : vector<8x128xi32>
    %c2_i32 = arith.constant 2 : i32
    %16 = vector.broadcast %c2_i32 : i32 to vector<8x128xi32>
    %17 = arith.cmpi slt, %15, %16 : vector<8x128xi32>
    %cst_11 = arith.constant -1.000000e+30 : f32
    %18 = vector.broadcast %cst_11 : f32 to vector<8x128xf32>
    %19 = arith.select %17, %14, %18 : vector<8x128xi1>, vector<8x128xf32>
    %cst_12 = arith.constant dense<0xFF800000> : vector<8xf32>
    %20 = vector.multi_reduction <maximumf>, %19, %cst_12 [1] : vector<8x128xf32> to vector<8xf32>
    %21 = vector.shape_cast %20 : vector<8xf32> to vector<8x1xf32>
    %22 = vector.broadcast %21 : vector<8x1xf32> to vector<8x128xf32>
    %23 = arith.subf %19, %22 : vector<8x128xf32>
    %24 = math.exp %23 : vector<8x128xf32>
    %cst_13 = arith.constant dense<0.000000e+00> : vector<8xf32>
    %25 = vector.multi_reduction <add>, %24, %cst_13 [1] : vector<8x128xf32> to vector<8xf32>
    %26 = vector.shape_cast %25 : vector<8xf32> to vector<8x1xf32>
    %27 = tpu.reciprocal %26 : vector<8x1xf32> -> vector<8x1xf32>
    %28 = vector.broadcast %27 : vector<8x1xf32> to vector<8x128xf32>
    %29 = arith.mulf %24, %28 : vector<8x128xf32>
    %30 = math.log %26 : vector<8x1xf32>
    %31 = vector.broadcast %30 : vector<8x1xf32> to vector<8x128xf32>
    %32 = arith.subf %23, %31 : vector<8x128xf32>
    %cst_14 = arith.constant 0.000000e+00 : f32
    %33 = vector.broadcast %cst_14 : f32 to vector<8x128xf32>
    %34 = arith.subf %33, %29 : vector<8x128xf32>
    %35 = arith.mulf %34, %32 : vector<8x128xf32>
    %c2_i32_15 = arith.constant 2 : i32
    %36 = vector.broadcast %c2_i32_15 : i32 to vector<8x128xi32>
    %37 = arith.cmpi slt, %15, %36 : vector<8x128xi32>
    %c2_i32_16 = arith.constant 2 : i32
    %38 = tpu.dynamic_rotate %35 by %c2_i32_16 dim 1 : vector<8x128xf32>, i32 -> vector<8x128xf32>
    %39 = arith.select %37, %29, %38 : vector<8x128xi1>, vector<8x128xf32>
    %c0_17 = arith.constant 0 : index
    %c0_18 = arith.constant 0 : index
    %40 = vector.load %arg6[%c0_17, %c0_18] : memref<8x128xf32, #tpu.memory_space<vmem>>, vector<8x128xf32>
    tpu.vector_store %arg6[%c0_17, %c0_18], %39 {strides = array<i32>} : memref<8x128xf32, #tpu.memory_space<vmem>>, vector<8x128xf32>,
    return
  }
  func.func @transform_0(%arg0: i32) -> (i32, i32) {
    %c0_i32 = arith.constant 0 : i32
    %c0_i32_0 = arith.constant 0 : i32
    return %arg0, %c0_i32 : i32, i32
  }
  func.func @transform_1(%arg0: i32) -> (i32, i32) {
    %c0_i32 = arith.constant 0 : i32
    %c0_i32_0 = arith.constant 0 : i32
    %c0_i32_1 = arith.constant 0 : i32
    return %c0_i32, %c0_i32_0 : i32, i32
  }
  func.func @transform_2(%arg0: i32) -> (i32, i32) {
    %c0_i32 = arith.constant 0 : i32
    %c0_i32_0 = arith.constant 0 : i32
    %c0_i32_1 = arith.constant 0 : i32
    return %c0_i32, %c0_i32_0 : i32, i32
  }
  func.func @transform_3(%arg0: i32) -> (i32, i32) {
    %c0_i32 = arith.constant 0 : i32
    %c0_i32_0 = arith.constant 0 : i32
    %c0_i32_1 = arith.constant 0 : i32
    return %c0_i32, %c0_i32_0 : i32, i32
  }
  func.func @transform_4(%arg0: i32) -> (i32, i32) {
    %c0_i32 = arith.constant 0 : i32
    %c0_i32_0 = arith.constant 0 : i32
    %c0_i32_1 = arith.constant 0 : i32
    return %c0_i32, %c0_i32_0 : i32, i32
  }
  func.func @transform_5(%arg0: i32) -> (i32, i32) {
    %c0_i32 = arith.constant 0 : i32
    %c0_i32_0 = arith.constant 0 : i32
    return %arg0, %c0_i32 : i32, i32
  }
}

</mosaic_0001>

<bundles_post_ra>
// kernel: temporal_i3d_sga_std_forward.1
= control target key start
LH: loop header
LB: loop body
LE: loop exit
PB: predicated region body
PF: predicated region fallthrough
CT: control target
= control target key end

     0   :  { %10 = vsyncpa [#allocation3], 0  ;;  %s11065_s0 = inlined_call_operand.hbm [shape: f32[8,4096], index: 0, kind: input, shape index: {}]   ;;  %s11066_s1 = inlined_call_operand.hbm [shape: bf16[4096,512], index: 1, kind: input, shape index: {}]   ;;  %s11067_s2 = inlined_call_operand.hbm [shape: f32[1,512], index: 2, kind: input, shape index: {}]   ;;  %s11068_s3 = inlined_call_operand.hbm [shape: bf16[512,128], index: 3, kind: input, shape index: {}]   ;;  %s11069_s4 = inlined_call_operand.hbm [shape: f32[1,128], index: 4, kind: input, shape index: {}]   ;;  %s11070_s5 = inlined_call_operand.vmem [shape: f32[8,128], index: 5, kind: output, shape index: {}]  }
   0x1   :  { %11 = vsyncpa [#allocation5], 0 }
   0x2   :  { %12 = vsyncpa [#allocation8], 0  ;;  %s10797_s18 = smov [#allocation4]  }
   0x3   :  { %s28_s19 = sshll.u32 %s10797_s18, 4  ;;  %s29_s19 = int_to_ptr.vmem [resolvable:$true] %s28_s19 }
   0x4   :  { %s10699_s20 = scalar_lea.vmem %s29_s19, 131072  ;;  %p10704_p1 = scmp.lt.s32.totalorder %s29_s19, %s29_s19 }
   0x5   :  { %p10700_p0 = scmp.ne.s32.totalorder %s29_s19, %s10699_s20  ;;  %p10705_p2 = scmp.lt.s32.totalorder %s10699_s20, %s10699_s20 }
   0x7   :  { %p10706_p3 = por %p10705_p2, %p10704_p1 }
   0x9   :  { %p10707_p4 = pnand %p10706_p3, %p10700_p0 }
   0xb   :  { %10710 = shalt.err (!%p10707_p4)
}
   0xc   :  { %s10798_s21 = smov 256   ;;  %s10799_s22 = smov 16  }
   0xd   :  { %34 = dma.hbm_to_vmem [thread:$0]  %s11066_s1, 131072, %s29_s19, [#allocation5], %s10798_s21, %s10798_s21, %s10799_s22  }
   0xe   :  { %s10800_s25 = smov [#allocation7]  }
   0xf   :  { %s50_s26 = sshll.u32 %s10800_s25, 4  ;;  %s51_s26 = int_to_ptr.vmem [resolvable:$true] %s50_s26 }
  0x10   :  { %s10719_s27 = scalar_lea.vmem %s51_s26, 4096  ;;  %p10724_p6 = scmp.lt.s32.totalorder %s51_s26, %s51_s26 }
  0x11   :  { %p10720_p5 = scmp.ne.s32.totalorder %s51_s26, %s10719_s27  ;;  %p10725_p7 = scmp.lt.s32.totalorder %s10719_s27, %s10719_s27 }
  0x13   :  { %p10726_p8 = por %p10725_p7, %p10724_p6 }
  0x15   :  { %p10727_p9 = pnand %p10726_p8, %p10720_p5 }
  0x17   :  { %10730 = shalt.err (!%p10727_p9)
}
  0x18   :  { %s10801_s28 = smov 64   ;;  %s10802_s29 = smov 4  }
  0x19   :  { %56 = dma.hbm_to_vmem [thread:$0]  %s11068_s3, 4096, %s51_s26, [#allocation8], %s10801_s28, %s10801_s28, %s10802_s29  }
  0x1a   :  { %s10803_s7 = smov [#allocation2]   ;;  %s10804_s9 = smov [#allocation6]  }
  0x1b   :  { %s19_s8 = sshll.u32 %s10803_s7, 4  ;;  %s41_s1 = sshll.u32 %s10804_s9, 4  ;;  %s20_s8 = int_to_ptr.vmem [resolvable:$true] %s19_s8  ;;  %s42_s1 = int_to_ptr.vmem [resolvable:$true] %s41_s1 }
  0x1c   :  { %s10739_s10 = scalar_lea.vmem %s20_s8, 4096  ;;  %p10744_p11 = scmp.lt.s32.totalorder %s20_s8, %s20_s8 }
  0x1d   :  { %p10740_p10 = scmp.ne.s32.totalorder %s20_s8, %s10739_s10  ;;  %p10745_p12 = scmp.lt.s32.totalorder %s10739_s10, %s10739_s10 }
  0x1f   :  { %p10746_p13 = por %p10745_p12, %p10744_p11 }
  0x21   :  { %p10747_p0 = pnand %p10746_p13, %p10740_p10 }
  0x23   :  { %10750 = shalt.err (!%p10747_p0)
}
  0x24   :  { %22 = dma.hbm_to_vmem [thread:$0]  %s11065_s0, 4096, %s20_s8, [#allocation3]  }
  0x25   :  { %s10759_s13 = scalar_lea.vmem %s42_s1, 64  ;;  %p10764_p2 = scmp.lt.s32.totalorder %s42_s1, %s42_s1 }
  0x26   :  { %p10760_p1 = scmp.ne.s32.totalorder %s42_s1, %s10759_s13  ;;  %p10765_p3 = scmp.lt.s32.totalorder %s10759_s13, %s10759_s13 }
  0x28   :  { %p10766_p4 = por %p10765_p3, %p10764_p2 }
  0x2a   :  { %p10767_p5 = pnand %p10766_p4, %p10760_p1 }
  0x2c   :  { %10770 = shalt.err (!%p10767_p5)
}
  0x2d   :  { %44 = dma.hbm_to_vmem [thread:$0]  %s11067_s2, 64, %s42_s1, [#allocation5]  }
  0x2e   :  { %s10805_s15 = smov [#allocation9]  }
  0x2f   :  { %s63_s16 = sshll.u32 %s10805_s15, 4  ;;  %s64_s16 = int_to_ptr.vmem [resolvable:$true] %s63_s16 }
  0x30   :  { %s10779_s17 = scalar_lea.vmem %s64_s16, 16  ;;  %s10783_s18 = scalar_lea.vmem %s64_s16, 32 }
  0x31   :  { %p10780_p6 = scmp.ne.s32.totalorder %s64_s16, %s10779_s17  ;;  %p10784_p7 = scmp.lt.s32.totalorder %s64_s16, %s64_s16 }
  0x32   :  { %p10785_p8 = scmp.lt.s32.totalorder %s10783_s18, %s10779_s17 }
  0x34   :  { %p10786_p9 = por %p10785_p8, %p10784_p7 }
  0x36   :  { %p10787_p10 = pnand %p10786_p9, %p10780_p6 }
  0x38   :  { %10790 = shalt.err (!%p10787_p10)
}
  0x39   :  { %66 = dma.hbm_to_vmem [thread:$0]  %s11069_s4, 16, %s64_s16, [#allocation8]  }
  0x3a   :  { %10791 = dma.done.wait [#allocation3], 4096  }
  0x3b   :  { %10792 = vsyncadd [#allocation3], 4294963200 }
  0x3c   :  { %10793 = dma.done.wait [#allocation5], 131136  }
  0x3d   :  { %10794 = vsyncadd [#allocation5], 4294836160 }
  0x3e   :  { %10795 = dma.done.wait [#allocation8], 4112  }
  0x3f   :  { %10796 = vsyncadd [#allocation8], 4294963184  ;;  %v9116_v0 = vld [vmem:[#allocation4 + $0xe4] ss:$16 sps:$4 sm:$0xff]   ;;  %v9120_v2 = vld [vmem:[#allocation4 + $0xe0] ss:$16 sps:$4 sm:$0xff]  }
  0x40   :  { %v9118_v1 = vld [vmem:[#allocation4 + $0x2e4] ss:$16 sps:$4 sm:$0xff]   ;;  %6313 = vmatprep.subr.bf16.mxu0 %v9116_v0  ;;  %v9121_v3 = vld [vmem:[#allocation4 + $0x2e0] ss:$16 sps:$4 sm:$0xff]   ;;  %v84_v46 = vld [vmem:[#allocation2 + $0x8] sm:$0xff]  ;;  %s10806_s2 = smov 2  }
  0x41   :  { %6354 = vmatprep.subr.bf16.mxu1 %v9118_v1  ;;  %v9122_v4 = vld [vmem:[#allocation4 + $0xc4] ss:$16 sps:$4 sm:$0xff]   ;;  %6314 = vmatpush1.bf16.msra.mxu0 %v9120_v2  ;;  %v9126_v6 = vld [vmem:[#allocation4 + $0xc0] ss:$16 sps:$4 sm:$0xff]   ;;  %v10852_v49 = vpack.c.bf16 %v84_v46, %v84_v46  ;;  %v86_v50 = vld [vmem:[#allocation2 + $0x18] sm:$0xff] }
  0x42   :  { %6355 = vmatpush1.bf16.msra.mxu1 %v9121_v3  ;;  %v9124_v5 = vld [vmem:[#allocation4 + $0x2c4] ss:$16 sps:$4 sm:$0xff]   ;;  %6315 = vmatprep.subr.bf16.mxu0 %v9122_v4  ;;  %v9127_v7 = vld [vmem:[#allocation4 + $0x2c0] ss:$16 sps:$4 sm:$0xff]   ;;  %v10854_v52 = vpack.c.bf16 %v86_v50, %v86_v50 }
  0x43   :  { %6356 = vmatprep.subr.bf16.mxu1 %v9124_v5  ;;  %v9128_v8 = vld [vmem:[#allocation4 + $0xa4] ss:$16 sps:$4 sm:$0xff]   ;;  %v9132_v10 = vld [vmem:[#allocation4 + $0xa0] ss:$16 sps:$4 sm:$0xff]   ;;  %6345 = vmatprep.mubr.bf16.mxu0 %v10852_v49 }
  0x44   :  { %v9130_v9 = vld [vmem:[#allocation4 + $0x2a4] ss:$16 sps:$4 sm:$0xff]   ;;  %v9133_v11 = vld [vmem:[#allocation4 + $0x2a0] ss:$16 sps:$4 sm:$0xff]   ;;  %6386 = vmatprep.mubr.bf16.mxu1 %v10854_v52 }
  0x45   :  { %6316 = vmatpush1.bf16.msra.mxu0 %v9126_v6  ;;  %v9134_v12 = vld [vmem:[#allocation4 + $0x84] ss:$16 sps:$4 sm:$0xff]   ;;  %v9138_v14 = vld [vmem:[#allocation4 + $0x80] ss:$16 sps:$4 sm:$0xff]  }
  0x46   :  { %6357 = vmatpush1.bf16.msra.mxu1 %v9127_v7  ;;  %6317 = vmatprep.subr.bf16.mxu0 %v9128_v8  ;;  %v9136_v13 = vld [vmem:[#allocation4 + $0x284] ss:$16 sps:$4 sm:$0xff]   ;;  %v9139_v15 = vld [vmem:[#allocation4 + $0x280] ss:$16 sps:$4 sm:$0xff]  }
  0x47   :  { %6358 = vmatprep.subr.bf16.mxu1 %v9130_v9  ;;  %v9140_v16 = vld [vmem:[#allocation4 + $0x64] ss:$16 sps:$4 sm:$0xff]   ;;  %v9144_v18 = vld [vmem:[#allocation4 + $0x60] ss:$16 sps:$4 sm:$0xff]  }
  0x48   :  { %v9142_v17 = vld [vmem:[#allocation4 + $0x264] ss:$16 sps:$4 sm:$0xff]   ;;  %v9145_v19 = vld [vmem:[#allocation4 + $0x260] ss:$16 sps:$4 sm:$0xff]  }
  0x49   :  { %6318 = vmatpush1.bf16.msra.mxu0 %v9132_v10  ;;  %v9146_v20 = vld [vmem:[#allocation4 + $0x44] ss:$16 sps:$4 sm:$0xff]   ;;  %v9150_v22 = vld [vmem:[#allocation4 + $0x40] ss:$16 sps:$4 sm:$0xff]  }
  0x4a   :  { %6359 = vmatpush1.bf16.msra.mxu1 %v9133_v11  ;;  %6319 = vmatprep.subr.bf16.mxu0 %v9134_v12  ;;  %v9148_v21 = vld [vmem:[#allocation4 + $0x244] ss:$16 sps:$4 sm:$0xff]   ;;  %v9151_v23 = vld [vmem:[#allocation4 + $0x240] ss:$16 sps:$4 sm:$0xff]  }
  0x4b   :  { %6360 = vmatprep.subr.bf16.mxu1 %v9136_v13  ;;  %v9152_v24 = vld [vmem:[#allocation4 + $0x24] ss:$16 sps:$4 sm:$0xff]   ;;  %v9156_v26 = vld [vmem:[#allocation4 + $0x20] ss:$16 sps:$4 sm:$0xff]  }
  0x4c   :  { %v9154_v25 = vld [vmem:[#allocation4 + $0x224] ss:$16 sps:$4 sm:$0xff]   ;;  %v9157_v27 = vld [vmem:[#allocation4 + $0x220] ss:$16 sps:$4 sm:$0xff]  }
  0x4d   :  { %6320 = vmatpush1.bf16.msra.mxu0 %v9138_v14  ;;  %v9158_v28 = vld [vmem:[#allocation4 + $0x4] ss:$16 sps:$4 sm:$0xff]   ;;  %v9162_v30 = vld [vmem:[#allocation4] ss:$16 sps:$4 sm:$0xff]  }
  0x4e   :  { %6361 = vmatpush1.bf16.msra.mxu1 %v9139_v15  ;;  %6321 = vmatprep.subr.bf16.mxu0 %v9140_v16  ;;  %v9160_v29 = vld [vmem:[#allocation4 + $0x204] ss:$16 sps:$4 sm:$0xff]   ;;  %v9163_v31 = vld [vmem:[#allocation4 + $0x200] ss:$16 sps:$4 sm:$0xff]  }
  0x4f   :  { %6362 = vmatprep.subr.bf16.mxu1 %v9142_v17  ;;  %v9164_v32 = vld [vmem:[#allocation4 + $0x1e4] ss:$16 sps:$4 sm:$0xff]   ;;  %v9168_v34 = vld [vmem:[#allocation4 + $0x1e0] ss:$16 sps:$4 sm:$0xff]  }
  0x50   :  { %v9166_v33 = vld [vmem:[#allocation4 + $0x3e4] ss:$16 sps:$4 sm:$0xff]   ;;  %v9169_v35 = vld [vmem:[#allocation4 + $0x3e0] ss:$16 sps:$4 sm:$0xff]  }
  0x51   :  { %6322 = vmatpush1.bf16.msra.mxu0 %v9144_v18  ;;  %v9170_v36 = vld [vmem:[#allocation4 + $0x1c4] ss:$16 sps:$4 sm:$0xff]   ;;  %v9174_v38 = vld [vmem:[#allocation4 + $0x1c0] ss:$16 sps:$4 sm:$0xff]  }
  0x52   :  { %6363 = vmatpush1.bf16.msra.mxu1 %v9145_v19  ;;  %6323 = vmatprep.subr.bf16.mxu0 %v9146_v20  ;;  %v9172_v37 = vld [vmem:[#allocation4 + $0x3c4] ss:$16 sps:$4 sm:$0xff]   ;;  %v9175_v39 = vld [vmem:[#allocation4 + $0x3c0] ss:$16 sps:$4 sm:$0xff]  }
  0x53   :  { %6364 = vmatprep.subr.bf16.mxu1 %v9148_v21  ;;  %v9176_v40 = vld [vmem:[#allocation4 + $0x1a4] ss:$16 sps:$4 sm:$0xff]   ;;  %v9180_v42 = vld [vmem:[#allocation4 + $0x1a0] ss:$16 sps:$4 sm:$0xff]  }
  0x54   :  { %v9178_v41 = vld [vmem:[#allocation4 + $0x3a4] ss:$16 sps:$4 sm:$0xff]   ;;  %v9181_v43 = vld [vmem:[#allocation4 + $0x3a0] ss:$16 sps:$4 sm:$0xff]  }
  0x55   :  { %6324 = vmatpush1.bf16.msra.mxu0 %v9150_v22  ;;  %v9182_v44 = vld [vmem:[#allocation4 + $0x184] ss:$16 sps:$4 sm:$0xff]   ;;  %v9186_v47 = vld [vmem:[#allocation4 + $0x180] ss:$16 sps:$4 sm:$0xff]  }
  0x56   :  { %6365 = vmatpush1.bf16.msra.mxu1 %v9151_v23  ;;  %6325 = vmatprep.subr.bf16.mxu0 %v9152_v24  ;;  %v9184_v45 = vld [vmem:[#allocation4 + $0x384] ss:$16 sps:$4 sm:$0xff]   ;;  %v9187_v48 = vld [vmem:[#allocation4 + $0x380] ss:$16 sps:$4 sm:$0xff]  }
  0x57   :  { %6366 = vmatprep.subr.bf16.mxu1 %v9154_v25  ;;  %v9188_v51 = vld [vmem:[#allocation4 + $0x164] ss:$16 sps:$4 sm:$0xff]   ;;  %v9192_v54 = vld [vmem:[#allocation4 + $0x160] ss:$16 sps:$4 sm:$0xff]  }
  0x58   :  { %v9190_v53 = vld [vmem:[#allocation4 + $0x364] ss:$16 sps:$4 sm:$0xff]   ;;  %v9193_v55 = vld [vmem:[#allocation4 + $0x360] ss:$16 sps:$4 sm:$0xff]  }
  0x59   :  { %6326 = vmatpush1.bf16.msra.mxu0 %v9156_v26  ;;  %v9194_v56 = vld [vmem:[#allocation4 + $0x144] ss:$16 sps:$4 sm:$0xff]   ;;  %v9198_v58 = vld [vmem:[#allocation4 + $0x140] ss:$16 sps:$4 sm:$0xff]  }
  0x5a   :  { %6367 = vmatpush1.bf16.msra.mxu1 %v9157_v27  ;;  %6327 = vmatprep.subr.bf16.mxu0 %v9158_v28  ;;  %v9196_v57 = vld [vmem:[#allocation4 + $0x344] ss:$16 sps:$4 sm:$0xff]   ;;  %v9199_v59 = vld [vmem:[#allocation4 + $0x340] ss:$16 sps:$4 sm:$0xff]  }
  0x5b   :  { %6368 = vmatprep.subr.bf16.mxu1 %v9160_v29  ;;  %v9200_v60 = vld [vmem:[#allocation4 + $0x124] ss:$16 sps:$4 sm:$0xff]   ;;  %v9204_v62 = vld [vmem:[#allocation4 + $0x120] ss:$16 sps:$4 sm:$0xff]  }
  0x5c   :  { %v9202_v61 = vld [vmem:[#allocation4 + $0x324] ss:$16 sps:$4 sm:$0xff]   ;;  %v9205_v63 = vld [vmem:[#allocation4 + $0x320] ss:$16 sps:$4 sm:$0xff]  }
  0x5d   :  { %6328 = vmatpush1.bf16.msra.mxu0 %v9162_v30  ;;  %v9206_v0 = vld [vmem:[#allocation4 + $0x104] ss:$16 sps:$4 sm:$0xff]   ;;  %v9210_v2 = vld [vmem:[#allocation4 + $0x100] ss:$16 sps:$4 sm:$0xff]  }
  0x5e   :  { %6369 = vmatpush1.bf16.msra.mxu1 %v9163_v31  ;;  %6329 = vmatprep.subr.bf16.mxu0 %v9164_v32  ;;  %v9208_v1 = vld [vmem:[#allocation4 + $0x304] ss:$16 sps:$4 sm:$0xff]   ;;  %v9211_v3 = vld [vmem:[#allocation4 + $0x300] ss:$16 sps:$4 sm:$0xff]  }
  0x5f   :  { %6370 = vmatprep.subr.bf16.mxu1 %v9166_v33  ;;  %v83_v4 = vld [vmem:[#allocation2] sm:$0xff]  ;;  %v85_v5 = vld [vmem:[#allocation2 + $0x10] sm:$0xff] }
  0x60   :  { %v9214_v6 = vld [vmem:[#allocation4 + $0x4e4] ss:$16 sps:$4 sm:$0xff]   ;;  %v10858_v8 = vpack.c.bf16 %v83_v4, %v83_v4  ;;  %v10860_v9 = vpack.c.bf16 %v85_v5, %v85_v5  ;;  %v9212_v10 = vld [vmem:[#allocation4 + $0x4e0] ss:$16 sps:$4 sm:$0xff]  }
  0x61   :  { %6330 = vmatpush2.bf16.msra.mxu0 %v9168_v34  ;;  %v9217_v7 = vld [vmem:[#allocation4 + $0x6e4] ss:$16 sps:$4 sm:$0xff]   ;;  %v9215_v11 = vld [vmem:[#allocation4 + $0x6e0] ss:$16 sps:$4 sm:$0xff]   ;;  %v88_v34 = vld [vmem:[#allocation2 + $0x28] sm:$0xff] }
  0x62   :  { %6371 = vmatpush2.bf16.msra.mxu1 %v9169_v35  ;;  %6331 = vmatprep.subr.bf16.mxu0 %v9170_v36  ;;  %v9220_v12 = vld [vmem:[#allocation4 + $0x4c4] ss:$16 sps:$4 sm:$0xff]   ;;  %v9218_v14 = vld [vmem:[#allocation4 + $0x4c0] ss:$16 sps:$4 sm:$0xff]  }
  0x63   :  { %6372 = vmatprep.subr.bf16.mxu1 %v9172_v37  ;;  %v9223_v13 = vld [vmem:[#allocation4 + $0x6c4] ss:$16 sps:$4 sm:$0xff]   ;;  %v9221_v15 = vld [vmem:[#allocation4 + $0x6c0] ss:$16 sps:$4 sm:$0xff]   ;;  %v10864_v37 = vpack.c.bf16 %v88_v34, %v88_v34 }
  0x64   :  { %v9226_v16 = vld [vmem:[#allocation4 + $0x4a4] ss:$16 sps:$4 sm:$0xff]   ;;  %v9224_v18 = vld [vmem:[#allocation4 + $0x4a0] ss:$16 sps:$4 sm:$0xff]  }
  0x65   :  { %6332 = vmatpush2.bf16.msra.mxu0 %v9174_v38  ;;  %v9229_v17 = vld [vmem:[#allocation4 + $0x6a4] ss:$16 sps:$4 sm:$0xff]   ;;  %v9227_v19 = vld [vmem:[#allocation4 + $0x6a0] ss:$16 sps:$4 sm:$0xff]   ;;  %v90_v38 = vld [vmem:[#allocation2 + $0x38] sm:$0xff] }
  0x66   :  { %6373 = vmatpush2.bf16.msra.mxu1 %v9175_v39  ;;  %6333 = vmatprep.subr.bf16.mxu0 %v9176_v40  ;;  %v9232_v20 = vld [vmem:[#allocation4 + $0x484] ss:$16 sps:$4 sm:$0xff]   ;;  %v9230_v22 = vld [vmem:[#allocation4 + $0x480] ss:$16 sps:$4 sm:$0xff]   ;;  %v10866_v40 = vpack.c.bf16 %v90_v38, %v90_v38 }
  0x67   :  { %6374 = vmatprep.subr.bf16.mxu1 %v9178_v41  ;;  %v9235_v21 = vld [vmem:[#allocation4 + $0x684] ss:$16 sps:$4 sm:$0xff]   ;;  %v9233_v23 = vld [vmem:[#allocation4 + $0x680] ss:$16 sps:$4 sm:$0xff]  }
  0x68   :  { %v9238_v24 = vld [vmem:[#allocation4 + $0x464] ss:$16 sps:$4 sm:$0xff]   ;;  %v9236_v26 = vld [vmem:[#allocation4 + $0x460] ss:$16 sps:$4 sm:$0xff]  }
  0x69   :  { %6334 = vmatpush2.bf16.msra.mxu0 %v9180_v42  ;;  %v9241_v25 = vld [vmem:[#allocation4 + $0x664] ss:$16 sps:$4 sm:$0xff]   ;;  %v9239_v27 = vld [vmem:[#allocation4 + $0x660] ss:$16 sps:$4 sm:$0xff]  }
  0x6a   :  { %6375 = vmatpush2.bf16.msra.mxu1 %v9181_v43  ;;  %6335 = vmatprep.subr.bf16.mxu0 %v9182_v44  ;;  %v9244_v28 = vld [vmem:[#allocation4 + $0x444] ss:$16 sps:$4 sm:$0xff]   ;;  %v9242_v30 = vld [vmem:[#allocation4 + $0x440] ss:$16 sps:$4 sm:$0xff]  }
  0x6b   :  { %6376 = vmatprep.subr.bf16.mxu1 %v9184_v45  ;;  %v9247_v29 = vld [vmem:[#allocation4 + $0x644] ss:$16 sps:$4 sm:$0xff]   ;;  %v9245_v31 = vld [vmem:[#allocation4 + $0x640] ss:$16 sps:$4 sm:$0xff]  }
  0x6c   :  { %v9250_v32 = vld [vmem:[#allocation4 + $0x424] ss:$16 sps:$4 sm:$0xff]   ;;  %v9248_v35 = vld [vmem:[#allocation4 + $0x420] ss:$16 sps:$4 sm:$0xff]  }
  0x6d   :  { %6336 = vmatpush2.bf16.msra.mxu0 %v9186_v47  ;;  %v9253_v33 = vld [vmem:[#allocation4 + $0x624] ss:$16 sps:$4 sm:$0xff]   ;;  %v9251_v36 = vld [vmem:[#allocation4 + $0x620] ss:$16 sps:$4 sm:$0xff]  }
  0x6e   :  { %6377 = vmatpush2.bf16.msra.mxu1 %v9187_v48  ;;  %6337 = vmatprep.subr.bf16.mxu0 %v9188_v51  ;;  %v9256_v39 = vld [vmem:[#allocation4 + $0x404] ss:$16 sps:$4 sm:$0xff]   ;;  %v9254_v42 = vld [vmem:[#allocation4 + $0x400] ss:$16 sps:$4 sm:$0xff]  }
  0x6f   :  { %6378 = vmatprep.subr.bf16.mxu1 %v9190_v53  ;;  %v9259_v41 = vld [vmem:[#allocation4 + $0x604] ss:$16 sps:$4 sm:$0xff]   ;;  %v9257_v43 = vld [vmem:[#allocation4 + $0x600] ss:$16 sps:$4 sm:$0xff]  }
  0x70   :  { %v9262_v44 = vld [vmem:[#allocation4 + $0x5e4] ss:$16 sps:$4 sm:$0xff]   ;;  %v9260_v46 = vld [vmem:[#allocation4 + $0x5e0] ss:$16 sps:$4 sm:$0xff]  }
  0x71   :  { %6338 = vmatpush2.bf16.msra.mxu0 %v9192_v54  ;;  %v9265_v45 = vld [vmem:[#allocation4 + $0x7e4] ss:$16 sps:$4 sm:$0xff]   ;;  %v9263_v47 = vld [vmem:[#allocation4 + $0x7e0] ss:$16 sps:$4 sm:$0xff]  }
  0x72   :  { %6379 = vmatpush2.bf16.msra.mxu1 %v9193_v55  ;;  %6339 = vmatprep.subr.bf16.mxu0 %v9194_v56  ;;  %v9268_v48 = vld [vmem:[#allocation4 + $0x5c4] ss:$16 sps:$4 sm:$0xff]   ;;  %v9266_v51 = vld [vmem:[#allocation4 + $0x5c0] ss:$16 sps:$4 sm:$0xff]  }
  0x73   :  { %6380 = vmatprep.subr.bf16.mxu1 %v9196_v57  ;;  %v9271_v50 = vld [vmem:[#allocation4 + $0x7c4] ss:$16 sps:$4 sm:$0xff]   ;;  %v9269_v53 = vld [vmem:[#allocation4 + $0x7c0] ss:$16 sps:$4 sm:$0xff]  }
  0x74   :  { %v9274_v54 = vld [vmem:[#allocation4 + $0x5a4] ss:$16 sps:$4 sm:$0xff]   ;;  %v9272_v56 = vld [vmem:[#allocation4 + $0x5a0] ss:$16 sps:$4 sm:$0xff]  }
  0x75   :  { %6340 = vmatpush2.bf16.msra.mxu0 %v9198_v58  ;;  %v9277_v55 = vld [vmem:[#allocation4 + $0x7a4] ss:$16 sps:$4 sm:$0xff]   ;;  %v9275_v57 = vld [vmem:[#allocation4 + $0x7a0] ss:$16 sps:$4 sm:$0xff]  }
  0x76   :  { %6381 = vmatpush2.bf16.msra.mxu1 %v9199_v59  ;;  %6341 = vmatprep.subr.bf16.mxu0 %v9200_v60  ;;  %v9280_v58 = vld [vmem:[#allocation4 + $0x584] ss:$16 sps:$4 sm:$0xff]   ;;  %v9278_v60 = vld [vmem:[#allocation4 + $0x580] ss:$16 sps:$4 sm:$0xff]  }
  0x77   :  { %6382 = vmatprep.subr.bf16.mxu1 %v9202_v61  ;;  %v9283_v59 = vld [vmem:[#allocation4 + $0x784] ss:$16 sps:$4 sm:$0xff]   ;;  %v9281_v61 = vld [vmem:[#allocation4 + $0x780] ss:$16 sps:$4 sm:$0xff]  }
  0x78   :  { %v9290_v4 = vld [vmem:[#allocation4 + $0x540] ss:$16 sps:$4 sm:$0xff]   ;;  %v9331_v38 = vld [vmem:[#allocation4 + $0xa84] ss:$16 sps:$4 sm:$0xff]  }
  0x79   :  { %6342 = vmatpush2.bf16.msra.mxu0 %v9204_v62  ;;  %v9286_v62 = vld [vmem:[#allocation4 + $0x564] ss:$16 sps:$4 sm:$0xff]   ;;  %v9293_v5 = vld [vmem:[#allocation4 + $0x740] ss:$16 sps:$4 sm:$0xff]  }
  0x7a   :  { %6383 = vmatpush2.bf16.msra.mxu1 %v9205_v63  ;;  %6343 = vmatprep.subr.bf16.mxu0 %v9206_v0  ;;  %v9289_v63 = vld [vmem:[#allocation4 + $0x764] ss:$16 sps:$4 sm:$0xff]   ;;  %v9284_v0 = vld [vmem:[#allocation4 + $0x560] ss:$16 sps:$4 sm:$0xff]  }
  0x7b   :  { %6384 = vmatprep.subr.bf16.mxu1 %v9208_v1  ;;  %v9287_v1 = vld [vmem:[#allocation4 + $0x760] ss:$16 sps:$4 sm:$0xff]  }
  0x7c   :  { %v9320_v34 = vld [vmem:[#allocation4 + $0x8a0] ss:$16 sps:$4 sm:$0xff]  }
  0x7d   :  { %6344 = vmatpush2.bf16.msra.mxu0 %v9210_v2  ;;  %v9292_v2 = vld [vmem:[#allocation4 + $0x544] ss:$16 sps:$4 sm:$0xff]  }
  0x7e   :  { %6385 = vmatpush2.bf16.msra.mxu1 %v9211_v3  ;;  %6395 = vmatprep.subr.bf16.mxu0 %v9214_v6  ;;  %v9295_v3 = vld [vmem:[#allocation4 + $0x744] ss:$16 sps:$4 sm:$0xff]  }
  0x7f   :  { %6436 = vmatprep.subr.bf16.mxu1 %v9217_v7  ;;  %v9298_v6 = vld [vmem:[#allocation4 + $0x524] ss:$16 sps:$4 sm:$0xff]  }
  0x80   :  { %6346 = vmatmul.mubr.bf16.vlgmr.msra.gmra.mxu0 %v10858_v8  ;;  %v9301_v7 = vld [vmem:[#allocation4 + $0x724] ss:$16 sps:$4 sm:$0xff]  }
  0x81   :  { %6387 = vmatmul.mubr.bf16.vlgmr.msra.gmra.mxu1 %v10860_v9  ;;  %6396 = vmatpush1.bf16.msra.mxu0 %v9212_v10  ;;  %v9296_v10 = vld [vmem:[#allocation4 + $0x520] ss:$16 sps:$4 sm:$0xff]  }
  0x82   :  { %6437 = vmatpush1.bf16.msra.mxu1 %v9215_v11  ;;  %6397 = vmatprep.subr.bf16.mxu0 %v9220_v12  ;;  %v9299_v11 = vld [vmem:[#allocation4 + $0x720] ss:$16 sps:$4 sm:$0xff]   ;;  %v9304_v12 = vld [vmem:[#allocation4 + $0x504] ss:$16 sps:$4 sm:$0xff]  }
  0x83   :  { %6438 = vmatprep.subr.bf16.mxu1 %v9223_v13  ;;  %6427 = vmatprep.mubr.bf16.mxu0 %v10864_v37  ;;  %v9307_v13 = vld [vmem:[#allocation4 + $0x704] ss:$16 sps:$4 sm:$0xff]  }
  0x84   :  { %6468 = vmatprep.mubr.bf16.mxu1 %v10866_v40 }
  0x85   :  { %6398 = vmatpush1.bf16.msra.mxu0 %v9218_v14  ;;  %v9302_v14 = vld [vmem:[#allocation4 + $0x500] ss:$16 sps:$4 sm:$0xff]  }
  0x86   :  { %6439 = vmatpush1.bf16.msra.mxu1 %v9221_v15  ;;  %6399 = vmatprep.subr.bf16.mxu0 %v9226_v16  ;;  %v9305_v15 = vld [vmem:[#allocation4 + $0x700] ss:$16 sps:$4 sm:$0xff]  }
  0x87   :  { %6440 = vmatprep.subr.bf16.mxu1 %v9229_v17  ;;  %v87_v16 = vld [vmem:[#allocation2 + $0x20] sm:$0xff]  ;;  %v89_v17 = vld [vmem:[#allocation2 + $0x30] sm:$0xff] }
  0x89   :  { %6400 = vmatpush1.bf16.msra.mxu0 %v9224_v18  ;;  %v9310_v18 = vld [vmem:[#allocation4 + $0x8e4] ss:$16 sps:$4 sm:$0xff]  }
  0x8a   :  { %6441 = vmatpush1.bf16.msra.mxu1 %v9227_v19  ;;  %6401 = vmatprep.subr.bf16.mxu0 %v9232_v20  ;;  %v9313_v19 = vld [vmem:[#allocation4 + $0xae4] ss:$16 sps:$4 sm:$0xff]   ;;  %v10870_v20 = vpack.c.bf16 %v87_v16, %v87_v16  ;;  %v9380_v16 = vld [vmem:[#allocation4 + $0x960] ss:$16 sps:$4 sm:$0xff]  }
  0x8b   :  { %6442 = vmatprep.subr.bf16.mxu1 %v9235_v21  ;;  %v10872_v21 = vpack.c.bf16 %v89_v17, %v89_v17  ;;  %v9383_v17 = vld [vmem:[#allocation4 + $0xb60] ss:$16 sps:$4 sm:$0xff]  }
  0x8d   :  { %6402 = vmatpush1.bf16.msra.mxu0 %v9230_v22  ;;  %v9308_v22 = vld [vmem:[#allocation4 + $0x8e0] ss:$16 sps:$4 sm:$0xff]  }
  0x8e   :  { %6443 = vmatpush1.bf16.msra.mxu1 %v9233_v23  ;;  %6403 = vmatprep.subr.bf16.mxu0 %v9238_v24  ;;  %v9311_v23 = vld [vmem:[#allocation4 + $0xae0] ss:$16 sps:$4 sm:$0xff]   ;;  %v9316_v24 = vld [vmem:[#allocation4 + $0x8c4] ss:$16 sps:$4 sm:$0xff]  }
  0x8f   :  { %6444 = vmatprep.subr.bf16.mxu1 %v9241_v25  ;;  %v9319_v25 = vld [vmem:[#allocation4 + $0xac4] ss:$16 sps:$4 sm:$0xff]  }
  0x91   :  { %6404 = vmatpush1.bf16.msra.mxu0 %v9236_v26  ;;  %v92_v26 = vld [vmem:[#allocation2 + $0x48] sm:$0xff] }
  0x92   :  { %6445 = vmatpush1.bf16.msra.mxu1 %v9239_v27  ;;  %6405 = vmatprep.subr.bf16.mxu0 %v9244_v28  ;;  %v9314_v27 = vld [vmem:[#allocation4 + $0x8c0] ss:$16 sps:$4 sm:$0xff]  }
  0x93   :  { %6446 = vmatprep.subr.bf16.mxu1 %v9247_v29  ;;  %v9317_v28 = vld [vmem:[#allocation4 + $0xac0] ss:$16 sps:$4 sm:$0xff]   ;;  %v10876_v29 = vpack.c.bf16 %v92_v26, %v92_v26 }
  0x94   :  { %v9392_v26 = vld [vmem:[#allocation4 + $0x920] ss:$16 sps:$4 sm:$0xff]  }
  0x95   :  { %6406 = vmatpush1.bf16.msra.mxu0 %v9242_v30  ;;  %v94_v30 = vld [vmem:[#allocation2 + $0x58] sm:$0xff] }
  0x96   :  { %6447 = vmatpush1.bf16.msra.mxu1 %v9245_v31  ;;  %6407 = vmatprep.subr.bf16.mxu0 %v9250_v32  ;;  %v9322_v31 = vld [vmem:[#allocation4 + $0x8a4] ss:$16 sps:$4 sm:$0xff]   ;;  %v10878_v32 = vpack.c.bf16 %v94_v30, %v94_v30 }
  0x97   :  { %6448 = vmatprep.subr.bf16.mxu1 %v9253_v33  ;;  %v9325_v33 = vld [vmem:[#allocation4 + $0xaa4] ss:$16 sps:$4 sm:$0xff]  }
  0x98   :  { %v9403_v30 = vld [vmem:[#allocation4 + $0xb04] ss:$16 sps:$4 sm:$0xff]  }
  0x99   :  { %6408 = vmatpush1.bf16.msra.mxu0 %v9248_v35  ;;  %v9323_v35 = vld [vmem:[#allocation4 + $0xaa0] ss:$16 sps:$4 sm:$0xff]  }
  0x9a   :  { %6449 = vmatpush1.bf16.msra.mxu1 %v9251_v36  ;;  %6409 = vmatprep.subr.bf16.mxu0 %v9256_v39  ;;  %v9328_v36 = vld [vmem:[#allocation4 + $0x884] ss:$16 sps:$4 sm:$0xff]   ;;  %v9326_v39 = vld [vmem:[#allocation4 + $0x880] ss:$16 sps:$4 sm:$0xff]  }
  0x9b   :  { %6450 = vmatprep.subr.bf16.mxu1 %v9259_v41  ;;  %v9329_v41 = vld [vmem:[#allocation4 + $0xa80] ss:$16 sps:$4 sm:$0xff]  }
  0x9d   :  { %6410 = vmatpush1.bf16.msra.mxu0 %v9254_v42  ;;  %v9334_v42 = vld [vmem:[#allocation4 + $0x864] ss:$16 sps:$4 sm:$0xff]  }
  0x9e   :  { %6451 = vmatpush1.bf16.msra.mxu1 %v9257_v43  ;;  %6411 = vmatprep.subr.bf16.mxu0 %v9262_v44  ;;  %v9337_v43 = vld [vmem:[#allocation4 + $0xa64] ss:$16 sps:$4 sm:$0xff]   ;;  %v9332_v44 = vld [vmem:[#allocation4 + $0x860] ss:$16 sps:$4 sm:$0xff]  }
  0x9f   :  { %6452 = vmatprep.subr.bf16.mxu1 %v9265_v45  ;;  %v9335_v45 = vld [vmem:[#allocation4 + $0xa60] ss:$16 sps:$4 sm:$0xff]  }
  0xa1   :  { %6412 = vmatpush2.bf16.msra.mxu0 %v9260_v46  ;;  %v9340_v46 = vld [vmem:[#allocation4 + $0x844] ss:$16 sps:$4 sm:$0xff]  }
  0xa2   :  { %6453 = vmatpush2.bf16.msra.mxu1 %v9263_v47  ;;  %6413 = vmatprep.subr.bf16.mxu0 %v9268_v48  ;;  %v9343_v47 = vld [vmem:[#allocation4 + $0xa44] ss:$16 sps:$4 sm:$0xff]   ;;  %v9338_v48 = vld [vmem:[#allocation4 + $0x840] ss:$16 sps:$4 sm:$0xff]  }
  0xa3   :  { %6454 = vmatprep.subr.bf16.mxu1 %v9271_v50  ;;  %v9341_v50 = vld [vmem:[#allocation4 + $0xa40] ss:$16 sps:$4 sm:$0xff]  }
  0xa5   :  { %6414 = vmatpush2.bf16.msra.mxu0 %v9266_v51  ;;  %v9346_v51 = vld [vmem:[#allocation4 + $0x824] ss:$16 sps:$4 sm:$0xff]  }
  0xa6   :  { %6455 = vmatpush2.bf16.msra.mxu1 %v9269_v53  ;;  %6415 = vmatprep.subr.bf16.mxu0 %v9274_v54  ;;  %v9349_v53 = vld [vmem:[#allocation4 + $0xa24] ss:$16 sps:$4 sm:$0xff]   ;;  %v9344_v54 = vld [vmem:[#allocation4 + $0x820] ss:$16 sps:$4 sm:$0xff]  }
  0xa7   :  { %6456 = vmatprep.subr.bf16.mxu1 %v9277_v55  ;;  %v9347_v55 = vld [vmem:[#allocation4 + $0xa20] ss:$16 sps:$4 sm:$0xff]  }
  0xa9   :  { %6416 = vmatpush2.bf16.msra.mxu0 %v9272_v56  ;;  %v9352_v56 = vld [vmem:[#allocation4 + $0x804] ss:$16 sps:$4 sm:$0xff]  }
  0xaa   :  { %6457 = vmatpush2.bf16.msra.mxu1 %v9275_v57  ;;  %6417 = vmatprep.subr.bf16.mxu0 %v9280_v58  ;;  %v9355_v57 = vld [vmem:[#allocation4 + $0xa04] ss:$16 sps:$4 sm:$0xff]   ;;  %v9350_v58 = vld [vmem:[#allocation4 + $0x800] ss:$16 sps:$4 sm:$0xff]  }
  0xab   :  { %6458 = vmatprep.subr.bf16.mxu1 %v9283_v59  ;;  %v9353_v59 = vld [vmem:[#allocation4 + $0xa00] ss:$16 sps:$4 sm:$0xff]  }
  0xad   :  { %6418 = vmatpush2.bf16.msra.mxu0 %v9278_v60  ;;  %v9358_v60 = vld [vmem:[#allocation4 + $0x9e4] ss:$16 sps:$4 sm:$0xff]  }
  0xae   :  { %6459 = vmatpush2.bf16.msra.mxu1 %v9281_v61  ;;  %6419 = vmatprep.subr.bf16.mxu0 %v9286_v62  ;;  %v9361_v61 = vld [vmem:[#allocation4 + $0xbe4] ss:$16 sps:$4 sm:$0xff]   ;;  %v9356_v62 = vld [vmem:[#allocation4 + $0x9e0] ss:$16 sps:$4 sm:$0xff]  }
  0xaf   :  { %6460 = vmatprep.subr.bf16.mxu1 %v9289_v63  ;;  %v9359_v63 = vld [vmem:[#allocation4 + $0xbe0] ss:$16 sps:$4 sm:$0xff]  }
  0xb1   :  { %6420 = vmatpush2.bf16.msra.mxu0 %v9284_v0  ;;  %v9364_v0 = vld [vmem:[#allocation4 + $0x9c4] ss:$16 sps:$4 sm:$0xff]  }
  0xb2   :  { %6461 = vmatpush2.bf16.msra.mxu1 %v9287_v1  ;;  %6421 = vmatprep.subr.bf16.mxu0 %v9292_v2  ;;  %v9367_v1 = vld [vmem:[#allocation4 + $0xbc4] ss:$16 sps:$4 sm:$0xff]   ;;  %v9362_v2 = vld [vmem:[#allocation4 + $0x9c0] ss:$16 sps:$4 sm:$0xff]  }
  0xb3   :  { %6462 = vmatprep.subr.bf16.mxu1 %v9295_v3  ;;  %v9365_v3 = vld [vmem:[#allocation4 + $0xbc0] ss:$16 sps:$4 sm:$0xff]  }
  0xb5   :  { %6422 = vmatpush2.bf16.msra.mxu0 %v9290_v4  ;;  %v9370_v4 = vld [vmem:[#allocation4 + $0x9a4] ss:$16 sps:$4 sm:$0xff]  }
  0xb6   :  { %6463 = vmatpush2.bf16.msra.mxu1 %v9293_v5  ;;  %6423 = vmatprep.subr.bf16.mxu0 %v9298_v6  ;;  %v9373_v5 = vld [vmem:[#allocation4 + $0xba4] ss:$16 sps:$4 sm:$0xff]   ;;  %v9368_v6 = vld [vmem:[#allocation4 + $0x9a0] ss:$16 sps:$4 sm:$0xff]  }
  0xb7   :  { %6464 = vmatprep.subr.bf16.mxu1 %v9301_v7  ;;  %v9371_v7 = vld [vmem:[#allocation4 + $0xba0] ss:$16 sps:$4 sm:$0xff]  }
  0xb9   :  { %6424 = vmatpush2.bf16.msra.mxu0 %v9296_v10  ;;  %v9376_v10 = vld [vmem:[#allocation4 + $0x984] ss:$16 sps:$4 sm:$0xff]  }
  0xba   :  { %6465 = vmatpush2.bf16.msra.mxu1 %v9299_v11  ;;  %6425 = vmatprep.subr.bf16.mxu0 %v9304_v12  ;;  %v9379_v11 = vld [vmem:[#allocation4 + $0xb84] ss:$16 sps:$4 sm:$0xff]   ;;  %v9374_v12 = vld [vmem:[#allocation4 + $0x980] ss:$16 sps:$4 sm:$0xff]  }
  0xbb   :  { %6466 = vmatprep.subr.bf16.mxu1 %v9307_v13  ;;  %v9377_v13 = vld [vmem:[#allocation4 + $0xb80] ss:$16 sps:$4 sm:$0xff]  }
  0xbd   :  { %6426 = vmatpush2.bf16.msra.mxu0 %v9302_v14  ;;  %v9382_v14 = vld [vmem:[#allocation4 + $0x964] ss:$16 sps:$4 sm:$0xff]  }
  0xbe   :  { %6467 = vmatpush2.bf16.msra.mxu1 %v9305_v15  ;;  %6477 = vmatprep.subr.bf16.mxu0 %v9310_v18  ;;  %v9385_v15 = vld [vmem:[#allocation4 + $0xb64] ss:$16 sps:$4 sm:$0xff]  }
  0xbf   :  { %6518 = vmatprep.subr.bf16.mxu1 %v9313_v19  ;;  %v9388_v18 = vld [vmem:[#allocation4 + $0x944] ss:$16 sps:$4 sm:$0xff]  }
  0xc0   :  { %6428 = vmatmul.mubr.bf16.vlgmr.msra.gmra.mxu0 %v10870_v20  ;;  %v9391_v19 = vld [vmem:[#allocation4 + $0xb44] ss:$16 sps:$4 sm:$0xff]  }
  0xc1   :  { %6469 = vmatmul.mubr.bf16.vlgmr.msra.gmra.mxu1 %v10872_v21  ;;  %6478 = vmatpush1.bf16.msra.mxu0 %v9308_v22  ;;  %v9386_v22 = vld [vmem:[#allocation4 + $0x940] ss:$16 sps:$4 sm:$0xff]  }
  0xc2   :  { %6519 = vmatpush1.bf16.msra.mxu1 %v9311_v23  ;;  %6479 = vmatprep.subr.bf16.mxu0 %v9316_v24  ;;  %v9389_v23 = vld [vmem:[#allocation4 + $0xb40] ss:$16 sps:$4 sm:$0xff]   ;;  %v9394_v24 = vld [vmem:[#allocation4 + $0x924] ss:$16 sps:$4 sm:$0xff]  }
  0xc3   :  { %6520 = vmatprep.subr.bf16.mxu1 %v9319_v25  ;;  %6509 = vmatprep.mubr.bf16.mxu0 %v10876_v29  ;;  %v9397_v25 = vld [vmem:[#allocation4 + $0xb24] ss:$16 sps:$4 sm:$0xff]  }
  0xc4   :  { %6550 = vmatprep.mubr.bf16.mxu1 %v10878_v32 }
  0xc5   :  { %6480 = vmatpush1.bf16.msra.mxu0 %v9314_v27  ;;  %v9395_v27 = vld [vmem:[#allocation4 + $0xb20] ss:$16 sps:$4 sm:$0xff]  }
  0xc6   :  { %6521 = vmatpush1.bf16.msra.mxu1 %v9317_v28  ;;  %6481 = vmatprep.subr.bf16.mxu0 %v9322_v31  ;;  %v9400_v28 = vld [vmem:[#allocation4 + $0x904] ss:$16 sps:$4 sm:$0xff]   ;;  %v9398_v31 = vld [vmem:[#allocation4 + $0x900] ss:$16 sps:$4 sm:$0xff]  }
  0xc7   :  { %6522 = vmatprep.subr.bf16.mxu1 %v9325_v33  ;;  %v9401_v33 = vld [vmem:[#allocation4 + $0xb00] ss:$16 sps:$4 sm:$0xff]  }
  0xc9   :  { %6482 = vmatpush1.bf16.msra.mxu0 %v9320_v34  ;;  %v91_v34 = vld [vmem:[#allocation2 + $0x40] sm:$0xff] }
  0xca   :  { %6523 = vmatpush1.bf16.msra.mxu1 %v9323_v35  ;;  %6483 = vmatprep.subr.bf16.mxu0 %v9328_v36  ;;  %v93_v35 = vld [vmem:[#allocation2 + $0x50] sm:$0xff] }
  0xcb   :  { %6524 = vmatprep.subr.bf16.mxu1 %v9331_v38  ;;  %v9406_v36 = vld [vmem:[#allocation4 + $0xce4] ss:$16 sps:$4 sm:$0xff]  }
  0xcc   :  { %v9409_v38 = vld [vmem:[#allocation4 + $0xee4] ss:$16 sps:$4 sm:$0xff]  }
  0xcd   :  { %6484 = vmatpush1.bf16.msra.mxu0 %v9326_v39  ;;  %v9404_v39 = vld [vmem:[#allocation4 + $0xce0] ss:$16 sps:$4 sm:$0xff]  }
  0xce   :  { %6525 = vmatpush1.bf16.msra.mxu1 %v9329_v41  ;;  %6485 = vmatprep.subr.bf16.mxu0 %v9334_v42  ;;  %v96_v41 = vld [vmem:[#allocation2 + $0x68] sm:$0xff]  ;;  %v10882_v42 = vpack.c.bf16 %v91_v34, %v91_v34  ;;  %v9470_v34 = vld [vmem:[#allocation4 + $0xd80] ss:$16 sps:$4 sm:$0xff]  }
  0xcf   :  { %6526 = vmatprep.subr.bf16.mxu1 %v9337_v43  ;;  %v10884_v43 = vpack.c.bf16 %v93_v35, %v93_v35  ;;  %v9473_v35 = vld [vmem:[#allocation4 + $0xf80] ss:$16 sps:$4 sm:$0xff]  }
  0xd1   :  { %6486 = vmatpush1.bf16.msra.mxu0 %v9332_v44  ;;  %v98_v44 = vld [vmem:[#allocation2 + $0x78] sm:$0xff] }
  0xd2   :  { %6527 = vmatpush1.bf16.msra.mxu1 %v9335_v45  ;;  %6487 = vmatprep.subr.bf16.mxu0 %v9340_v46  ;;  %v9407_v45 = vld [vmem:[#allocation4 + $0xee0] ss:$16 sps:$4 sm:$0xff]   ;;  %v9412_v46 = vld [vmem:[#allocation4 + $0xcc4] ss:$16 sps:$4 sm:$0xff]  }
  0xd3   :  { %6528 = vmatprep.subr.bf16.mxu1 %v9343_v47  ;;  %v9415_v47 = vld [vmem:[#allocation4 + $0xec4] ss:$16 sps:$4 sm:$0xff]  }
  0xd5   :  { %6488 = vmatpush1.bf16.msra.mxu0 %v9338_v48  ;;  %v10886_v48 = vpack.c.bf16 %v96_v41, %v96_v41  ;;  %v9479_v41 = vld [vmem:[#allocation4 + $0xf60] ss:$16 sps:$4 sm:$0xff]  }
  0xd6   :  { %6529 = vmatpush1.bf16.msra.mxu1 %v9341_v50  ;;  %6489 = vmatprep.subr.bf16.mxu0 %v9346_v51  ;;  %v10888_v50 = vpack.c.bf16 %v98_v44, %v98_v44  ;;  %v9410_v51 = vld [vmem:[#allocation4 + $0xcc0] ss:$16 sps:$4 sm:$0xff]   ;;  %v9484_v44 = vld [vmem:[#allocation4 + $0xd44] ss:$16 sps:$4 sm:$0xff]  }
  0xd7   :  { %6530 = vmatprep.subr.bf16.mxu1 %v9349_v53  ;;  %v9413_v53 = vld [vmem:[#allocation4 + $0xec0] ss:$16 sps:$4 sm:$0xff]  }
  0xd9   :  { %6490 = vmatpush1.bf16.msra.mxu0 %v9344_v54  ;;  %v9418_v54 = vld [vmem:[#allocation4 + $0xca4] ss:$16 sps:$4 sm:$0xff]  }
  0xda   :  { %6531 = vmatpush1.bf16.msra.mxu1 %v9347_v55  ;;  %6491 = vmatprep.subr.bf16.mxu0 %v9352_v56  ;;  %v9421_v55 = vld [vmem:[#allocation4 + $0xea4] ss:$16 sps:$4 sm:$0xff]   ;;  %v9416_v56 = vld [vmem:[#allocation4 + $0xca0] ss:$16 sps:$4 sm:$0xff]  }
  0xdb   :  { %6532 = vmatprep.subr.bf16.mxu1 %v9355_v57  ;;  %v9419_v57 = vld [vmem:[#allocation4 + $0xea0] ss:$16 sps:$4 sm:$0xff]  }
  0xdd   :  { %6492 = vmatpush1.bf16.msra.mxu0 %v9350_v58  ;;  %v9424_v58 = vld [vmem:[#allocation4 + $0xc84] ss:$16 sps:$4 sm:$0xff]  }
  0xde   :  { %6533 = vmatpush1.bf16.msra.mxu1 %v9353_v59  ;;  %6493 = vmatprep.subr.bf16.mxu0 %v9358_v60  ;;  %v9427_v59 = vld [vmem:[#allocation4 + $0xe84] ss:$16 sps:$4 sm:$0xff]   ;;  %v9422_v60 = vld [vmem:[#allocation4 + $0xc80] ss:$16 sps:$4 sm:$0xff]  }
  0xdf   :  { %6534 = vmatprep.subr.bf16.mxu1 %v9361_v61  ;;  %v9425_v61 = vld [vmem:[#allocation4 + $0xe80] ss:$16 sps:$4 sm:$0xff]  }
  0xe1   :  { %6494 = vmatpush2.bf16.msra.mxu0 %v9356_v62  ;;  %v9430_v62 = vld [vmem:[#allocation4 + $0xc64] ss:$16 sps:$4 sm:$0xff]  }
  0xe2   :  { %6535 = vmatpush2.bf16.msra.mxu1 %v9359_v63  ;;  %6495 = vmatprep.subr.bf16.mxu0 %v9364_v0  ;;  %v9433_v63 = vld [vmem:[#allocation4 + $0xe64] ss:$16 sps:$4 sm:$0xff]   ;;  %v9428_v0 = vld [vmem:[#allocation4 + $0xc60] ss:$16 sps:$4 sm:$0xff]  }
  0xe3   :  { %6536 = vmatprep.subr.bf16.mxu1 %v9367_v1  ;;  %v9431_v1 = vld [vmem:[#allocation4 + $0xe60] ss:$16 sps:$4 sm:$0xff]  }
  0xe5   :  { %6496 = vmatpush2.bf16.msra.mxu0 %v9362_v2  ;;  %v9436_v2 = vld [vmem:[#allocation4 + $0xc44] ss:$16 sps:$4 sm:$0xff]  }
  0xe6   :  { %6537 = vmatpush2.bf16.msra.mxu1 %v9365_v3  ;;  %6497 = vmatprep.subr.bf16.mxu0 %v9370_v4  ;;  %v9439_v3 = vld [vmem:[#allocation4 + $0xe44] ss:$16 sps:$4 sm:$0xff]   ;;  %v9434_v4 = vld [vmem:[#allocation4 + $0xc40] ss:$16 sps:$4 sm:$0xff]  }
  0xe7   :  { %6538 = vmatprep.subr.bf16.mxu1 %v9373_v5  ;;  %v9437_v5 = vld [vmem:[#allocation4 + $0xe40] ss:$16 sps:$4 sm:$0xff]  }
  0xe9   :  { %6498 = vmatpush2.bf16.msra.mxu0 %v9368_v6  ;;  %v9442_v6 = vld [vmem:[#allocation4 + $0xc24] ss:$16 sps:$4 sm:$0xff]  }
  0xea   :  { %6539 = vmatpush2.bf16.msra.mxu1 %v9371_v7  ;;  %6499 = vmatprep.subr.bf16.mxu0 %v9376_v10  ;;  %v9445_v7 = vld [vmem:[#allocation4 + $0xe24] ss:$16 sps:$4 sm:$0xff]   ;;  %v9440_v10 = vld [vmem:[#allocation4 + $0xc20] ss:$16 sps:$4 sm:$0xff]  }
  0xeb   :  { %6540 = vmatprep.subr.bf16.mxu1 %v9379_v11  ;;  %v9443_v11 = vld [vmem:[#allocation4 + $0xe20] ss:$16 sps:$4 sm:$0xff]  }
  0xed   :  { %6500 = vmatpush2.bf16.msra.mxu0 %v9374_v12  ;;  %v9448_v12 = vld [vmem:[#allocation4 + $0xc04] ss:$16 sps:$4 sm:$0xff]  }
  0xee   :  { %6541 = vmatpush2.bf16.msra.mxu1 %v9377_v13  ;;  %6501 = vmatprep.subr.bf16.mxu0 %v9382_v14  ;;  %v9451_v13 = vld [vmem:[#allocation4 + $0xe04] ss:$16 sps:$4 sm:$0xff]   ;;  %v9446_v14 = vld [vmem:[#allocation4 + $0xc00] ss:$16 sps:$4 sm:$0xff]  }
  0xef   :  { %6542 = vmatprep.subr.bf16.mxu1 %v9385_v15  ;;  %v9449_v15 = vld [vmem:[#allocation4 + $0xe00] ss:$16 sps:$4 sm:$0xff]  }
  0xf1   :  { %6502 = vmatpush2.bf16.msra.mxu0 %v9380_v16  ;;  %v9454_v16 = vld [vmem:[#allocation4 + $0xde4] ss:$16 sps:$4 sm:$0xff]  }
  0xf2   :  { %6543 = vmatpush2.bf16.msra.mxu1 %v9383_v17  ;;  %6503 = vmatprep.subr.bf16.mxu0 %v9388_v18  ;;  %v9457_v17 = vld [vmem:[#allocation4 + $0xfe4] ss:$16 sps:$4 sm:$0xff]   ;;  %v9452_v18 = vld [vmem:[#allocation4 + $0xde0] ss:$16 sps:$4 sm:$0xff]  }
  0xf3   :  { %6544 = vmatprep.subr.bf16.mxu1 %v9391_v19  ;;  %v9455_v19 = vld [vmem:[#allocation4 + $0xfe0] ss:$16 sps:$4 sm:$0xff]  }
  0xf5   :  { %6504 = vmatpush2.bf16.msra.mxu0 %v9386_v22  ;;  %v9460_v22 = vld [vmem:[#allocation4 + $0xdc4] ss:$16 sps:$4 sm:$0xff]  }
  0xf6   :  { %6545 = vmatpush2.bf16.msra.mxu1 %v9389_v23  ;;  %6505 = vmatprep.subr.bf16.mxu0 %v9394_v24  ;;  %v9463_v23 = vld [vmem:[#allocation4 + $0xfc4] ss:$16 sps:$4 sm:$0xff]   ;;  %v9458_v24 = vld [vmem:[#allocation4 + $0xdc0] ss:$16 sps:$4 sm:$0xff]  }
  0xf7   :  { %6546 = vmatprep.subr.bf16.mxu1 %v9397_v25  ;;  %v9461_v25 = vld [vmem:[#allocation4 + $0xfc0] ss:$16 sps:$4 sm:$0xff]  }
  0xf9   :  { %6506 = vmatpush2.bf16.msra.mxu0 %v9392_v26  ;;  %v9466_v26 = vld [vmem:[#allocation4 + $0xda4] ss:$16 sps:$4 sm:$0xff]  }
  0xfa   :  { %6547 = vmatpush2.bf16.msra.mxu1 %v9395_v27  ;;  %6507 = vmatprep.subr.bf16.mxu0 %v9400_v28  ;;  %v9469_v27 = vld [vmem:[#allocation4 + $0xfa4] ss:$16 sps:$4 sm:$0xff]   ;;  %v9464_v28 = vld [vmem:[#allocation4 + $0xda0] ss:$16 sps:$4 sm:$0xff]  }
  0xfb   :  { %6548 = vmatprep.subr.bf16.mxu1 %v9403_v30  ;;  %v9467_v30 = vld [vmem:[#allocation4 + $0xfa0] ss:$16 sps:$4 sm:$0xff]  }
  0xfd   :  { %6508 = vmatpush2.bf16.msra.mxu0 %v9398_v31  ;;  %v9472_v31 = vld [vmem:[#allocation4 + $0xd84] ss:$16 sps:$4 sm:$0xff]  }
  0xfe   :  { %6549 = vmatpush2.bf16.msra.mxu1 %v9401_v33  ;;  %6559 = vmatprep.subr.bf16.mxu0 %v9406_v36  ;;  %v9475_v33 = vld [vmem:[#allocation4 + $0xf84] ss:$16 sps:$4 sm:$0xff]  }
  0xff   :  { %6600 = vmatprep.subr.bf16.mxu1 %v9409_v38  ;;  %v9478_v36 = vld [vmem:[#allocation4 + $0xd64] ss:$16 sps:$4 sm:$0xff]  }
 0x100   :  { %6510 = vmatmul.mubr.bf16.vlgmr.msra.gmra.mxu0 %v10882_v42  ;;  %v9481_v38 = vld [vmem:[#allocation4 + $0xf64] ss:$16 sps:$4 sm:$0xff]  }
 0x101   :  { %6551 = vmatmul.mubr.bf16.vlgmr.msra.gmra.mxu1 %v10884_v43  ;;  %6560 = vmatpush1.bf16.msra.mxu0 %v9404_v39  ;;  %v9476_v39 = vld [vmem:[#allocation4 + $0xd60] ss:$16 sps:$4 sm:$0xff]  }
 0x102   :  { %6601 = vmatpush1.bf16.msra.mxu1 %v9407_v45  ;;  %6561 = vmatprep.subr.bf16.mxu0 %v9412_v46  ;;  %v9487_v45 = vld [vmem:[#allocation4 + $0xf44] ss:$16 sps:$4 sm:$0xff]   ;;  %v9482_v46 = vld [vmem:[#allocation4 + $0xd40] ss:$16 sps:$4 sm:$0xff]  }
 0x103   :  { %6602 = vmatprep.subr.bf16.mxu1 %v9415_v47  ;;  %6591 = vmatprep.mubr.bf16.mxu0 %v10886_v48  ;;  %v9485_v47 = vld [vmem:[#allocation4 + $0xf40] ss:$16 sps:$4 sm:$0xff]  }
 0x104   :  { %6632 = vmatprep.mubr.bf16.mxu1 %v10888_v50 }
 0x105   :  { %6562 = vmatpush1.bf16.msra.mxu0 %v9410_v51  ;;  %v1173_v51 = vlaneseq }
 0x106   :  { %6603 = vmatpush1.bf16.msra.mxu1 %v9413_v53  ;;  %6563 = vmatprep.subr.bf16.mxu0 %v9418_v54  ;;  %v9490_v53 = vld [vmem:[#allocation4 + $0xd24] ss:$16 sps:$4 sm:$0xff]  }
 0x107   :  { %6604 = vmatprep.subr.bf16.mxu1 %v9421_v55  ;;  %v9493_v54 = vld [vmem:[#allocation4 + $0xf24] ss:$16 sps:$4 sm:$0xff]   ;;  %v9488_v55 = vld [vmem:[#allocation4 + $0xd20] ss:$16 sps:$4 sm:$0xff]  }
 0x109   :  { %6564 = vmatpush1.bf16.msra.mxu0 %v9416_v56  ;;  %v9491_v56 = vld [vmem:[#allocation4 + $0xf20] ss:$16 sps:$4 sm:$0xff]  }
 0x10a   :  { %6605 = vmatpush1.bf16.msra.mxu1 %v9419_v57  ;;  %6565 = vmatprep.subr.bf16.mxu0 %v9424_v58  ;;  %v10895_v57 = vshrl.u32 %v1173_v51, 7  ;;  %v9496_v58 = vld [vmem:[#allocation4 + $0xd04] ss:$16 sps:$4 sm:$0xff]  }
 0x10b   :  { %6606 = vmatprep.subr.bf16.mxu1 %v9427_v59  ;;  %v9499_v59 = vld [vmem:[#allocation4 + $0xf04] ss:$16 sps:$4 sm:$0xff]  }
 0x10d   :  { %6566 = vmatpush1.bf16.msra.mxu0 %v9422_v60  ;;  %v9494_v60 = vld [vmem:[#allocation4 + $0xd00] ss:$16 sps:$4 sm:$0xff]  }
 0x10e   :  { %6607 = vmatpush1.bf16.msra.mxu1 %v9425_v61  ;;  %6567 = vmatprep.subr.bf16.mxu0 %v9430_v62  ;;  %v9497_v61 = vld [vmem:[#allocation4 + $0xf00] ss:$16 sps:$4 sm:$0xff]  }
 0x10f   :  { %6608 = vmatprep.subr.bf16.mxu1 %v9433_v63  ;;  %v1171_v62 = vld [vmem:[#allocation6] sm:$0xf] }
 0x110   :  { %v95_v63 = vld [vmem:[#allocation2 + $0x60] sm:$0xff] }
 0x111   :  { %6568 = vmatpush1.bf16.msra.mxu0 %v9428_v0  ;;  %v1175_v0 = vsub.s32 0, %v10895_v57 }
 0x112   :  { %6609 = vmatpush1.bf16.msra.mxu1 %v9431_v1  ;;  %6569 = vmatprep.subr.bf16.mxu0 %v9436_v2  ;;  %v97_v1 = vld [vmem:[#allocation2 + $0x70] sm:$0xff] }
 0x113   :  { %6610 = vmatprep.subr.bf16.mxu1 %v9439_v3  ;;  %v9502_v2 = vld [vmem:[#allocation4 + $0x10e4] ss:$16 sps:$4 sm:$0xff]  }
 0x114   :  { %v9505_v3 = vld [vmem:[#allocation4 + $0x12e4] ss:$16 sps:$4 sm:$0xff]  }
 0x115   :  { %6570 = vmatpush1.bf16.msra.mxu0 %v9434_v4  ;;  %v9500_v4 = vld [vmem:[#allocation4 + $0x10e0] ss:$16 sps:$4 sm:$0xff]  }
 0x116   :  { %6611 = vmatpush1.bf16.msra.mxu1 %v9437_v5  ;;  %6571 = vmatprep.subr.bf16.mxu0 %v9442_v6  ;;  %v1179_v5 = vsub.s32 1, %v10895_v57  ;;  %v100_v6 = vld [vmem:[#allocation2 + $0x88] sm:$0xff] }
 0x117   :  { %6612 = vmatprep.subr.bf16.mxu1 %v9445_v7  ;;  %v10899_v7 = vpack.c.bf16 %v95_v63, %v95_v63  ;;  %v9538_v63 = vld [vmem:[#allocation4 + $0x1024] ss:$16 sps:$4 sm:$0xff]  }
 0x119   :  { %6572 = vmatpush1.bf16.msra.mxu0 %v9440_v10  ;;  %v10901_v10 = vpack.c.bf16 %v97_v1, %v97_v1  ;;  %v9536_v1 = vld [vmem:[#allocation4 + $0x1020] ss:$16 sps:$4 sm:$0xff]  }
 0x11a   :  { %6613 = vmatpush1.bf16.msra.mxu1 %v9443_v11  ;;  %6573 = vmatprep.subr.bf16.mxu0 %v9448_v12  ;;  %v102_v11 = vld [vmem:[#allocation2 + $0x98] sm:$0xff]  ;;  %v1176_v12 = vrot.slane %v1171_v62, %v1175_v0  ;;  %v9541_v0 = vld [vmem:[#allocation4 + $0x1224] ss:$16 sps:$4 sm:$0xff]  }
 0x11b   :  { %6614 = vmatprep.subr.bf16.mxu1 %v9451_v13  ;;  %v9503_v13 = vld [vmem:[#allocation4 + $0x12e0] ss:$16 sps:$4 sm:$0xff]  }
 0x11d   :  { %6574 = vmatpush1.bf16.msra.mxu0 %v9446_v14  ;;  %v9508_v14 = vld [vmem:[#allocation4 + $0x10c4] ss:$16 sps:$4 sm:$0xff]  }
 0x11e   :  { %6615 = vmatpush1.bf16.msra.mxu1 %v9449_v15  ;;  %6575 = vmatprep.subr.bf16.mxu0 %v9454_v16  ;;  %v9511_v15 = vld [vmem:[#allocation4 + $0x12c4] ss:$16 sps:$4 sm:$0xff]   ;;  %v1180_v16 = vrot.slane %v1171_v62, %v1179_v5  ;;  %v9533_v62 = vld [vmem:[#allocation4 + $0x1240] ss:$16 sps:$4 sm:$0xff]  }
 0x11f   :  { %6616 = vmatprep.subr.bf16.mxu1 %v9457_v17  ;;  %v10903_v17 = vpack.c.bf16 %v100_v6, %v100_v6  ;;  %v9542_v5 = vld [vmem:[#allocation4 + $0x1000] ss:$16 sps:$4 sm:$0xff]  }
 0x120   :  { %v9545_v6 = vld [vmem:[#allocation4 + $0x1200] ss:$16 sps:$4 sm:$0xff]  }
 0x121   :  { %6576 = vmatpush2.bf16.msra.mxu0 %v9452_v18  ;;  %v10905_v18 = vpack.c.bf16 %v102_v11, %v102_v11  ;;  %v9550_v11 = vld [vmem:[#allocation4 + $0x11e4] ss:$16 sps:$4 sm:$0xff]  }
 0x122   :  { %6617 = vmatpush2.bf16.msra.mxu1 %v9455_v19  ;;  %6577 = vmatprep.subr.bf16.mxu0 %v9460_v22 }
 0x123   :  { %6618 = vmatprep.subr.bf16.mxu1 %v9463_v23  ;;  %v9506_v23 = vld [vmem:[#allocation4 + $0x10c0] ss:$16 sps:$4 sm:$0xff]  }
 0x125   :  { %6578 = vmatpush2.bf16.msra.mxu0 %v9458_v24 }
 0x126   :  { %6619 = vmatpush2.bf16.msra.mxu1 %v9461_v25  ;;  %6579 = vmatprep.subr.bf16.mxu0 %v9466_v26  ;;  %v9509_v25 = vld [vmem:[#allocation4 + $0x12c0] ss:$16 sps:$4 sm:$0xff]  }
 0x127   :  { %6620 = vmatprep.subr.bf16.mxu1 %v9469_v27 }
 0x129   :  { %6580 = vmatpush2.bf16.msra.mxu0 %v9464_v28  ;;  %v9514_v28 = vld [vmem:[#allocation4 + $0x10a4] ss:$16 sps:$4 sm:$0xff]  }
 0x12a   :  { %6621 = vmatpush2.bf16.msra.mxu1 %v9467_v30  ;;  %6581 = vmatprep.subr.bf16.mxu0 %v9472_v31  ;;  %v9517_v30 = vld [vmem:[#allocation4 + $0x12a4] ss:$16 sps:$4 sm:$0xff]  }
 0x12b   :  { %6622 = vmatprep.subr.bf16.mxu1 %v9475_v33 }
 0x12d   :  { %6582 = vmatpush2.bf16.msra.mxu0 %v9470_v34 }
 0x12e   :  { %6623 = vmatpush2.bf16.msra.mxu1 %v9473_v35  ;;  %6583 = vmatprep.subr.bf16.mxu0 %v9478_v36  ;;  %v9512_v36 = vld [vmem:[#allocation4 + $0x10a0] ss:$16 sps:$4 sm:$0xff]  }
 0x12f   :  { %6624 = vmatprep.subr.bf16.mxu1 %v9481_v38 }
 0x131   :  { %6584 = vmatpush2.bf16.msra.mxu0 %v9476_v39  ;;  %v9515_v39 = vld [vmem:[#allocation4 + $0x12a0] ss:$16 sps:$4 sm:$0xff]  }
 0x132   :  { %6625 = vmatpush2.bf16.msra.mxu1 %v9479_v41  ;;  %6585 = vmatprep.subr.bf16.mxu0 %v9484_v44 }
 0x133   :  { %6626 = vmatprep.subr.bf16.mxu1 %v9487_v45  ;;  %v9520_v45 = vld [vmem:[#allocation4 + $0x1084] ss:$16 sps:$4 sm:$0xff]  }
 0x135   :  { %6586 = vmatpush2.bf16.msra.mxu0 %v9482_v46  ;;  %v9523_v46 = vld [vmem:[#allocation4 + $0x1284] ss:$16 sps:$4 sm:$0xff]  }
 0x136   :  { %6627 = vmatpush2.bf16.msra.mxu1 %v9485_v47  ;;  %6587 = vmatprep.subr.bf16.mxu0 %v9490_v53  ;;  %v9518_v47 = vld [vmem:[#allocation4 + $0x1080] ss:$16 sps:$4 sm:$0xff]  }
 0x137   :  { %6628 = vmatprep.subr.bf16.mxu1 %v9493_v54  ;;  %v9521_v53 = vld [vmem:[#allocation4 + $0x1280] ss:$16 sps:$4 sm:$0xff]   ;;  %v9526_v54 = vld [vmem:[#allocation4 + $0x1064] ss:$16 sps:$4 sm:$0xff]  }
 0x139   :  { %6588 = vmatpush2.bf16.msra.mxu0 %v9488_v55  ;;  %v9529_v55 = vld [vmem:[#allocation4 + $0x1264] ss:$16 sps:$4 sm:$0xff]  }
 0x13a   :  { %6629 = vmatpush2.bf16.msra.mxu1 %v9491_v56  ;;  %6589 = vmatprep.subr.bf16.mxu0 %v9496_v58  ;;  %v9524_v56 = vld [vmem:[#allocation4 + $0x1060] ss:$16 sps:$4 sm:$0xff]  }
 0x13b   :  { %6630 = vmatprep.subr.bf16.mxu1 %v9499_v59  ;;  %v9527_v58 = vld [vmem:[#allocation4 + $0x1260] ss:$16 sps:$4 sm:$0xff]   ;;  %v9532_v59 = vld [vmem:[#allocation4 + $0x1044] ss:$16 sps:$4 sm:$0xff]  }
 0x13d   :  { %6590 = vmatpush2.bf16.msra.mxu0 %v9494_v60  ;;  %v9535_v60 = vld [vmem:[#allocation4 + $0x1244] ss:$16 sps:$4 sm:$0xff]  }
 0x13e   :  { %6631 = vmatpush2.bf16.msra.mxu1 %v9497_v61  ;;  %6641 = vmatprep.subr.bf16.mxu0 %v9502_v2  ;;  %v9530_v61 = vld [vmem:[#allocation4 + $0x1040] ss:$16 sps:$4 sm:$0xff]  }
 0x13f   :  { %6682 = vmatprep.subr.bf16.mxu1 %v9505_v3  ;;  %v9539_v2 = vld [vmem:[#allocation4 + $0x1220] ss:$16 sps:$4 sm:$0xff]   ;;  %v9544_v3 = vld [vmem:[#allocation4 + $0x1004] ss:$16 sps:$4 sm:$0xff]  }
 0x140   :  { %v6347_v19 = vpop.f32.mrf.mxu0  ;;  %6592 = vmatmul.mubr.bf16.vlgmr.msra.gmra.mxu0 %v10899_v7 }
 0x141   :  { %v6388_v22 = vpop.f32.mrf.mxu1  ;;  %6633 = vmatmul.mubr.bf16.vlgmr.msra.gmra.mxu1 %v10901_v10  ;;  %v6348_v24 = vadd.f32 %v6347_v19, %v1176_v12  ;;  %6642 = vmatpush1.bf16.msra.mxu0 %v9500_v4  ;;  %v9547_v4 = vld [vmem:[#allocation4 + $0x1204] ss:$16 sps:$4 sm:$0xff]   ;;  %v9554_v19 = vld [vmem:[#allocation4 + $0x11c0] ss:$16 sps:$4 sm:$0xff]  }
 0x142   :  { %6683 = vmatpush1.bf16.msra.mxu1 %v9503_v13  ;;  %v6349_v26 = vpop.f32.mrf.mxu0  ;;  %6643 = vmatprep.subr.bf16.mxu0 %v9508_v14  ;;  %v9553_v12 = vld [vmem:[#allocation4 + $0x13e4] ss:$16 sps:$4 sm:$0xff]   ;;  %v9548_v13 = vld [vmem:[#allocation4 + $0x11e0] ss:$16 sps:$4 sm:$0xff]  }
 0x143   :  { %v6390_v27 = vpop.f32.mrf.mxu1  ;;  %6684 = vmatprep.subr.bf16.mxu1 %v9511_v15  ;;  %v10909_v31 = vadd.f32 %v6388_v22, %v6348_v24  ;;  %v6350_v33 = vadd.f32 %v6349_v26, %v1180_v16  ;;  %6673 = vmatprep.mubr.bf16.mxu0 %v10903_v17  ;;  %v9551_v14 = vld [vmem:[#allocation4 + $0x13e0] ss:$16 sps:$4 sm:$0xff]   ;;  %v9556_v15 = vld [vmem:[#allocation4 + $0x11c4] ss:$16 sps:$4 sm:$0xff]  }
 0x144   :  { %6714 = vmatprep.mubr.bf16.mxu1 %v10905_v18  ;;  %v6351_v34 = vpop.f32.mrf.mxu0  ;;  %v9559_v16 = vld [vmem:[#allocation4 + $0x13c4] ss:$16 sps:$4 sm:$0xff]   ;;  %v9557_v22 = vld [vmem:[#allocation4 + $0x13c0] ss:$16 sps:$4 sm:$0xff]  }
 0x145   :  { %v6392_v35 = vpop.f32.mrf.mxu1  ;;  %v10913_v38 = vadd.f32 %v6390_v27, %v6350_v33  ;;  %6644 = vmatpush1.bf16.msra.mxu0 %v9506_v23  ;;  %v9562_v23 = vld [vmem:[#allocation4 + $0x11a4] ss:$16 sps:$4 sm:$0xff]   ;;  %v9563_v26 = vld [vmem:[#allocation4 + $0x13a0] ss:$16 sps:$4 sm:$0xff]  }
 0x146   :  { %6685 = vmatpush1.bf16.msra.mxu1 %v9509_v25  ;;  %v6352_v41 = vpop.f32.mrf.mxu0  ;;  %6645 = vmatprep.subr.bf16.mxu0 %v9514_v28  ;;  %v9565_v24 = vld [vmem:[#allocation4 + $0x13a4] ss:$16 sps:$4 sm:$0xff]   ;;  %v9560_v25 = vld [vmem:[#allocation4 + $0x11a0] ss:$16 sps:$4 sm:$0xff]  }
 0x147   :  { %v6393_v44 = vpop.f32.mrf.mxu1  ;;  %6686 = vmatprep.subr.bf16.mxu1 %v9517_v30  ;;  %v9568_v27 = vld [vmem:[#allocation4 + $0x1184] ss:$16 sps:$4 sm:$0xff]   ;;  %v9566_v30 = vld [vmem:[#allocation4 + $0x1180] ss:$16 sps:$4 sm:$0xff]  }
 0x148   :  { %v9571_v28 = vld [vmem:[#allocation4 + $0x1384] ss:$16 sps:$4 sm:$0xff]   ;;  %v9569_v33 = vld [vmem:[#allocation4 + $0x1380] ss:$16 sps:$4 sm:$0xff]  }
 0x149   :  { %6646 = vmatpush1.bf16.msra.mxu0 %v9512_v36  ;;  %v9574_v34 = vld [vmem:[#allocation4 + $0x1164] ss:$16 sps:$4 sm:$0xff]   ;;  %v9572_v36 = vld [vmem:[#allocation4 + $0x1160] ss:$16 sps:$4 sm:$0xff]  }
 0x14a   :  { %6687 = vmatpush1.bf16.msra.mxu1 %v9515_v39  ;;  %6647 = vmatprep.subr.bf16.mxu0 %v9520_v45  ;;  %v9577_v35 = vld [vmem:[#allocation4 + $0x1364] ss:$16 sps:$4 sm:$0xff]   ;;  %v9575_v39 = vld [vmem:[#allocation4 + $0x1360] ss:$16 sps:$4 sm:$0xff]  }
 0x14b   :  { %6688 = vmatprep.subr.bf16.mxu1 %v9523_v46  ;;  %v9580_v41 = vld [vmem:[#allocation4 + $0x1144] ss:$16 sps:$4 sm:$0xff]   ;;  %v9578_v45 = vld [vmem:[#allocation4 + $0x1140] ss:$16 sps:$4 sm:$0xff]  }
 0x14c   :  { %v9583_v44 = vld [vmem:[#allocation4 + $0x1344] ss:$16 sps:$4 sm:$0xff]   ;;  %v9581_v46 = vld [vmem:[#allocation4 + $0x1340] ss:$16 sps:$4 sm:$0xff]  }
 0x14d   :  { %6648 = vmatpush1.bf16.msra.mxu0 %v9518_v47  ;;  %v9586_v47 = vld [vmem:[#allocation4 + $0x1124] ss:$16 sps:$4 sm:$0xff]  }
 0x14e   :  { %6689 = vmatpush1.bf16.msra.mxu1 %v9521_v53  ;;  %6649 = vmatprep.subr.bf16.mxu0 %v9526_v54  ;;  %v9589_v53 = vld [vmem:[#allocation4 + $0x1324] ss:$16 sps:$4 sm:$0xff]   ;;  %v9584_v54 = vld [vmem:[#allocation4 + $0x1120] ss:$16 sps:$4 sm:$0xff]  }
 0x14f   :  { %6690 = vmatprep.subr.bf16.mxu1 %v9529_v55  ;;  %v9587_v55 = vld [vmem:[#allocation4 + $0x1320] ss:$16 sps:$4 sm:$0xff]  }
 0x151   :  { %6650 = vmatpush1.bf16.msra.mxu0 %v9524_v56  ;;  %v9592_v56 = vld [vmem:[#allocation4 + $0x1104] ss:$16 sps:$4 sm:$0xff]  }
 0x152   :  { %6691 = vmatpush1.bf16.msra.mxu1 %v9527_v58  ;;  %6651 = vmatprep.subr.bf16.mxu0 %v9532_v59  ;;  %v9595_v58 = vld [vmem:[#allocation4 + $0x1304] ss:$16 sps:$4 sm:$0xff]   ;;  %v9590_v59 = vld [vmem:[#allocation4 + $0x1100] ss:$16 sps:$4 sm:$0xff]  }
 0x153   :  { %6692 = vmatprep.subr.bf16.mxu1 %v9535_v60  ;;  %v9593_v60 = vld [vmem:[#allocation4 + $0x1300] ss:$16 sps:$4 sm:$0xff]  }
 0x155   :  { %6652 = vmatpush1.bf16.msra.mxu0 %v9530_v61  ;;  %v99_v61 = vld [vmem:[#allocation2 + $0x80] sm:$0xff] }
 0x156   :  { %6693 = vmatpush1.bf16.msra.mxu1 %v9533_v62  ;;  %6653 = vmatprep.subr.bf16.mxu0 %v9538_v63  ;;  %v101_v62 = vld [vmem:[#allocation2 + $0x90] sm:$0xff] }
 0x157   :  { %6694 = vmatprep.subr.bf16.mxu1 %v9541_v0  ;;  %v9598_v63 = vld [vmem:[#allocation4 + $0x14e4] ss:$16 sps:$4 sm:$0xff]  }
 0x158   :  { %v9601_v0 = vld [vmem:[#allocation4 + $0x16e4] ss:$16 sps:$4 sm:$0xff]  }
 0x159   :  { %6654 = vmatpush1.bf16.msra.mxu0 %v9536_v1  ;;  %v10915_v1 = vpack.c.bf16 %v99_v61, %v99_v61  ;;  %v9634_v61 = vld [vmem:[#allocation4 + $0x1424] ss:$16 sps:$4 sm:$0xff]  }
 0x15a   :  { %6695 = vmatpush1.bf16.msra.mxu1 %v9539_v2  ;;  %6655 = vmatprep.subr.bf16.mxu0 %v9544_v3  ;;  %v10917_v2 = vpack.c.bf16 %v101_v62, %v101_v62  ;;  %v104_v3 = vld [vmem:[#allocation2 + $0xa8] sm:$0xff]  ;;  %v9637_v62 = vld [vmem:[#allocation4 + $0x1624] ss:$16 sps:$4 sm:$0xff]  }
 0x15b   :  { %6696 = vmatprep.subr.bf16.mxu1 %v9547_v4  ;;  %v106_v4 = vld [vmem:[#allocation2 + $0xb8] sm:$0xff] }
 0x15d   :  { %6656 = vmatpush1.bf16.msra.mxu0 %v9542_v5  ;;  %v9596_v5 = vld [vmem:[#allocation4 + $0x14e0] ss:$16 sps:$4 sm:$0xff]  }
 0x15e   :  { %6697 = vmatpush1.bf16.msra.mxu1 %v9545_v6  ;;  %6657 = vmatprep.subr.bf16.mxu0 %v9550_v11  ;;  %v9599_v6 = vld [vmem:[#allocation4 + $0x16e0] ss:$16 sps:$4 sm:$0xff]   ;;  %v9604_v11 = vld [vmem:[#allocation4 + $0x14c4] ss:$16 sps:$4 sm:$0xff]  }
 0x15f   :  { %6698 = vmatprep.subr.bf16.mxu1 %v9553_v12  ;;  %v9607_v12 = vld [vmem:[#allocation4 + $0x16c4] ss:$16 sps:$4 sm:$0xff]  }
 0x161   :  { %6658 = vmatpush2.bf16.msra.mxu0 %v9548_v13  ;;  %v9602_v13 = vld [vmem:[#allocation4 + $0x14c0] ss:$16 sps:$4 sm:$0xff]  }
 0x162   :  { %6699 = vmatpush2.bf16.msra.mxu1 %v9551_v14  ;;  %6659 = vmatprep.subr.bf16.mxu0 %v9556_v15  ;;  %v9605_v14 = vld [vmem:[#allocation4 + $0x16c0] ss:$16 sps:$4 sm:$0xff]   ;;  %v10919_v15 = vpack.c.bf16 %v104_v3, %v104_v3  ;;  %v9640_v3 = vld [vmem:[#allocation4 + $0x1404] ss:$16 sps:$4 sm:$0xff]  }
 0x163   :  { %6700 = vmatprep.subr.bf16.mxu1 %v9559_v16  ;;  %v10921_v16 = vpack.c.bf16 %v106_v4, %v106_v4  ;;  %v9643_v4 = vld [vmem:[#allocation4 + $0x1604] ss:$16 sps:$4 sm:$0xff]  }
 0x165   :  { %6660 = vmatpush2.bf16.msra.mxu0 %v9554_v19 }
 0x166   :  { %6701 = vmatpush2.bf16.msra.mxu1 %v9557_v22  ;;  %6661 = vmatprep.subr.bf16.mxu0 %v9562_v23 }
 0x167   :  { %6702 = vmatprep.subr.bf16.mxu1 %v9565_v24 }
 0x169   :  { %6662 = vmatpush2.bf16.msra.mxu0 %v9560_v25 }
 0x16a   :  { %6703 = vmatpush2.bf16.msra.mxu1 %v9563_v26  ;;  %6663 = vmatprep.subr.bf16.mxu0 %v9568_v27  ;;  %v9610_v26 = vld [vmem:[#allocation4 + $0x14a4] ss:$16 sps:$4 sm:$0xff]  }
 0x16b   :  { %6704 = vmatprep.subr.bf16.mxu1 %v9571_v28  ;;  %v9613_v27 = vld [vmem:[#allocation4 + $0x16a4] ss:$16 sps:$4 sm:$0xff]  }
 0x16d   :  { %6664 = vmatpush2.bf16.msra.mxu0 %v9566_v30 }
 0x16e   :  { %6705 = vmatpush2.bf16.msra.mxu1 %v9569_v33  ;;  %6665 = vmatprep.subr.bf16.mxu0 %v9574_v34  ;;  %v9608_v33 = vld [vmem:[#allocation4 + $0x14a0] ss:$16 sps:$4 sm:$0xff]  }
 0x16f   :  { %6706 = vmatprep.subr.bf16.mxu1 %v9577_v35  ;;  %v9611_v34 = vld [vmem:[#allocation4 + $0x16a0] ss:$16 sps:$4 sm:$0xff]  }
 0x171   :  { %6666 = vmatpush2.bf16.msra.mxu0 %v9572_v36 }
 0x172   :  { %6707 = vmatpush2.bf16.msra.mxu1 %v9575_v39  ;;  %6667 = vmatprep.subr.bf16.mxu0 %v9580_v41 }
 0x173   :  { %6708 = vmatprep.subr.bf16.mxu1 %v9583_v44  ;;  %v9616_v44 = vld [vmem:[#allocation4 + $0x1484] ss:$16 sps:$4 sm:$0xff]  }
 0x175   :  { %6668 = vmatpush2.bf16.msra.mxu0 %v9578_v45  ;;  %v9619_v45 = vld [vmem:[#allocation4 + $0x1684] ss:$16 sps:$4 sm:$0xff]  }
 0x176   :  { %6709 = vmatpush2.bf16.msra.mxu1 %v9581_v46  ;;  %6669 = vmatprep.subr.bf16.mxu0 %v9586_v47  ;;  %v9617_v46 = vld [vmem:[#allocation4 + $0x1680] ss:$16 sps:$4 sm:$0xff]   ;;  %v9622_v47 = vld [vmem:[#allocation4 + $0x1464] ss:$16 sps:$4 sm:$0xff]  }
 0x177   :  { %6710 = vmatprep.subr.bf16.mxu1 %v9589_v53  ;;  %v9625_v53 = vld [vmem:[#allocation4 + $0x1664] ss:$16 sps:$4 sm:$0xff]  }
 0x179   :  { %6670 = vmatpush2.bf16.msra.mxu0 %v9584_v54  ;;  %v9620_v54 = vld [vmem:[#allocation4 + $0x1460] ss:$16 sps:$4 sm:$0xff]  }
 0x17a   :  { %6711 = vmatpush2.bf16.msra.mxu1 %v9587_v55  ;;  %6671 = vmatprep.subr.bf16.mxu0 %v9592_v56  ;;  %v9623_v55 = vld [vmem:[#allocation4 + $0x1660] ss:$16 sps:$4 sm:$0xff]   ;;  %v9628_v56 = vld [vmem:[#allocation4 + $0x1444] ss:$16 sps:$4 sm:$0xff]  }
 0x17b   :  { %6712 = vmatprep.subr.bf16.mxu1 %v9595_v58  ;;  %v9631_v58 = vld [vmem:[#allocation4 + $0x1644] ss:$16 sps:$4 sm:$0xff]  }
 0x17d   :  { %6672 = vmatpush2.bf16.msra.mxu0 %v9590_v59  ;;  %v9626_v59 = vld [vmem:[#allocation4 + $0x1440] ss:$16 sps:$4 sm:$0xff]  }
 0x17e   :  { %6713 = vmatpush2.bf16.msra.mxu1 %v9593_v60  ;;  %6723 = vmatprep.subr.bf16.mxu0 %v9598_v63  ;;  %v9629_v60 = vld [vmem:[#allocation4 + $0x1640] ss:$16 sps:$4 sm:$0xff]  }
 0x17f   :  { %6764 = vmatprep.subr.bf16.mxu1 %v9601_v0  ;;  %v9632_v63 = vld [vmem:[#allocation4 + $0x1420] ss:$16 sps:$4 sm:$0xff]  }
 0x180   :  { %v6429_v19 = vpop.f32.mrf.mxu0  ;;  %6674 = vmatmul.mubr.bf16.vlgmr.msra.gmra.mxu0 %v10915_v1  ;;  %v9635_v0 = vld [vmem:[#allocation4 + $0x1620] ss:$16 sps:$4 sm:$0xff]  }
 0x181   :  { %v6470_v22 = vpop.f32.mrf.mxu1  ;;  %6715 = vmatmul.mubr.bf16.vlgmr.msra.gmra.mxu1 %v10917_v2  ;;  %v6430_v23 = vadd.f32 %v6429_v19, %v10909_v31  ;;  %6724 = vmatpush1.bf16.msra.mxu0 %v9596_v5  ;;  %v9638_v5 = vld [vmem:[#allocation4 + $0x1400] ss:$16 sps:$4 sm:$0xff]   ;;  %v9652_v19 = vld [vmem:[#allocation4 + $0x15c4] ss:$16 sps:$4 sm:$0xff]  }
 0x182   :  { %6765 = vmatpush1.bf16.msra.mxu1 %v9599_v6  ;;  %v6431_v24 = vpop.f32.mrf.mxu0  ;;  %6725 = vmatprep.subr.bf16.mxu0 %v9604_v11  ;;  %v9641_v6 = vld [vmem:[#allocation4 + $0x1600] ss:$16 sps:$4 sm:$0xff]   ;;  %v9646_v11 = vld [vmem:[#allocation4 + $0x15e4] ss:$16 sps:$4 sm:$0xff]  }
 0x183   :  { %v6472_v25 = vpop.f32.mrf.mxu1  ;;  %6766 = vmatprep.subr.bf16.mxu1 %v9607_v12  ;;  %v10926_v28 = vadd.f32 %v6470_v22, %v6430_v23  ;;  %v6432_v30 = vadd.f32 %v6431_v24, %v10913_v38  ;;  %6755 = vmatprep.mubr.bf16.mxu0 %v10919_v15  ;;  %v9614_v38 = vld [vmem:[#allocation4 + $0x1480] ss:$16 sps:$4 sm:$0xff]   ;;  %v9649_v12 = vld [vmem:[#allocation4 + $0x17e4] ss:$16 sps:$4 sm:$0xff]  }
 0x184   :  { %6796 = vmatprep.mubr.bf16.mxu1 %v10921_v16  ;;  %v6433_v35 = vpop.f32.mrf.mxu0  ;;  %v9655_v22 = vld [vmem:[#allocation4 + $0x17c4] ss:$16 sps:$4 sm:$0xff]   ;;  %v9650_v23 = vld [vmem:[#allocation4 + $0x15c0] ss:$16 sps:$4 sm:$0xff]  }
 0x185   :  { %v6474_v31 = vpop.f32.mrf.mxu1  ;;  %v10931_v36 = vadd.f32 %v6472_v25, %v6432_v30  ;;  %6726 = vmatpush1.bf16.msra.mxu0 %v9602_v13  ;;  %v9644_v13 = vld [vmem:[#allocation4 + $0x15e0] ss:$16 sps:$4 sm:$0xff]   ;;  %v9658_v25 = vld [vmem:[#allocation4 + $0x15a4] ss:$16 sps:$4 sm:$0xff]  }
 0x186   :  { %6767 = vmatpush1.bf16.msra.mxu1 %v9605_v14  ;;  %v6434_v39 = vpop.f32.mrf.mxu0  ;;  %6727 = vmatprep.subr.bf16.mxu0 %v9610_v26  ;;  %v9647_v14 = vld [vmem:[#allocation4 + $0x17e0] ss:$16 sps:$4 sm:$0xff]   ;;  %v9661_v26 = vld [vmem:[#allocation4 + $0x17a4] ss:$16 sps:$4 sm:$0xff]  }
 0x187   :  { %v6475_v41 = vpop.f32.mrf.mxu1  ;;  %6768 = vmatprep.subr.bf16.mxu1 %v9613_v27  ;;  %v9653_v24 = vld [vmem:[#allocation4 + $0x17c0] ss:$16 sps:$4 sm:$0xff]   ;;  %v9670_v39 = vld [vmem:[#allocation4 + $0x1564] ss:$16 sps:$4 sm:$0xff]  }
 0x188   :  { %v9656_v27 = vld [vmem:[#allocation4 + $0x15a0] ss:$16 sps:$4 sm:$0xff]   ;;  %v9673_v41 = vld [vmem:[#allocation4 + $0x1764] ss:$16 sps:$4 sm:$0xff]  }
 0x189   :  { %6728 = vmatpush1.bf16.msra.mxu0 %v9608_v33  ;;  %v9659_v30 = vld [vmem:[#allocation4 + $0x17a0] ss:$16 sps:$4 sm:$0xff]   ;;  %v9664_v33 = vld [vmem:[#allocation4 + $0x1584] ss:$16 sps:$4 sm:$0xff]  }
 0x18a   :  { %6769 = vmatpush1.bf16.msra.mxu1 %v9611_v34  ;;  %6729 = vmatprep.subr.bf16.mxu0 %v9616_v44  ;;  %v9667_v34 = vld [vmem:[#allocation4 + $0x1784] ss:$16 sps:$4 sm:$0xff]   ;;  %v9662_v35 = vld [vmem:[#allocation4 + $0x1580] ss:$16 sps:$4 sm:$0xff]  }
 0x18b   :  { %6770 = vmatprep.subr.bf16.mxu1 %v9619_v45  ;;  %v9665_v31 = vld [vmem:[#allocation4 + $0x1780] ss:$16 sps:$4 sm:$0xff]  }
 0x18c   :  { %v9668_v44 = vld [vmem:[#allocation4 + $0x1560] ss:$16 sps:$4 sm:$0xff]  }
 0x18d   :  { %6730 = vmatpush1.bf16.msra.mxu0 %v9614_v38  ;;  %v9671_v45 = vld [vmem:[#allocation4 + $0x1760] ss:$16 sps:$4 sm:$0xff]   ;;  %v9676_v38 = vld [vmem:[#allocation4 + $0x1544] ss:$16 sps:$4 sm:$0xff]  }
 0x18e   :  { %6771 = vmatpush1.bf16.msra.mxu1 %v9617_v46  ;;  %6731 = vmatprep.subr.bf16.mxu0 %v9622_v47  ;;  %v9679_v46 = vld [vmem:[#allocation4 + $0x1744] ss:$16 sps:$4 sm:$0xff]   ;;  %v9674_v47 = vld [vmem:[#allocation4 + $0x1540] ss:$16 sps:$4 sm:$0xff]  }
 0x18f   :  { %6772 = vmatprep.subr.bf16.mxu1 %v9625_v53  ;;  %v9677_v53 = vld [vmem:[#allocation4 + $0x1740] ss:$16 sps:$4 sm:$0xff]  }
 0x191   :  { %6732 = vmatpush1.bf16.msra.mxu0 %v9620_v54  ;;  %v9682_v54 = vld [vmem:[#allocation4 + $0x1524] ss:$16 sps:$4 sm:$0xff]  }
 0x192   :  { %6773 = vmatpush1.bf16.msra.mxu1 %v9623_v55  ;;  %6733 = vmatprep.subr.bf16.mxu0 %v9628_v56  ;;  %v9685_v55 = vld [vmem:[#allocation4 + $0x1724] ss:$16 sps:$4 sm:$0xff]   ;;  %v9680_v56 = vld [vmem:[#allocation4 + $0x1520] ss:$16 sps:$4 sm:$0xff]  }
 0x193   :  { %6774 = vmatprep.subr.bf16.mxu1 %v9631_v58  ;;  %v9683_v58 = vld [vmem:[#allocation4 + $0x1720] ss:$16 sps:$4 sm:$0xff]  }
 0x195   :  { %6734 = vmatpush1.bf16.msra.mxu0 %v9626_v59  ;;  %v9688_v59 = vld [vmem:[#allocation4 + $0x1504] ss:$16 sps:$4 sm:$0xff]  }
 0x196   :  { %6775 = vmatpush1.bf16.msra.mxu1 %v9629_v60  ;;  %6735 = vmatprep.subr.bf16.mxu0 %v9634_v61  ;;  %v9691_v60 = vld [vmem:[#allocation4 + $0x1704] ss:$16 sps:$4 sm:$0xff]   ;;  %v9686_v61 = vld [vmem:[#allocation4 + $0x1500] ss:$16 sps:$4 sm:$0xff]  }
 0x197   :  { %6776 = vmatprep.subr.bf16.mxu1 %v9637_v62  ;;  %v9689_v62 = vld [vmem:[#allocation4 + $0x1700] ss:$16 sps:$4 sm:$0xff]  }
 0x199   :  { %6736 = vmatpush1.bf16.msra.mxu0 %v9632_v63  ;;  %v103_v63 = vld [vmem:[#allocation2 + $0xa0] sm:$0xff] }
 0x19a   :  { %6777 = vmatpush1.bf16.msra.mxu1 %v9635_v0  ;;  %6737 = vmatprep.subr.bf16.mxu0 %v9640_v3  ;;  %v105_v0 = vld [vmem:[#allocation2 + $0xb0] sm:$0xff] }
 0x19b   :  { %6778 = vmatprep.subr.bf16.mxu1 %v9643_v4  ;;  %v9694_v3 = vld [vmem:[#allocation4 + $0x18e4] ss:$16 sps:$4 sm:$0xff]  }
 0x19c   :  { %v9697_v4 = vld [vmem:[#allocation4 + $0x1ae4] ss:$16 sps:$4 sm:$0xff]  }
 0x19d   :  { %6738 = vmatpush1.bf16.msra.mxu0 %v9638_v5  ;;  %v10933_v5 = vpack.c.bf16 %v103_v63, %v103_v63  ;;  %v9724_v63 = vld [vmem:[#allocation4 + $0x1844] ss:$16 sps:$4 sm:$0xff]  }
 0x19e   :  { %6779 = vmatpush1.bf16.msra.mxu1 %v9641_v6  ;;  %6739 = vmatprep.subr.bf16.mxu0 %v9646_v11  ;;  %v10935_v6 = vpack.c.bf16 %v105_v0, %v105_v0  ;;  %v108_v11 = vld [vmem:[#allocation2 + $0xc8] sm:$0xff]  ;;  %v9727_v0 = vld [vmem:[#allocation4 + $0x1a44] ss:$16 sps:$4 sm:$0xff]  }
 0x19f   :  { %6780 = vmatprep.subr.bf16.mxu1 %v9649_v12  ;;  %v110_v12 = vld [vmem:[#allocation2 + $0xd8] sm:$0xff] }
 0x1a1   :  { %6740 = vmatpush2.bf16.msra.mxu0 %v9644_v13  ;;  %v9692_v13 = vld [vmem:[#allocation4 + $0x18e0] ss:$16 sps:$4 sm:$0xff]  }
 0x1a2   :  { %6781 = vmatpush2.bf16.msra.mxu1 %v9647_v14  ;;  %6741 = vmatprep.subr.bf16.mxu0 %v9652_v19  ;;  %v9695_v14 = vld [vmem:[#allocation4 + $0x1ae0] ss:$16 sps:$4 sm:$0xff]   ;;  %v9700_v19 = vld [vmem:[#allocation4 + $0x18c4] ss:$16 sps:$4 sm:$0xff]  }
 0x1a3   :  { %6782 = vmatprep.subr.bf16.mxu1 %v9655_v22  ;;  %v9703_v22 = vld [vmem:[#allocation4 + $0x1ac4] ss:$16 sps:$4 sm:$0xff]  }
 0x1a5   :  { %6742 = vmatpush2.bf16.msra.mxu0 %v9650_v23  ;;  %v9698_v23 = vld [vmem:[#allocation4 + $0x18c0] ss:$16 sps:$4 sm:$0xff]  }
 0x1a6   :  { %6783 = vmatpush2.bf16.msra.mxu1 %v9653_v24  ;;  %6743 = vmatprep.subr.bf16.mxu0 %v9658_v25  ;;  %v9701_v24 = vld [vmem:[#allocation4 + $0x1ac0] ss:$16 sps:$4 sm:$0xff]   ;;  %v10937_v25 = vpack.c.bf16 %v108_v11, %v108_v11  ;;  %v9730_v11 = vld [vmem:[#allocation4 + $0x1824] ss:$16 sps:$4 sm:$0xff]  }
 0x1a7   :  { %6784 = vmatprep.subr.bf16.mxu1 %v9661_v26  ;;  %v10939_v26 = vpack.c.bf16 %v110_v12, %v110_v12  ;;  %v9733_v12 = vld [vmem:[#allocation4 + $0x1a24] ss:$16 sps:$4 sm:$0xff]  }
 0x1a9   :  { %6744 = vmatpush2.bf16.msra.mxu0 %v9656_v27 }
 0x1aa   :  { %6785 = vmatpush2.bf16.msra.mxu1 %v9659_v30  ;;  %6745 = vmatprep.subr.bf16.mxu0 %v9664_v33 }
 0x1ab   :  { %6786 = vmatprep.subr.bf16.mxu1 %v9667_v34 }
 0x1ad   :  { %6746 = vmatpush2.bf16.msra.mxu0 %v9662_v35 }
 0x1ae   :  { %6787 = vmatpush2.bf16.msra.mxu1 %v9665_v31  ;;  %6747 = vmatprep.subr.bf16.mxu0 %v9670_v39  ;;  %v9706_v31 = vld [vmem:[#allocation4 + $0x18a4] ss:$16 sps:$4 sm:$0xff]  }
 0x1af   :  { %6788 = vmatprep.subr.bf16.mxu1 %v9673_v41  ;;  %v9709_v39 = vld [vmem:[#allocation4 + $0x1aa4] ss:$16 sps:$4 sm:$0xff]  }
 0x1b1   :  { %6748 = vmatpush2.bf16.msra.mxu0 %v9668_v44 }
 0x1b2   :  { %6789 = vmatpush2.bf16.msra.mxu1 %v9671_v45  ;;  %6749 = vmatprep.subr.bf16.mxu0 %v9676_v38  ;;  %v9704_v45 = vld [vmem:[#allocation4 + $0x18a0] ss:$16 sps:$4 sm:$0xff]  }
 0x1b3   :  { %6790 = vmatprep.subr.bf16.mxu1 %v9679_v46  ;;  %v9707_v38 = vld [vmem:[#allocation4 + $0x1aa0] ss:$16 sps:$4 sm:$0xff]  }
 0x1b5   :  { %6750 = vmatpush2.bf16.msra.mxu0 %v9674_v47 }
 0x1b6   :  { %6791 = vmatpush2.bf16.msra.mxu1 %v9677_v53  ;;  %6751 = vmatprep.subr.bf16.mxu0 %v9682_v54 }
 0x1b7   :  { %6792 = vmatprep.subr.bf16.mxu1 %v9685_v55  ;;  %v9712_v55 = vld [vmem:[#allocation4 + $0x1884] ss:$16 sps:$4 sm:$0xff]  }
 0x1b9   :  { %6752 = vmatpush2.bf16.msra.mxu0 %v9680_v56  ;;  %v9715_v56 = vld [vmem:[#allocation4 + $0x1a84] ss:$16 sps:$4 sm:$0xff]  }
 0x1ba   :  { %6793 = vmatpush2.bf16.msra.mxu1 %v9683_v58  ;;  %6753 = vmatprep.subr.bf16.mxu0 %v9688_v59  ;;  %v9713_v58 = vld [vmem:[#allocation4 + $0x1a80] ss:$16 sps:$4 sm:$0xff]   ;;  %v9718_v59 = vld [vmem:[#allocation4 + $0x1864] ss:$16 sps:$4 sm:$0xff]  }
 0x1bb   :  { %6794 = vmatprep.subr.bf16.mxu1 %v9691_v60  ;;  %v9721_v60 = vld [vmem:[#allocation4 + $0x1a64] ss:$16 sps:$4 sm:$0xff]  }
 0x1bd   :  { %6754 = vmatpush2.bf16.msra.mxu0 %v9686_v61  ;;  %v9716_v61 = vld [vmem:[#allocation4 + $0x1860] ss:$16 sps:$4 sm:$0xff]  }
 0x1be   :  { %6795 = vmatpush2.bf16.msra.mxu1 %v9689_v62  ;;  %6805 = vmatprep.subr.bf16.mxu0 %v9694_v3  ;;  %v9719_v62 = vld [vmem:[#allocation4 + $0x1a60] ss:$16 sps:$4 sm:$0xff]  }
 0x1bf   :  { %6846 = vmatprep.subr.bf16.mxu1 %v9697_v4  ;;  %v9722_v3 = vld [vmem:[#allocation4 + $0x1840] ss:$16 sps:$4 sm:$0xff]  }
 0x1c0   :  { %v6511_v27 = vpop.f32.mrf.mxu0  ;;  %6756 = vmatmul.mubr.bf16.vlgmr.msra.gmra.mxu0 %v10933_v5  ;;  %v9725_v4 = vld [vmem:[#allocation4 + $0x1a40] ss:$16 sps:$4 sm:$0xff]  }
 0x1c1   :  { %v6552_v30 = vpop.f32.mrf.mxu1  ;;  %6797 = vmatmul.mubr.bf16.vlgmr.msra.gmra.mxu1 %v10935_v6  ;;  %v6512_v33 = vadd.f32 %v6511_v27, %v10926_v28  ;;  %6806 = vmatpush1.bf16.msra.mxu0 %v9692_v13  ;;  %v9728_v13 = vld [vmem:[#allocation4 + $0x1820] ss:$16 sps:$4 sm:$0xff]   ;;  %v9742_v27 = vld [vmem:[#allocation4 + $0x19e4] ss:$16 sps:$4 sm:$0xff]  }
 0x1c2   :  { %6847 = vmatpush1.bf16.msra.mxu1 %v9695_v14  ;;  %v6513_v34 = vpop.f32.mrf.mxu0  ;;  %6807 = vmatprep.subr.bf16.mxu0 %v9700_v19  ;;  %v9731_v14 = vld [vmem:[#allocation4 + $0x1a20] ss:$16 sps:$4 sm:$0xff]   ;;  %v9736_v19 = vld [vmem:[#allocation4 + $0x1804] ss:$16 sps:$4 sm:$0xff]  }
 0x1c3   :  { %v6554_v35 = vpop.f32.mrf.mxu1  ;;  %6848 = vmatprep.subr.bf16.mxu1 %v9703_v22  ;;  %v10944_v41 = vadd.f32 %v6552_v30, %v6512_v33  ;;  %v6514_v44 = vadd.f32 %v6513_v34, %v10931_v36  ;;  %6837 = vmatprep.mubr.bf16.mxu0 %v10937_v25  ;;  %v9710_v36 = vld [vmem:[#allocation4 + $0x1880] ss:$16 sps:$4 sm:$0xff]   ;;  %v9739_v22 = vld [vmem:[#allocation4 + $0x1a04] ss:$16 sps:$4 sm:$0xff]  }
 0x1c4   :  { %6878 = vmatprep.mubr.bf16.mxu1 %v10939_v26  ;;  %v6515_v46 = vpop.f32.mrf.mxu0  ;;  %v9745_v30 = vld [vmem:[#allocation4 + $0x1be4] ss:$16 sps:$4 sm:$0xff]   ;;  %v9740_v33 = vld [vmem:[#allocation4 + $0x19e0] ss:$16 sps:$4 sm:$0xff]  }
 0x1c5   :  { %v6556_v28 = vpop.f32.mrf.mxu1  ;;  %v10949_v47 = vadd.f32 %v6554_v35, %v6514_v44  ;;  %6808 = vmatpush1.bf16.msra.mxu0 %v9698_v23  ;;  %v9734_v23 = vld [vmem:[#allocation4 + $0x1800] ss:$16 sps:$4 sm:$0xff]   ;;  %v9748_v35 = vld [vmem:[#allocation4 + $0x19c4] ss:$16 sps:$4 sm:$0xff]  }
 0x1c6   :  { %6849 = vmatpush1.bf16.msra.mxu1 %v9701_v24  ;;  %v6516_v53 = vpop.f32.mrf.mxu0  ;;  %6809 = vmatprep.subr.bf16.mxu0 %v9706_v31  ;;  %v9737_v24 = vld [vmem:[#allocation4 + $0x1a00] ss:$16 sps:$4 sm:$0xff]   ;;  %v9751_v31 = vld [vmem:[#allocation4 + $0x1bc4] ss:$16 sps:$4 sm:$0xff]  }
 0x1c7   :  { %v6557_v54 = vpop.f32.mrf.mxu1  ;;  %6850 = vmatprep.subr.bf16.mxu1 %v9709_v39  ;;  %v9743_v34 = vld [vmem:[#allocation4 + $0x1be0] ss:$16 sps:$4 sm:$0xff]   ;;  %v9760_v53 = vld [vmem:[#allocation4 + $0x1984] ss:$16 sps:$4 sm:$0xff]  }
 0x1c8   :  { %v9746_v39 = vld [vmem:[#allocation4 + $0x19c0] ss:$16 sps:$4 sm:$0xff]   ;;  %v9763_v54 = vld [vmem:[#allocation4 + $0x1b84] ss:$16 sps:$4 sm:$0xff]  }
 0x1c9   :  { %6810 = vmatpush1.bf16.msra.mxu0 %v9704_v45  ;;  %v9749_v44 = vld [vmem:[#allocation4 + $0x1bc0] ss:$16 sps:$4 sm:$0xff]   ;;  %v9754_v45 = vld [vmem:[#allocation4 + $0x19a4] ss:$16 sps:$4 sm:$0xff]  }
 0x1ca   :  { %6851 = vmatpush1.bf16.msra.mxu1 %v9707_v38  ;;  %6811 = vmatprep.subr.bf16.mxu0 %v9712_v55  ;;  %v9757_v38 = vld [vmem:[#allocation4 + $0x1ba4] ss:$16 sps:$4 sm:$0xff]   ;;  %v9752_v46 = vld [vmem:[#allocation4 + $0x19a0] ss:$16 sps:$4 sm:$0xff]  }
 0x1cb   :  { %6852 = vmatprep.subr.bf16.mxu1 %v9715_v56  ;;  %v9755_v28 = vld [vmem:[#allocation4 + $0x1ba0] ss:$16 sps:$4 sm:$0xff]  }
 0x1cc   :  { %v9758_v55 = vld [vmem:[#allocation4 + $0x1980] ss:$16 sps:$4 sm:$0xff]  }
 0x1cd   :  { %6812 = vmatpush1.bf16.msra.mxu0 %v9710_v36  ;;  %v9761_v56 = vld [vmem:[#allocation4 + $0x1b80] ss:$16 sps:$4 sm:$0xff]   ;;  %v9766_v36 = vld [vmem:[#allocation4 + $0x1964] ss:$16 sps:$4 sm:$0xff]  }
 0x1ce   :  { %6853 = vmatpush1.bf16.msra.mxu1 %v9713_v58  ;;  %6813 = vmatprep.subr.bf16.mxu0 %v9718_v59  ;;  %v9769_v58 = vld [vmem:[#allocation4 + $0x1b64] ss:$16 sps:$4 sm:$0xff]   ;;  %v9764_v59 = vld [vmem:[#allocation4 + $0x1960] ss:$16 sps:$4 sm:$0xff]  }
 0x1cf   :  { %6854 = vmatprep.subr.bf16.mxu1 %v9721_v60  ;;  %v9767_v60 = vld [vmem:[#allocation4 + $0x1b60] ss:$16 sps:$4 sm:$0xff]  }
 0x1d1   :  { %6814 = vmatpush1.bf16.msra.mxu0 %v9716_v61  ;;  %v9772_v61 = vld [vmem:[#allocation4 + $0x1944] ss:$16 sps:$4 sm:$0xff]  }
 0x1d2   :  { %6855 = vmatpush1.bf16.msra.mxu1 %v9719_v62  ;;  %6815 = vmatprep.subr.bf16.mxu0 %v9724_v63  ;;  %v9775_v62 = vld [vmem:[#allocation4 + $0x1b44] ss:$16 sps:$4 sm:$0xff]   ;;  %v9770_v63 = vld [vmem:[#allocation4 + $0x1940] ss:$16 sps:$4 sm:$0xff]  }
 0x1d3   :  { %6856 = vmatprep.subr.bf16.mxu1 %v9727_v0  ;;  %v9773_v0 = vld [vmem:[#allocation4 + $0x1b40] ss:$16 sps:$4 sm:$0xff]  }
 0x1d5   :  { %6816 = vmatpush1.bf16.msra.mxu0 %v9722_v3  ;;  %v9778_v3 = vld [vmem:[#allocation4 + $0x1924] ss:$16 sps:$4 sm:$0xff]  }
 0x1d6   :  { %6857 = vmatpush1.bf16.msra.mxu1 %v9725_v4  ;;  %6817 = vmatprep.subr.bf16.mxu0 %v9730_v11  ;;  %v9781_v4 = vld [vmem:[#allocation4 + $0x1b24] ss:$16 sps:$4 sm:$0xff]   ;;  %v9776_v11 = vld [vmem:[#allocation4 + $0x1920] ss:$16 sps:$4 sm:$0xff]  }
 0x1d7   :  { %6858 = vmatprep.subr.bf16.mxu1 %v9733_v12  ;;  %v9779_v12 = vld [vmem:[#allocation4 + $0x1b20] ss:$16 sps:$4 sm:$0xff]  }
 0x1d9   :  { %6818 = vmatpush1.bf16.msra.mxu0 %v9728_v13  ;;  %v9784_v13 = vld [vmem:[#allocation4 + $0x1904] ss:$16 sps:$4 sm:$0xff]  }
 0x1da   :  { %6859 = vmatpush1.bf16.msra.mxu1 %v9731_v14  ;;  %6819 = vmatprep.subr.bf16.mxu0 %v9736_v19  ;;  %v9787_v14 = vld [vmem:[#allocation4 + $0x1b04] ss:$16 sps:$4 sm:$0xff]   ;;  %v9782_v19 = vld [vmem:[#allocation4 + $0x1900] ss:$16 sps:$4 sm:$0xff]  }
 0x1db   :  { %6860 = vmatprep.subr.bf16.mxu1 %v9739_v22  ;;  %v9785_v22 = vld [vmem:[#allocation4 + $0x1b00] ss:$16 sps:$4 sm:$0xff]  }
 0x1dd   :  { %6820 = vmatpush1.bf16.msra.mxu0 %v9734_v23  ;;  %v107_v23 = vld [vmem:[#allocation2 + $0xc0] sm:$0xff] }
 0x1de   :  { %6861 = vmatpush1.bf16.msra.mxu1 %v9737_v24  ;;  %6821 = vmatprep.subr.bf16.mxu0 %v9742_v27  ;;  %v109_v24 = vld [vmem:[#allocation2 + $0xd0] sm:$0xff] }
 0x1df   :  { %6862 = vmatprep.subr.bf16.mxu1 %v9745_v30  ;;  %v9790_v27 = vld [vmem:[#allocation4 + $0x1ce4] ss:$16 sps:$4 sm:$0xff]  }
 0x1e0   :  { %v9793_v30 = vld [vmem:[#allocation4 + $0x1ee4] ss:$16 sps:$4 sm:$0xff]  }
 0x1e1   :  { %6822 = vmatpush2.bf16.msra.mxu0 %v9740_v33  ;;  %v112_v33 = vld [vmem:[#allocation2 + $0xe8] sm:$0xff] }
 0x1e2   :  { %6863 = vmatpush2.bf16.msra.mxu1 %v9743_v34  ;;  %6823 = vmatprep.subr.bf16.mxu0 %v9748_v35  ;;  %v114_v34 = vld [vmem:[#allocation2 + $0xf8] sm:$0xff]  ;;  %v9788_v35 = vld [vmem:[#allocation4 + $0x1ce0] ss:$16 sps:$4 sm:$0xff]  }
 0x1e3   :  { %6864 = vmatprep.subr.bf16.mxu1 %v9751_v31  ;;  %v9791_v31 = vld [vmem:[#allocation4 + $0x1ee0] ss:$16 sps:$4 sm:$0xff]  }
 0x1e5   :  { %6824 = vmatpush2.bf16.msra.mxu0 %v9746_v39  ;;  %v10951_v39 = vpack.c.bf16 %v107_v23, %v107_v23  ;;  %v9814_v23 = vld [vmem:[#allocation4 + $0x1c64] ss:$16 sps:$4 sm:$0xff]  }
 0x1e6   :  { %6865 = vmatpush2.bf16.msra.mxu1 %v9749_v44  ;;  %6825 = vmatprep.subr.bf16.mxu0 %v9754_v45  ;;  %v10953_v44 = vpack.c.bf16 %v109_v24, %v109_v24  ;;  %v9796_v45 = vld [vmem:[#allocation4 + $0x1cc4] ss:$16 sps:$4 sm:$0xff]  }
 0x1e7   :  { %6866 = vmatprep.subr.bf16.mxu1 %v9757_v38  ;;  %v9799_v38 = vld [vmem:[#allocation4 + $0x1ec4] ss:$16 sps:$4 sm:$0xff]  }
 0x1e8   :  { %v9817_v24 = vld [vmem:[#allocation4 + $0x1e64] ss:$16 sps:$4 sm:$0xff]  }
 0x1e9   :  { %6826 = vmatpush2.bf16.msra.mxu0 %v9752_v46  ;;  %v9794_v46 = vld [vmem:[#allocation4 + $0x1cc0] ss:$16 sps:$4 sm:$0xff]  }
 0x1ea   :  { %6867 = vmatpush2.bf16.msra.mxu1 %v9755_v28  ;;  %6827 = vmatprep.subr.bf16.mxu0 %v9760_v53  ;;  %v9797_v28 = vld [vmem:[#allocation4 + $0x1ec0] ss:$16 sps:$4 sm:$0xff]   ;;  %v10955_v53 = vpack.c.bf16 %v112_v33, %v112_v33  ;;  %v9820_v33 = vld [vmem:[#allocation4 + $0x1c44] ss:$16 sps:$4 sm:$0xff]  }
 0x1eb   :  { %6868 = vmatprep.subr.bf16.mxu1 %v9763_v54  ;;  %v10957_v54 = vpack.c.bf16 %v114_v34, %v114_v34  ;;  %v9823_v34 = vld [vmem:[#allocation4 + $0x1e44] ss:$16 sps:$4 sm:$0xff]  }
 0x1ed   :  { %6828 = vmatpush2.bf16.msra.mxu0 %v9758_v55 }
 0x1ee   :  { %6869 = vmatpush2.bf16.msra.mxu1 %v9761_v56  ;;  %6829 = vmatprep.subr.bf16.mxu0 %v9766_v36 }
 0x1ef   :  { %6870 = vmatprep.subr.bf16.mxu1 %v9769_v58 }
 0x1f1   :  { %6830 = vmatpush2.bf16.msra.mxu0 %v9764_v59 }
 0x1f2   :  { %6871 = vmatpush2.bf16.msra.mxu1 %v9767_v60  ;;  %6831 = vmatprep.subr.bf16.mxu0 %v9772_v61  ;;  %v9802_v60 = vld [vmem:[#allocation4 + $0x1ca4] ss:$16 sps:$4 sm:$0xff]  }
 0x1f3   :  { %6872 = vmatprep.subr.bf16.mxu1 %v9775_v62  ;;  %v9805_v61 = vld [vmem:[#allocation4 + $0x1ea4] ss:$16 sps:$4 sm:$0xff]  }
 0x1f5   :  { %6832 = vmatpush2.bf16.msra.mxu0 %v9770_v63 }
 0x1f6   :  { %6873 = vmatpush2.bf16.msra.mxu1 %v9773_v0  ;;  %6833 = vmatprep.subr.bf16.mxu0 %v9778_v3  ;;  %v9800_v0 = vld [vmem:[#allocation4 + $0x1ca0] ss:$16 sps:$4 sm:$0xff]  }
 0x1f7   :  { %6874 = vmatprep.subr.bf16.mxu1 %v9781_v4  ;;  %v9803_v3 = vld [vmem:[#allocation4 + $0x1ea0] ss:$16 sps:$4 sm:$0xff]  }
 0x1f9   :  { %6834 = vmatpush2.bf16.msra.mxu0 %v9776_v11 }
 0x1fa   :  { %6875 = vmatpush2.bf16.msra.mxu1 %v9779_v12  ;;  %6835 = vmatprep.subr.bf16.mxu0 %v9784_v13 }
 0x1fb   :  { %6876 = vmatprep.subr.bf16.mxu1 %v9787_v14  ;;  %v9808_v14 = vld [vmem:[#allocation4 + $0x1c84] ss:$16 sps:$4 sm:$0xff]  }
 0x1fd   :  { %6836 = vmatpush2.bf16.msra.mxu0 %v9782_v19  ;;  %v9811_v19 = vld [vmem:[#allocation4 + $0x1e84] ss:$16 sps:$4 sm:$0xff]  }
 0x1fe   :  { %6877 = vmatpush2.bf16.msra.mxu1 %v9785_v22  ;;  %6887 = vmatprep.subr.bf16.mxu0 %v9790_v27  ;;  %v9809_v22 = vld [vmem:[#allocation4 + $0x1e80] ss:$16 sps:$4 sm:$0xff]  }
 0x1ff   :  { %6928 = vmatprep.subr.bf16.mxu1 %v9793_v30  ;;  %v9812_v27 = vld [vmem:[#allocation4 + $0x1c60] ss:$16 sps:$4 sm:$0xff]  }
 0x200   :  { %v6593_v55 = vpop.f32.mrf.mxu0  ;;  %6838 = vmatmul.mubr.bf16.vlgmr.msra.gmra.mxu0 %v10951_v39  ;;  %v9815_v30 = vld [vmem:[#allocation4 + $0x1e60] ss:$16 sps:$4 sm:$0xff]  }
 0x201   :  { %v6634_v56 = vpop.f32.mrf.mxu1  ;;  %6879 = vmatmul.mubr.bf16.vlgmr.msra.gmra.mxu1 %v10953_v44  ;;  %v6594_v36 = vadd.f32 %v6593_v55, %v10944_v41  ;;  %6888 = vmatpush1.bf16.msra.mxu0 %v9788_v35  ;;  %v9818_v35 = vld [vmem:[#allocation4 + $0x1c40] ss:$16 sps:$4 sm:$0xff]   ;;  %v9832_v55 = vld [vmem:[#allocation4 + $0x1c04] ss:$16 sps:$4 sm:$0xff]  }
 0x202   :  { %6929 = vmatpush1.bf16.msra.mxu1 %v9791_v31  ;;  %v6595_v58 = vpop.f32.mrf.mxu0  ;;  %6889 = vmatprep.subr.bf16.mxu0 %v9796_v45  ;;  %v9821_v31 = vld [vmem:[#allocation4 + $0x1e40] ss:$16 sps:$4 sm:$0xff]   ;;  %v9826_v45 = vld [vmem:[#allocation4 + $0x1c24] ss:$16 sps:$4 sm:$0xff]  }
 0x203   :  { %v6636_v59 = vpop.f32.mrf.mxu1  ;;  %6930 = vmatprep.subr.bf16.mxu1 %v9799_v38  ;;  %v10962_v62 = vadd.f32 %v6634_v56, %v6594_v36  ;;  %v6596_v63 = vadd.f32 %v6595_v58, %v10949_v47  ;;  %6919 = vmatprep.mubr.bf16.mxu0 %v10955_v53  ;;  %v9806_v47 = vld [vmem:[#allocation4 + $0x1c80] ss:$16 sps:$4 sm:$0xff]   ;;  %v9829_v38 = vld [vmem:[#allocation4 + $0x1e24] ss:$16 sps:$4 sm:$0xff]  }
 0x204   :  { %6960 = vmatprep.mubr.bf16.mxu1 %v10957_v54  ;;  %v6597_v4 = vpop.f32.mrf.mxu0  ;;  %v9835_v56 = vld [vmem:[#allocation4 + $0x1e04] ss:$16 sps:$4 sm:$0xff]   ;;  %v9830_v36 = vld [vmem:[#allocation4 + $0x1c00] ss:$16 sps:$4 sm:$0xff]  }
 0x205   :  { %v6638_v41 = vpop.f32.mrf.mxu1  ;;  %v10967_v11 = vadd.f32 %v6636_v59, %v6596_v63  ;;  %6890 = vmatpush1.bf16.msra.mxu0 %v9794_v46  ;;  %v9824_v46 = vld [vmem:[#allocation4 + $0x1c20] ss:$16 sps:$4 sm:$0xff]   ;;  %v9838_v59 = vld [vmem:[#allocation4 + $0x1de4] ss:$16 sps:$4 sm:$0xff]  }
 0x206   :  { %6931 = vmatpush1.bf16.msra.mxu1 %v9797_v28  ;;  %v6598_v12 = vpop.f32.mrf.mxu0  ;;  %6891 = vmatprep.subr.bf16.mxu0 %v9802_v60  ;;  %v9827_v28 = vld [vmem:[#allocation4 + $0x1e20] ss:$16 sps:$4 sm:$0xff]   ;;  %v9841_v60 = vld [vmem:[#allocation4 + $0x1fe4] ss:$16 sps:$4 sm:$0xff]  }
 0x207   :  { %v6639_v13 = vpop.f32.mrf.mxu1  ;;  %6932 = vmatprep.subr.bf16.mxu1 %v9805_v61  ;;  %v9833_v58 = vld [vmem:[#allocation4 + $0x1e00] ss:$16 sps:$4 sm:$0xff]   ;;  %v9850_v12 = vld [vmem:[#allocation4 + $0x1da4] ss:$16 sps:$4 sm:$0xff]  }
 0x208   :  { %v9836_v61 = vld [vmem:[#allocation4 + $0x1de0] ss:$16 sps:$4 sm:$0xff]   ;;  %v9853_v13 = vld [vmem:[#allocation4 + $0x1fa4] ss:$16 sps:$4 sm:$0xff]  }
 0x209   :  { %6892 = vmatpush1.bf16.msra.mxu0 %v9800_v0  ;;  %v9839_v63 = vld [vmem:[#allocation4 + $0x1fe0] ss:$16 sps:$4 sm:$0xff]   ;;  %v9844_v0 = vld [vmem:[#allocation4 + $0x1dc4] ss:$16 sps:$4 sm:$0xff]  }
 0x20a   :  { %6933 = vmatpush1.bf16.msra.mxu1 %v9803_v3  ;;  %6893 = vmatprep.subr.bf16.mxu0 %v9808_v14  ;;  %v9847_v3 = vld [vmem:[#allocation4 + $0x1fc4] ss:$16 sps:$4 sm:$0xff]   ;;  %v9842_v4 = vld [vmem:[#allocation4 + $0x1dc0] ss:$16 sps:$4 sm:$0xff]  }
 0x20b   :  { %6934 = vmatprep.subr.bf16.mxu1 %v9811_v19  ;;  %v9845_v41 = vld [vmem:[#allocation4 + $0x1fc0] ss:$16 sps:$4 sm:$0xff]  }
 0x20c   :  { %v9848_v14 = vld [vmem:[#allocation4 + $0x1da0] ss:$16 sps:$4 sm:$0xff]  }
 0x20d   :  { %6894 = vmatpush1.bf16.msra.mxu0 %v9806_v47  ;;  %v9851_v19 = vld [vmem:[#allocation4 + $0x1fa0] ss:$16 sps:$4 sm:$0xff]   ;;  %v9856_v47 = vld [vmem:[#allocation4 + $0x1d84] ss:$16 sps:$4 sm:$0xff]  }
 0x20e   :  { %6935 = vmatpush1.bf16.msra.mxu1 %v9809_v22  ;;  %6895 = vmatprep.subr.bf16.mxu0 %v9814_v23  ;;  %v9859_v22 = vld [vmem:[#allocation4 + $0x1f84] ss:$16 sps:$4 sm:$0xff]   ;;  %v9854_v23 = vld [vmem:[#allocation4 + $0x1d80] ss:$16 sps:$4 sm:$0xff]  }
 0x20f   :  { %6936 = vmatprep.subr.bf16.mxu1 %v9817_v24  ;;  %v9857_v24 = vld [vmem:[#allocation4 + $0x1f80] ss:$16 sps:$4 sm:$0xff]  }
 0x211   :  { %6896 = vmatpush1.bf16.msra.mxu0 %v9812_v27  ;;  %v9862_v27 = vld [vmem:[#allocation4 + $0x1d64] ss:$16 sps:$4 sm:$0xff]  }
 0x212   :  { %6937 = vmatpush1.bf16.msra.mxu1 %v9815_v30  ;;  %6897 = vmatprep.subr.bf16.mxu0 %v9820_v33  ;;  %v9865_v30 = vld [vmem:[#allocation4 + $0x1f64] ss:$16 sps:$4 sm:$0xff]   ;;  %v9860_v33 = vld [vmem:[#allocation4 + $0x1d60] ss:$16 sps:$4 sm:$0xff]  }
 0x213   :  { %6938 = vmatprep.subr.bf16.mxu1 %v9823_v34  ;;  %v9863_v34 = vld [vmem:[#allocation4 + $0x1f60] ss:$16 sps:$4 sm:$0xff]  }
 0x215   :  { %6898 = vmatpush1.bf16.msra.mxu0 %v9818_v35  ;;  %v9868_v35 = vld [vmem:[#allocation4 + $0x1d44] ss:$16 sps:$4 sm:$0xff]  }
 0x216   :  { %6939 = vmatpush1.bf16.msra.mxu1 %v9821_v31  ;;  %6899 = vmatprep.subr.bf16.mxu0 %v9826_v45  ;;  %v9871_v31 = vld [vmem:[#allocation4 + $0x1f44] ss:$16 sps:$4 sm:$0xff]   ;;  %v9866_v45 = vld [vmem:[#allocation4 + $0x1d40] ss:$16 sps:$4 sm:$0xff]  }
 0x217   :  { %6940 = vmatprep.subr.bf16.mxu1 %v9829_v38  ;;  %v9869_v38 = vld [vmem:[#allocation4 + $0x1f40] ss:$16 sps:$4 sm:$0xff]  }
 0x219   :  { %6900 = vmatpush1.bf16.msra.mxu0 %v9824_v46  ;;  %v9874_v46 = vld [vmem:[#allocation4 + $0x1d24] ss:$16 sps:$4 sm:$0xff]  }
 0x21a   :  { %6941 = vmatpush1.bf16.msra.mxu1 %v9827_v28  ;;  %6901 = vmatprep.subr.bf16.mxu0 %v9832_v55  ;;  %v9877_v28 = vld [vmem:[#allocation4 + $0x1f24] ss:$16 sps:$4 sm:$0xff]   ;;  %v9872_v55 = vld [vmem:[#allocation4 + $0x1d20] ss:$16 sps:$4 sm:$0xff]  }
 0x21b   :  { %6942 = vmatprep.subr.bf16.mxu1 %v9835_v56  ;;  %v9875_v56 = vld [vmem:[#allocation4 + $0x1f20] ss:$16 sps:$4 sm:$0xff]  }
 0x21d   :  { %6902 = vmatpush1.bf16.msra.mxu0 %v9830_v36  ;;  %v9880_v36 = vld [vmem:[#allocation4 + $0x1d04] ss:$16 sps:$4 sm:$0xff]  }
 0x21e   :  { %6943 = vmatpush1.bf16.msra.mxu1 %v9833_v58  ;;  %6903 = vmatprep.subr.bf16.mxu0 %v9838_v59  ;;  %v9883_v58 = vld [vmem:[#allocation4 + $0x1f04] ss:$16 sps:$4 sm:$0xff]   ;;  %v9878_v59 = vld [vmem:[#allocation4 + $0x1d00] ss:$16 sps:$4 sm:$0xff]  }
 0x21f   :  { %6944 = vmatprep.subr.bf16.mxu1 %v9841_v60  ;;  %v9881_v60 = vld [vmem:[#allocation4 + $0x1f00] ss:$16 sps:$4 sm:$0xff]  }
 0x221   :  { %6904 = vmatpush2.bf16.msra.mxu0 %v9836_v61  ;;  %v111_v61 = vld [vmem:[#allocation2 + $0xe0] sm:$0xff] }
 0x222   :  { %6945 = vmatpush2.bf16.msra.mxu1 %v9839_v63  ;;  %6905 = vmatprep.subr.bf16.mxu0 %v9844_v0  ;;  %v113_v63 = vld [vmem:[#allocation2 + $0xf0] sm:$0xff]  ;;  %v9886_v0 = vld [vmem:[#allocation4 + $0xec] ss:$16 sps:$4 sm:$0xff]  }
 0x223   :  { %6946 = vmatprep.subr.bf16.mxu1 %v9847_v3  ;;  %v9889_v3 = vld [vmem:[#allocation4 + $0x2ec] ss:$16 sps:$4 sm:$0xff]  }
 0x225   :  { %6906 = vmatpush2.bf16.msra.mxu0 %v9842_v4  ;;  %v9884_v4 = vld [vmem:[#allocation4 + $0xe8] ss:$16 sps:$4 sm:$0xff]  }
 0x226   :  { %6947 = vmatpush2.bf16.msra.mxu1 %v9845_v41  ;;  %6907 = vmatprep.subr.bf16.mxu0 %v9850_v12  ;;  %v9887_v41 = vld [vmem:[#allocation4 + $0x2e8] ss:$16 sps:$4 sm:$0xff]   ;;  %v10969_v12 = vpack.c.bf16 %v111_v61, %v111_v61 }
 0x227   :  { %6948 = vmatprep.subr.bf16.mxu1 %v9853_v13  ;;  %v10971_v13 = vpack.c.bf16 %v113_v63, %v113_v63  ;;  %v9908_v61 = vld [vmem:[#allocation4 + $0x68] ss:$16 sps:$4 sm:$0xff]  }
 0x228   :  { %v9911_v63 = vld [vmem:[#allocation4 + $0x268] ss:$16 sps:$4 sm:$0xff]  }
 0x229   :  { %6908 = vmatpush2.bf16.msra.mxu0 %v9848_v14  ;;  %v9892_v14 = vld [vmem:[#allocation4 + $0xcc] ss:$16 sps:$4 sm:$0xff]  }
 0x22a   :  { %6949 = vmatpush2.bf16.msra.mxu1 %v9851_v19  ;;  %6909 = vmatprep.subr.bf16.mxu0 %v9856_v47  ;;  %v9895_v19 = vld [vmem:[#allocation4 + $0x2cc] ss:$16 sps:$4 sm:$0xff]   ;;  %v9890_v47 = vld [vmem:[#allocation4 + $0xc8] ss:$16 sps:$4 sm:$0xff]  }
 0x22b   :  { %6950 = vmatprep.subr.bf16.mxu1 %v9859_v22  ;;  %v9893_v22 = vld [vmem:[#allocation4 + $0x2c8] ss:$16 sps:$4 sm:$0xff]  }
 0x22d   :  { %6910 = vmatpush2.bf16.msra.mxu0 %v9854_v23 }
 0x22e   :  { %6951 = vmatpush2.bf16.msra.mxu1 %v9857_v24  ;;  %6911 = vmatprep.subr.bf16.mxu0 %v9862_v27 }
 0x22f   :  { %6952 = vmatprep.subr.bf16.mxu1 %v9865_v30 }
 0x231   :  { %6912 = vmatpush2.bf16.msra.mxu0 %v9860_v33 }
 0x232   :  { %6953 = vmatpush2.bf16.msra.mxu1 %v9863_v34  ;;  %6913 = vmatprep.subr.bf16.mxu0 %v9868_v35  ;;  %v9898_v34 = vld [vmem:[#allocation4 + $0xac] ss:$16 sps:$4 sm:$0xff]  }
 0x233   :  { %6954 = vmatprep.subr.bf16.mxu1 %v9871_v31  ;;  %v9901_v35 = vld [vmem:[#allocation4 + $0x2ac] ss:$16 sps:$4 sm:$0xff]  }
 0x235   :  { %6914 = vmatpush2.bf16.msra.mxu0 %v9866_v45 }
 0x236   :  { %6955 = vmatpush2.bf16.msra.mxu1 %v9869_v38  ;;  %6915 = vmatprep.subr.bf16.mxu0 %v9874_v46  ;;  %v9896_v38 = vld [vmem:[#allocation4 + $0xa8] ss:$16 sps:$4 sm:$0xff]  }
 0x237   :  { %6956 = vmatprep.subr.bf16.mxu1 %v9877_v28  ;;  %v9899_v46 = vld [vmem:[#allocation4 + $0x2a8] ss:$16 sps:$4 sm:$0xff]  }
 0x239   :  { %6916 = vmatpush2.bf16.msra.mxu0 %v9872_v55 }
 0x23a   :  { %6957 = vmatpush2.bf16.msra.mxu1 %v9875_v56  ;;  %6917 = vmatprep.subr.bf16.mxu0 %v9880_v36 }
 0x23b   :  { %6958 = vmatprep.subr.bf16.mxu1 %v9883_v58  ;;  %v9904_v58 = vld [vmem:[#allocation4 + $0x8c] ss:$16 sps:$4 sm:$0xff]  }
 0x23d   :  { %6918 = vmatpush2.bf16.msra.mxu0 %v9878_v59  ;;  %v9907_v59 = vld [vmem:[#allocation4 + $0x28c] ss:$16 sps:$4 sm:$0xff]  }
 0x23e   :  { %6959 = vmatpush2.bf16.msra.mxu1 %v9881_v60  ;;  %6969 = vmatprep.subr.bf16.mxu0 %v9886_v0  ;;  %v9905_v60 = vld [vmem:[#allocation4 + $0x288] ss:$16 sps:$4 sm:$0xff]   ;;  %v9916_v0 = vld [vmem:[#allocation4 + $0x4c] ss:$16 sps:$4 sm:$0xff]  }
 0x23f   :  { %7010 = vmatprep.subr.bf16.mxu1 %v9889_v3  ;;  %v9919_v3 = vld [vmem:[#allocation4 + $0x24c] ss:$16 sps:$4 sm:$0xff]  }
 0x240   :  { %v6675_v23 = vpop.f32.mrf.mxu0  ;;  %6920 = vmatmul.mubr.bf16.vlgmr.msra.gmra.mxu0 %v10969_v12 }
 0x241   :  { %v6716_v24 = vpop.f32.mrf.mxu1  ;;  %6961 = vmatmul.mubr.bf16.vlgmr.msra.gmra.mxu1 %v10971_v13  ;;  %v6676_v27 = vadd.f32 %v6675_v23, %v10962_v62  ;;  %6970 = vmatpush1.bf16.msra.mxu0 %v9884_v4  ;;  %v9914_v4 = vld [vmem:[#allocation4 + $0x48] ss:$16 sps:$4 sm:$0xff]   ;;  %v9928_v23 = vld [vmem:[#allocation4 + $0xc] ss:$16 sps:$4 sm:$0xff]  }
 0x242   :  { %7011 = vmatpush1.bf16.msra.mxu1 %v9887_v41  ;;  %v6677_v30 = vpop.f32.mrf.mxu0  ;;  %6971 = vmatprep.subr.bf16.mxu0 %v9892_v14  ;;  %v9917_v41 = vld [vmem:[#allocation4 + $0x248] ss:$16 sps:$4 sm:$0xff]   ;;  %v9922_v14 = vld [vmem:[#allocation4 + $0x2c] ss:$16 sps:$4 sm:$0xff]  }
 0x243   :  { %v6718_v33 = vpop.f32.mrf.mxu1  ;;  %7012 = vmatprep.subr.bf16.mxu1 %v9895_v19  ;;  %v10976_v31 = vadd.f32 %v6716_v24, %v6676_v27  ;;  %v6678_v45 = vadd.f32 %v6677_v30, %v10967_v11  ;;  %7001 = vmatprep.mubr.bf16.mxu0 %v10852_v49  ;;  %v9902_v11 = vld [vmem:[#allocation4 + $0x88] ss:$16 sps:$4 sm:$0xff]   ;;  %v9910_v49 = vld [vmem:[#allocation4 + $0x6c] ss:$16 sps:$4 sm:$0xff]  }
 0x244   :  { %7042 = vmatprep.mubr.bf16.mxu1 %v10854_v52  ;;  %v6679_v28 = vpop.f32.mrf.mxu0  ;;  %v9913_v52 = vld [vmem:[#allocation4 + $0x26c] ss:$16 sps:$4 sm:$0xff]   ;;  %v9926_v27 = vld [vmem:[#allocation4 + $0x8] ss:$16 sps:$4 sm:$0xff]  }
 0x245   :  { %v6720_v62 = vpop.f32.mrf.mxu1  ;;  %v10981_v55 = vadd.f32 %v6718_v33, %v6678_v45  ;;  %6972 = vmatpush1.bf16.msra.mxu0 %v9890_v47  ;;  %v9925_v19 = vld [vmem:[#allocation4 + $0x22c] ss:$16 sps:$4 sm:$0xff]   ;;  %v9920_v47 = vld [vmem:[#allocation4 + $0x28] ss:$16 sps:$4 sm:$0xff]  }
 0x246   :  { %7013 = vmatpush1.bf16.msra.mxu1 %v9893_v22  ;;  %v6680_v56 = vpop.f32.mrf.mxu0  ;;  %6973 = vmatprep.subr.bf16.mxu0 %v9898_v34  ;;  %v9923_v22 = vld [vmem:[#allocation4 + $0x228] ss:$16 sps:$4 sm:$0xff]   ;;  %v9931_v24 = vld [vmem:[#allocation4 + $0x20c] ss:$16 sps:$4 sm:$0xff]  }
 0x247   :  { %v6721_v36 = vpop.f32.mrf.mxu1  ;;  %7014 = vmatprep.subr.bf16.mxu1 %v9901_v35  ;;  %v9929_v30 = vld [vmem:[#allocation4 + $0x208] ss:$16 sps:$4 sm:$0xff]   ;;  %v9934_v33 = vld [vmem:[#allocation4 + $0x1ec] ss:$16 sps:$4 sm:$0xff]  }
 0x248   :  { %v9937_v34 = vld [vmem:[#allocation4 + $0x3ec] ss:$16 sps:$4 sm:$0xff]   ;;  %v9932_v35 = vld [vmem:[#allocation4 + $0x1e8] ss:$16 sps:$4 sm:$0xff]  }
 0x249   :  { %6974 = vmatpush1.bf16.msra.mxu0 %v9896_v38  ;;  %v9935_v45 = vld [vmem:[#allocation4 + $0x3e8] ss:$16 sps:$4 sm:$0xff]   ;;  %v9940_v38 = vld [vmem:[#allocation4 + $0x1cc] ss:$16 sps:$4 sm:$0xff]  }
 0x24a   :  { %7015 = vmatpush1.bf16.msra.mxu1 %v9899_v46  ;;  %6975 = vmatprep.subr.bf16.mxu0 %v9904_v58  ;;  %v9943_v46 = vld [vmem:[#allocation4 + $0x3cc] ss:$16 sps:$4 sm:$0xff]   ;;  %v9938_v28 = vld [vmem:[#allocation4 + $0x1c8] ss:$16 sps:$4 sm:$0xff]  }
 0x24b   :  { %7016 = vmatprep.subr.bf16.mxu1 %v9907_v59  ;;  %v9941_v62 = vld [vmem:[#allocation4 + $0x3c8] ss:$16 sps:$4 sm:$0xff]   ;;  %v9946_v56 = vld [vmem:[#allocation4 + $0x1ac] ss:$16 sps:$4 sm:$0xff]  }
 0x24c   :  { %v9949_v36 = vld [vmem:[#allocation4 + $0x3ac] ss:$16 sps:$4 sm:$0xff]   ;;  %v9944_v58 = vld [vmem:[#allocation4 + $0x1a8] ss:$16 sps:$4 sm:$0xff]  }
 0x24d   :  { %6976 = vmatpush1.bf16.msra.mxu0 %v9902_v11  ;;  %v9947_v59 = vld [vmem:[#allocation4 + $0x3a8] ss:$16 sps:$4 sm:$0xff]   ;;  %v9952_v11 = vld [vmem:[#allocation4 + $0x18c] ss:$16 sps:$4 sm:$0xff]  }
 0x24e   :  { %7017 = vmatpush1.bf16.msra.mxu1 %v9905_v60  ;;  %6977 = vmatprep.subr.bf16.mxu0 %v9910_v49  ;;  %v9955_v60 = vld [vmem:[#allocation4 + $0x38c] ss:$16 sps:$4 sm:$0xff]   ;;  %v9950_v49 = vld [vmem:[#allocation4 + $0x188] ss:$16 sps:$4 sm:$0xff]  }
 0x24f   :  { %7018 = vmatprep.subr.bf16.mxu1 %v9913_v52  ;;  %v9953_v52 = vld [vmem:[#allocation4 + $0x388] ss:$16 sps:$4 sm:$0xff]  }
 0x251   :  { %6978 = vmatpush1.bf16.msra.mxu0 %v9908_v61  ;;  %v9958_v61 = vld [vmem:[#allocation4 + $0x16c] ss:$16 sps:$4 sm:$0xff]  }
 0x252   :  { %7019 = vmatpush1.bf16.msra.mxu1 %v9911_v63  ;;  %6979 = vmatprep.subr.bf16.mxu0 %v9916_v0  ;;  %v9961_v63 = vld [vmem:[#allocation4 + $0x36c] ss:$16 sps:$4 sm:$0xff]   ;;  %v9956_v0 = vld [vmem:[#allocation4 + $0x168] ss:$16 sps:$4 sm:$0xff]  }
 0x253   :  { %7020 = vmatprep.subr.bf16.mxu1 %v9919_v3  ;;  %v9959_v3 = vld [vmem:[#allocation4 + $0x368] ss:$16 sps:$4 sm:$0xff]  }
 0x255   :  { %6980 = vmatpush1.bf16.msra.mxu0 %v9914_v4  ;;  %v9964_v4 = vld [vmem:[#allocation4 + $0x14c] ss:$16 sps:$4 sm:$0xff]  }
 0x256   :  { %7021 = vmatpush1.bf16.msra.mxu1 %v9917_v41  ;;  %6981 = vmatprep.subr.bf16.mxu0 %v9922_v14  ;;  %v9967_v41 = vld [vmem:[#allocation4 + $0x34c] ss:$16 sps:$4 sm:$0xff]   ;;  %v9962_v14 = vld [vmem:[#allocation4 + $0x148] ss:$16 sps:$4 sm:$0xff]  }
 0x257   :  { %7022 = vmatprep.subr.bf16.mxu1 %v9925_v19  ;;  %v9965_v19 = vld [vmem:[#allocation4 + $0x348] ss:$16 sps:$4 sm:$0xff]  }
 0x259   :  { %6982 = vmatpush1.bf16.msra.mxu0 %v9920_v47  ;;  %v9970_v47 = vld [vmem:[#allocation4 + $0x12c] ss:$16 sps:$4 sm:$0xff]  }
 0x25a   :  { %7023 = vmatpush1.bf16.msra.mxu1 %v9923_v22  ;;  %6983 = vmatprep.subr.bf16.mxu0 %v9928_v23  ;;  %v9973_v22 = vld [vmem:[#allocation4 + $0x32c] ss:$16 sps:$4 sm:$0xff]   ;;  %v9968_v23 = vld [vmem:[#allocation4 + $0x128] ss:$16 sps:$4 sm:$0xff]  }
 0x25b   :  { %7024 = vmatprep.subr.bf16.mxu1 %v9931_v24  ;;  %v9971_v24 = vld [vmem:[#allocation4 + $0x328] ss:$16 sps:$4 sm:$0xff]  }
 0x25d   :  { %6984 = vmatpush1.bf16.msra.mxu0 %v9926_v27  ;;  %v9976_v27 = vld [vmem:[#allocation4 + $0x10c] ss:$16 sps:$4 sm:$0xff]  }
 0x25e   :  { %7025 = vmatpush1.bf16.msra.mxu1 %v9929_v30  ;;  %6985 = vmatprep.subr.bf16.mxu0 %v9934_v33  ;;  %v9979_v30 = vld [vmem:[#allocation4 + $0x30c] ss:$16 sps:$4 sm:$0xff]   ;;  %v9974_v33 = vld [vmem:[#allocation4 + $0x108] ss:$16 sps:$4 sm:$0xff]  }
 0x25f   :  { %7026 = vmatprep.subr.bf16.mxu1 %v9937_v34  ;;  %v9977_v34 = vld [vmem:[#allocation4 + $0x308] ss:$16 sps:$4 sm:$0xff]  }
 0x261   :  { %6986 = vmatpush2.bf16.msra.mxu0 %v9932_v35  ;;  %v9982_v35 = vld [vmem:[#allocation4 + $0x4ec] ss:$16 sps:$4 sm:$0xff]  }
 0x262   :  { %7027 = vmatpush2.bf16.msra.mxu1 %v9935_v45  ;;  %6987 = vmatprep.subr.bf16.mxu0 %v9940_v38  ;;  %v9985_v45 = vld [vmem:[#allocation4 + $0x6ec] ss:$16 sps:$4 sm:$0xff]   ;;  %v9980_v38 = vld [vmem:[#allocation4 + $0x4e8] ss:$16 sps:$4 sm:$0xff]  }
 0x263   :  { %7028 = vmatprep.subr.bf16.mxu1 %v9943_v46  ;;  %v9983_v46 = vld [vmem:[#allocation4 + $0x6e8] ss:$16 sps:$4 sm:$0xff]  }
 0x265   :  { %6988 = vmatpush2.bf16.msra.mxu0 %v9938_v28  ;;  %v9988_v28 = vld [vmem:[#allocation4 + $0x4cc] ss:$16 sps:$4 sm:$0xff]  }
 0x266   :  { %7029 = vmatpush2.bf16.msra.mxu1 %v9941_v62  ;;  %6989 = vmatprep.subr.bf16.mxu0 %v9946_v56  ;;  %v9991_v62 = vld [vmem:[#allocation4 + $0x6cc] ss:$16 sps:$4 sm:$0xff]   ;;  %v9986_v56 = vld [vmem:[#allocation4 + $0x4c8] ss:$16 sps:$4 sm:$0xff]  }
 0x267   :  { %7030 = vmatprep.subr.bf16.mxu1 %v9949_v36  ;;  %v9989_v36 = vld [vmem:[#allocation4 + $0x6c8] ss:$16 sps:$4 sm:$0xff]  }
 0x269   :  { %6990 = vmatpush2.bf16.msra.mxu0 %v9944_v58 }
 0x26a   :  { %7031 = vmatpush2.bf16.msra.mxu1 %v9947_v59  ;;  %6991 = vmatprep.subr.bf16.mxu0 %v9952_v11 }
 0x26b   :  { %7032 = vmatprep.subr.bf16.mxu1 %v9955_v60 }
 0x26d   :  { %6992 = vmatpush2.bf16.msra.mxu0 %v9950_v49 }
 0x26e   :  { %7033 = vmatpush2.bf16.msra.mxu1 %v9953_v52  ;;  %6993 = vmatprep.subr.bf16.mxu0 %v9958_v61  ;;  %v9994_v52 = vld [vmem:[#allocation4 + $0x4ac] ss:$16 sps:$4 sm:$0xff]  }
 0x26f   :  { %7034 = vmatprep.subr.bf16.mxu1 %v9961_v63  ;;  %v9997_v61 = vld [vmem:[#allocation4 + $0x6ac] ss:$16 sps:$4 sm:$0xff]  }
 0x271   :  { %6994 = vmatpush2.bf16.msra.mxu0 %v9956_v0 }
 0x272   :  { %7035 = vmatpush2.bf16.msra.mxu1 %v9959_v3  ;;  %6995 = vmatprep.subr.bf16.mxu0 %v9964_v4  ;;  %v9992_v3 = vld [vmem:[#allocation4 + $0x4a8] ss:$16 sps:$4 sm:$0xff]  }
 0x273   :  { %7036 = vmatprep.subr.bf16.mxu1 %v9967_v41  ;;  %v9995_v4 = vld [vmem:[#allocation4 + $0x6a8] ss:$16 sps:$4 sm:$0xff]  }
 0x275   :  { %6996 = vmatpush2.bf16.msra.mxu0 %v9962_v14 }
 0x276   :  { %7037 = vmatpush2.bf16.msra.mxu1 %v9965_v19  ;;  %6997 = vmatprep.subr.bf16.mxu0 %v9970_v47  ;;  %v10000_v19 = vld [vmem:[#allocation4 + $0x48c] ss:$16 sps:$4 sm:$0xff]  }
 0x277   :  { %7038 = vmatprep.subr.bf16.mxu1 %v9973_v22  ;;  %v10003_v47 = vld [vmem:[#allocation4 + $0x68c] ss:$16 sps:$4 sm:$0xff]   ;;  %v10001_v22 = vld [vmem:[#allocation4 + $0x688] ss:$16 sps:$4 sm:$0xff]  }
 0x279   :  { %6998 = vmatpush2.bf16.msra.mxu0 %v9968_v23  ;;  %v10004_v23 = vld [vmem:[#allocation4 + $0x468] ss:$16 sps:$4 sm:$0xff]  }
 0x27a   :  { %7039 = vmatpush2.bf16.msra.mxu1 %v9971_v24  ;;  %6999 = vmatprep.subr.bf16.mxu0 %v9976_v27  ;;  %v10007_v24 = vld [vmem:[#allocation4 + $0x668] ss:$16 sps:$4 sm:$0xff]   ;;  %v10012_v27 = vld [vmem:[#allocation4 + $0x44c] ss:$16 sps:$4 sm:$0xff]  }
 0x27b   :  { %7040 = vmatprep.subr.bf16.mxu1 %v9979_v30  ;;  %v10015_v30 = vld [vmem:[#allocation4 + $0x64c] ss:$16 sps:$4 sm:$0xff]  }
 0x27d   :  { %7000 = vmatpush2.bf16.msra.mxu0 %v9974_v33  ;;  %v10010_v33 = vld [vmem:[#allocation4 + $0x448] ss:$16 sps:$4 sm:$0xff]  }
 0x27e   :  { %7041 = vmatpush2.bf16.msra.mxu1 %v9977_v34  ;;  %7051 = vmatprep.subr.bf16.mxu0 %v9982_v35  ;;  %v10013_v34 = vld [vmem:[#allocation4 + $0x648] ss:$16 sps:$4 sm:$0xff]   ;;  %v10018_v35 = vld [vmem:[#allocation4 + $0x42c] ss:$16 sps:$4 sm:$0xff]  }
 0x27f   :  { %7092 = vmatprep.subr.bf16.mxu1 %v9985_v45  ;;  %v10021_v45 = vld [vmem:[#allocation4 + $0x62c] ss:$16 sps:$4 sm:$0xff]  }
 0x280   :  { %v6757_v58 = vpop.f32.mrf.mxu0  ;;  %7002 = vmatmul.mubr.bf16.vlgmr.msra.gmra.mxu0 %v10858_v8 }
 0x281   :  { %v6798_v59 = vpop.f32.mrf.mxu1  ;;  %7043 = vmatmul.mubr.bf16.vlgmr.msra.gmra.mxu1 %v10860_v9  ;;  %v6758_v11 = vadd.f32 %v6757_v58, %v10976_v31  ;;  %7052 = vmatpush1.bf16.msra.mxu0 %v9980_v38  ;;  %v10016_v38 = vld [vmem:[#allocation4 + $0x428] ss:$16 sps:$4 sm:$0xff]   ;;  %v10030_v58 = vld [vmem:[#allocation4 + $0x5ec] ss:$16 sps:$4 sm:$0xff]  }
 0x282   :  { %7093 = vmatpush1.bf16.msra.mxu1 %v9983_v46  ;;  %v6759_v60 = vpop.f32.mrf.mxu0  ;;  %7053 = vmatprep.subr.bf16.mxu0 %v9988_v28  ;;  %v10019_v46 = vld [vmem:[#allocation4 + $0x628] ss:$16 sps:$4 sm:$0xff]   ;;  %v10024_v28 = vld [vmem:[#allocation4 + $0x40c] ss:$16 sps:$4 sm:$0xff]  }
 0x283   :  { %v6800_v49 = vpop.f32.mrf.mxu1  ;;  %7094 = vmatprep.subr.bf16.mxu1 %v9991_v62  ;;  %v10986_v63 = vadd.f32 %v6798_v59, %v6758_v11  ;;  %v6760_v0 = vadd.f32 %v6759_v60, %v10981_v55  ;;  %7083 = vmatprep.mubr.bf16.mxu0 %v10864_v37  ;;  %v9998_v55 = vld [vmem:[#allocation4 + $0x488] ss:$16 sps:$4 sm:$0xff]   ;;  %v10006_v37 = vld [vmem:[#allocation4 + $0x46c] ss:$16 sps:$4 sm:$0xff]  }
 0x284   :  { %7124 = vmatprep.mubr.bf16.mxu1 %v10866_v40  ;;  %v6761_v8 = vpop.f32.mrf.mxu0  ;;  %v10009_v40 = vld [vmem:[#allocation4 + $0x66c] ss:$16 sps:$4 sm:$0xff]   ;;  %v10028_v11 = vld [vmem:[#allocation4 + $0x5e8] ss:$16 sps:$4 sm:$0xff]  }
 0x285   :  { %v6802_v9 = vpop.f32.mrf.mxu1  ;;  %v10991_v31 = vadd.f32 %v6800_v49, %v6760_v0  ;;  %7054 = vmatpush1.bf16.msra.mxu0 %v9986_v56  ;;  %v10027_v62 = vld [vmem:[#allocation4 + $0x60c] ss:$16 sps:$4 sm:$0xff]   ;;  %v10022_v56 = vld [vmem:[#allocation4 + $0x408] ss:$16 sps:$4 sm:$0xff]  }
 0x286   :  { %7095 = vmatpush1.bf16.msra.mxu1 %v9989_v36  ;;  %v6762_v41 = vpop.f32.mrf.mxu0  ;;  %7055 = vmatprep.subr.bf16.mxu0 %v9994_v52  ;;  %v10025_v36 = vld [vmem:[#allocation4 + $0x608] ss:$16 sps:$4 sm:$0xff]   ;;  %v10033_v59 = vld [vmem:[#allocation4 + $0x7ec] ss:$16 sps:$4 sm:$0xff]  }
 0x287   :  { %v6803_v14 = vpop.f32.mrf.mxu1  ;;  %7096 = vmatprep.subr.bf16.mxu1 %v9997_v61  ;;  %v10031_v60 = vld [vmem:[#allocation4 + $0x7e8] ss:$16 sps:$4 sm:$0xff]   ;;  %v10036_v49 = vld [vmem:[#allocation4 + $0x5cc] ss:$16 sps:$4 sm:$0xff]  }
 0x288   :  { %v10039_v52 = vld [vmem:[#allocation4 + $0x7cc] ss:$16 sps:$4 sm:$0xff]   ;;  %v10034_v61 = vld [vmem:[#allocation4 + $0x5c8] ss:$16 sps:$4 sm:$0xff]  }
 0x289   :  { %7056 = vmatpush1.bf16.msra.mxu0 %v9992_v3  ;;  %v10037_v0 = vld [vmem:[#allocation4 + $0x7c8] ss:$16 sps:$4 sm:$0xff]   ;;  %v10042_v3 = vld [vmem:[#allocation4 + $0x5ac] ss:$16 sps:$4 sm:$0xff]  }
 0x28a   :  { %7097 = vmatpush1.bf16.msra.mxu1 %v9995_v4  ;;  %7057 = vmatprep.subr.bf16.mxu0 %v10000_v19  ;;  %v10045_v4 = vld [vmem:[#allocation4 + $0x7ac] ss:$16 sps:$4 sm:$0xff]   ;;  %v10040_v8 = vld [vmem:[#allocation4 + $0x5a8] ss:$16 sps:$4 sm:$0xff]  }
 0x28b   :  { %7098 = vmatprep.subr.bf16.mxu1 %v10003_v47  ;;  %v10043_v9 = vld [vmem:[#allocation4 + $0x7a8] ss:$16 sps:$4 sm:$0xff]   ;;  %v10048_v41 = vld [vmem:[#allocation4 + $0x58c] ss:$16 sps:$4 sm:$0xff]  }
 0x28c   :  { %v10051_v14 = vld [vmem:[#allocation4 + $0x78c] ss:$16 sps:$4 sm:$0xff]   ;;  %v10046_v19 = vld [vmem:[#allocation4 + $0x588] ss:$16 sps:$4 sm:$0xff]  }
 0x28d   :  { %7058 = vmatpush1.bf16.msra.mxu0 %v9998_v55  ;;  %v10049_v47 = vld [vmem:[#allocation4 + $0x788] ss:$16 sps:$4 sm:$0xff]   ;;  %v10054_v55 = vld [vmem:[#allocation4 + $0x56c] ss:$16 sps:$4 sm:$0xff]  }
 0x28e   :  { %7099 = vmatpush1.bf16.msra.mxu1 %v10001_v22  ;;  %7059 = vmatprep.subr.bf16.mxu0 %v10006_v37  ;;  %v10057_v22 = vld [vmem:[#allocation4 + $0x76c] ss:$16 sps:$4 sm:$0xff]   ;;  %v10052_v37 = vld [vmem:[#allocation4 + $0x568] ss:$16 sps:$4 sm:$0xff]  }
 0x28f   :  { %7100 = vmatprep.subr.bf16.mxu1 %v10009_v40  ;;  %v10055_v40 = vld [vmem:[#allocation4 + $0x768] ss:$16 sps:$4 sm:$0xff]  }
 0x291   :  { %7060 = vmatpush1.bf16.msra.mxu0 %v10004_v23  ;;  %v10060_v23 = vld [vmem:[#allocation4 + $0x54c] ss:$16 sps:$4 sm:$0xff]  }
 0x292   :  { %7101 = vmatpush1.bf16.msra.mxu1 %v10007_v24  ;;  %7061 = vmatprep.subr.bf16.mxu0 %v10012_v27  ;;  %v10063_v24 = vld [vmem:[#allocation4 + $0x74c] ss:$16 sps:$4 sm:$0xff]   ;;  %v10058_v27 = vld [vmem:[#allocation4 + $0x548] ss:$16 sps:$4 sm:$0xff]  }
 0x293   :  { %7102 = vmatprep.subr.bf16.mxu1 %v10015_v30  ;;  %v10061_v30 = vld [vmem:[#allocation4 + $0x748] ss:$16 sps:$4 sm:$0xff]  }
 0x295   :  { %7062 = vmatpush1.bf16.msra.mxu0 %v10010_v33  ;;  %v10066_v33 = vld [vmem:[#allocation4 + $0x52c] ss:$16 sps:$4 sm:$0xff]  }
 0x296   :  { %7103 = vmatpush1.bf16.msra.mxu1 %v10013_v34  ;;  %7063 = vmatprep.subr.bf16.mxu0 %v10018_v35  ;;  %v10069_v34 = vld [vmem:[#allocation4 + $0x72c] ss:$16 sps:$4 sm:$0xff]   ;;  %v10064_v35 = vld [vmem:[#allocation4 + $0x528] ss:$16 sps:$4 sm:$0xff]  }
 0x297   :  { %7104 = vmatprep.subr.bf16.mxu1 %v10021_v45  ;;  %v10067_v45 = vld [vmem:[#allocation4 + $0x728] ss:$16 sps:$4 sm:$0xff]  }
 0x299   :  { %7064 = vmatpush1.bf16.msra.mxu0 %v10016_v38  ;;  %v10072_v38 = vld [vmem:[#allocation4 + $0x50c] ss:$16 sps:$4 sm:$0xff]  }
 0x29a   :  { %7105 = vmatpush1.bf16.msra.mxu1 %v10019_v46  ;;  %7065 = vmatprep.subr.bf16.mxu0 %v10024_v28  ;;  %v10075_v46 = vld [vmem:[#allocation4 + $0x70c] ss:$16 sps:$4 sm:$0xff]   ;;  %v10070_v28 = vld [vmem:[#allocation4 + $0x508] ss:$16 sps:$4 sm:$0xff]  }
 0x29b   :  { %7106 = vmatprep.subr.bf16.mxu1 %v10027_v62  ;;  %v10073_v62 = vld [vmem:[#allocation4 + $0x708] ss:$16 sps:$4 sm:$0xff]  }
 0x29d   :  { %7066 = vmatpush1.bf16.msra.mxu0 %v10022_v56  ;;  %v10078_v56 = vld [vmem:[#allocation4 + $0x8ec] ss:$16 sps:$4 sm:$0xff]  }
 0x29e   :  { %7107 = vmatpush1.bf16.msra.mxu1 %v10025_v36  ;;  %7067 = vmatprep.subr.bf16.mxu0 %v10030_v58  ;;  %v10081_v36 = vld [vmem:[#allocation4 + $0xaec] ss:$16 sps:$4 sm:$0xff]   ;;  %v10076_v58 = vld [vmem:[#allocation4 + $0x8e8] ss:$16 sps:$4 sm:$0xff]  }
 0x29f   :  { %7108 = vmatprep.subr.bf16.mxu1 %v10033_v59  ;;  %v10079_v59 = vld [vmem:[#allocation4 + $0xae8] ss:$16 sps:$4 sm:$0xff]  }
 0x2a1   :  { %7068 = vmatpush2.bf16.msra.mxu0 %v10028_v11  ;;  %v10084_v11 = vld [vmem:[#allocation4 + $0x8cc] ss:$16 sps:$4 sm:$0xff]  }
 0x2a2   :  { %7109 = vmatpush2.bf16.msra.mxu1 %v10031_v60  ;;  %7069 = vmatprep.subr.bf16.mxu0 %v10036_v49  ;;  %v10087_v60 = vld [vmem:[#allocation4 + $0xacc] ss:$16 sps:$4 sm:$0xff]  }
 0x2a3   :  { %7110 = vmatprep.subr.bf16.mxu1 %v10039_v52 }
 0x2a5   :  { %7070 = vmatpush2.bf16.msra.mxu0 %v10034_v61 }
 0x2a6   :  { %7111 = vmatpush2.bf16.msra.mxu1 %v10037_v0  ;;  %7071 = vmatprep.subr.bf16.mxu0 %v10042_v3  ;;  %v10082_v0 = vld [vmem:[#allocation4 + $0x8c8] ss:$16 sps:$4 sm:$0xff]  }
 0x2a7   :  { %7112 = vmatprep.subr.bf16.mxu1 %v10045_v4  ;;  %v10085_v3 = vld [vmem:[#allocation4 + $0xac8] ss:$16 sps:$4 sm:$0xff]  }
 0x2a9   :  { %7072 = vmatpush2.bf16.msra.mxu0 %v10040_v8 }
 0x2aa   :  { %7113 = vmatpush2.bf16.msra.mxu1 %v10043_v9  ;;  %7073 = vmatprep.subr.bf16.mxu0 %v10048_v41  ;;  %v10090_v9 = vld [vmem:[#allocation4 + $0x8ac] ss:$16 sps:$4 sm:$0xff]  }
 0x2ab   :  { %7114 = vmatprep.subr.bf16.mxu1 %v10051_v14  ;;  %v10093_v41 = vld [vmem:[#allocation4 + $0xaac] ss:$16 sps:$4 sm:$0xff]  }
 0x2ad   :  { %7074 = vmatpush2.bf16.msra.mxu0 %v10046_v19 }
 0x2ae   :  { %7115 = vmatpush2.bf16.msra.mxu1 %v10049_v47  ;;  %7075 = vmatprep.subr.bf16.mxu0 %v10054_v55  ;;  %v10088_v47 = vld [vmem:[#allocation4 + $0x8a8] ss:$16 sps:$4 sm:$0xff]  }
 0x2af   :  { %7116 = vmatprep.subr.bf16.mxu1 %v10057_v22  ;;  %v10091_v55 = vld [vmem:[#allocation4 + $0xaa8] ss:$16 sps:$4 sm:$0xff]  }
 0x2b1   :  { %7076 = vmatpush2.bf16.msra.mxu0 %v10052_v37 }
 0x2b2   :  { %7117 = vmatpush2.bf16.msra.mxu1 %v10055_v40  ;;  %7077 = vmatprep.subr.bf16.mxu0 %v10060_v23  ;;  %v10096_v40 = vld [vmem:[#allocation4 + $0x88c] ss:$16 sps:$4 sm:$0xff]  }
 0x2b3   :  { %7118 = vmatprep.subr.bf16.mxu1 %v10063_v24  ;;  %v10099_v23 = vld [vmem:[#allocation4 + $0xa8c] ss:$16 sps:$4 sm:$0xff]  }
 0x2b4   :  { %v10105_v24 = vld [vmem:[#allocation4 + $0xa6c] ss:$16 sps:$4 sm:$0xff]  }
 0x2b5   :  { %7078 = vmatpush2.bf16.msra.mxu0 %v10058_v27  ;;  %v10100_v27 = vld [vmem:[#allocation4 + $0x868] ss:$16 sps:$4 sm:$0xff]  }
 0x2b6   :  { %7119 = vmatpush2.bf16.msra.mxu1 %v10061_v30  ;;  %7079 = vmatprep.subr.bf16.mxu0 %v10066_v33  ;;  %v10103_v30 = vld [vmem:[#allocation4 + $0xa68] ss:$16 sps:$4 sm:$0xff]   ;;  %v10108_v33 = vld [vmem:[#allocation4 + $0x84c] ss:$16 sps:$4 sm:$0xff]  }
 0x2b7   :  { %7120 = vmatprep.subr.bf16.mxu1 %v10069_v34  ;;  %v10111_v34 = vld [vmem:[#allocation4 + $0xa4c] ss:$16 sps:$4 sm:$0xff]  }
 0x2b9   :  { %7080 = vmatpush2.bf16.msra.mxu0 %v10064_v35  ;;  %v10106_v35 = vld [vmem:[#allocation4 + $0x848] ss:$16 sps:$4 sm:$0xff]  }
 0x2ba   :  { %7121 = vmatpush2.bf16.msra.mxu1 %v10067_v45  ;;  %7081 = vmatprep.subr.bf16.mxu0 %v10072_v38  ;;  %v10109_v45 = vld [vmem:[#allocation4 + $0xa48] ss:$16 sps:$4 sm:$0xff]   ;;  %v10114_v38 = vld [vmem:[#allocation4 + $0x82c] ss:$16 sps:$4 sm:$0xff]  }
 0x2bb   :  { %7122 = vmatprep.subr.bf16.mxu1 %v10075_v46  ;;  %v10117_v46 = vld [vmem:[#allocation4 + $0xa2c] ss:$16 sps:$4 sm:$0xff]  }
 0x2bd   :  { %7082 = vmatpush2.bf16.msra.mxu0 %v10070_v28  ;;  %v10112_v28 = vld [vmem:[#allocation4 + $0x828] ss:$16 sps:$4 sm:$0xff]  }
 0x2be   :  { %7123 = vmatpush2.bf16.msra.mxu1 %v10073_v62  ;;  %7133 = vmatprep.subr.bf16.mxu0 %v10078_v56  ;;  %v10115_v62 = vld [vmem:[#allocation4 + $0xa28] ss:$16 sps:$4 sm:$0xff]   ;;  %v10120_v56 = vld [vmem:[#allocation4 + $0x80c] ss:$16 sps:$4 sm:$0xff]  }
 0x2bf   :  { %7174 = vmatprep.subr.bf16.mxu1 %v10081_v36  ;;  %v10123_v36 = vld [vmem:[#allocation4 + $0xa0c] ss:$16 sps:$4 sm:$0xff]  }
 0x2c0   :  { %v6839_v49 = vpop.f32.mrf.mxu0  ;;  %7084 = vmatmul.mubr.bf16.vlgmr.msra.gmra.mxu0 %v10870_v20 }
 0x2c1   :  { %v6880_v52 = vpop.f32.mrf.mxu1  ;;  %7125 = vmatmul.mubr.bf16.vlgmr.msra.gmra.mxu1 %v10872_v21  ;;  %v6840_v61 = vadd.f32 %v6839_v49, %v10986_v63  ;;  %7134 = vmatpush1.bf16.msra.mxu0 %v10076_v58  ;;  %v10118_v58 = vld [vmem:[#allocation4 + $0x808] ss:$16 sps:$4 sm:$0xff]  }
 0x2c2   :  { %7175 = vmatpush1.bf16.msra.mxu1 %v10079_v59  ;;  %v6841_v4 = vpop.f32.mrf.mxu0  ;;  %7135 = vmatprep.subr.bf16.mxu0 %v10084_v11  ;;  %v10121_v59 = vld [vmem:[#allocation4 + $0xa08] ss:$16 sps:$4 sm:$0xff]   ;;  %v10126_v11 = vld [vmem:[#allocation4 + $0x9ec] ss:$16 sps:$4 sm:$0xff]  }
 0x2c3   :  { %v6882_v8 = vpop.f32.mrf.mxu1  ;;  %7176 = vmatprep.subr.bf16.mxu1 %v10087_v60  ;;  %v10996_v14 = vadd.f32 %v6880_v52, %v6840_v61  ;;  %v6842_v19 = vadd.f32 %v6841_v4, %v10991_v31  ;;  %7165 = vmatprep.mubr.bf16.mxu0 %v10876_v29  ;;  %v10094_v31 = vld [vmem:[#allocation4 + $0x888] ss:$16 sps:$4 sm:$0xff]   ;;  %v10129_v60 = vld [vmem:[#allocation4 + $0xbec] ss:$16 sps:$4 sm:$0xff]  }
 0x2c4   :  { %7206 = vmatprep.mubr.bf16.mxu1 %v10878_v32  ;;  %v6843_v20 = vpop.f32.mrf.mxu0  ;;  %v10097_v29 = vld [vmem:[#allocation4 + $0xa88] ss:$16 sps:$4 sm:$0xff]   ;;  %v10102_v32 = vld [vmem:[#allocation4 + $0x86c] ss:$16 sps:$4 sm:$0xff]  }
 0x2c5   :  { %v6884_v21 = vpop.f32.mrf.mxu1  ;;  %v11001_v63 = vadd.f32 %v6882_v8, %v6842_v19  ;;  %7136 = vmatpush1.bf16.msra.mxu0 %v10082_v0  ;;  %v10124_v49 = vld [vmem:[#allocation4 + $0x9e8] ss:$16 sps:$4 sm:$0xff]   ;;  %v10132_v61 = vld [vmem:[#allocation4 + $0x9cc] ss:$16 sps:$4 sm:$0xff]  }
 0x2c6   :  { %7177 = vmatpush1.bf16.msra.mxu1 %v10085_v3  ;;  %v6844_v22 = vpop.f32.mrf.mxu0  ;;  %7137 = vmatprep.subr.bf16.mxu0 %v10090_v9  ;;  %v10127_v52 = vld [vmem:[#allocation4 + $0xbe8] ss:$16 sps:$4 sm:$0xff]   ;;  %v10135_v0 = vld [vmem:[#allocation4 + $0xbcc] ss:$16 sps:$4 sm:$0xff]  }
 0x2c7   :  { %v6885_v37 = vpop.f32.mrf.mxu1  ;;  %7178 = vmatprep.subr.bf16.mxu1 %v10093_v41  ;;  %v10130_v3 = vld [vmem:[#allocation4 + $0x9c8] ss:$16 sps:$4 sm:$0xff]   ;;  %v10138_v8 = vld [vmem:[#allocation4 + $0x9ac] ss:$16 sps:$4 sm:$0xff]  }
 0x2c8   :  { %v10133_v4 = vld [vmem:[#allocation4 + $0xbc8] ss:$16 sps:$4 sm:$0xff]   ;;  %v10141_v9 = vld [vmem:[#allocation4 + $0xbac] ss:$16 sps:$4 sm:$0xff]  }
 0x2c9   :  { %7138 = vmatpush1.bf16.msra.mxu0 %v10088_v47  ;;  %v10136_v41 = vld [vmem:[#allocation4 + $0x9a8] ss:$16 sps:$4 sm:$0xff]   ;;  %v10144_v20 = vld [vmem:[#allocation4 + $0x98c] ss:$16 sps:$4 sm:$0xff]  }
 0x2ca   :  { %7179 = vmatpush1.bf16.msra.mxu1 %v10091_v55  ;;  %7139 = vmatprep.subr.bf16.mxu0 %v10096_v40  ;;  %v10139_v19 = vld [vmem:[#allocation4 + $0xba8] ss:$16 sps:$4 sm:$0xff]   ;;  %v10147_v21 = vld [vmem:[#allocation4 + $0xb8c] ss:$16 sps:$4 sm:$0xff]  }
 0x2cb   :  { %7180 = vmatprep.subr.bf16.mxu1 %v10099_v23  ;;  %v10142_v47 = vld [vmem:[#allocation4 + $0x988] ss:$16 sps:$4 sm:$0xff]   ;;  %v10150_v22 = vld [vmem:[#allocation4 + $0x96c] ss:$16 sps:$4 sm:$0xff]  }
 0x2cc   :  { %v10145_v55 = vld [vmem:[#allocation4 + $0xb88] ss:$16 sps:$4 sm:$0xff]   ;;  %v10153_v37 = vld [vmem:[#allocation4 + $0xb6c] ss:$16 sps:$4 sm:$0xff]  }
 0x2cd   :  { %7140 = vmatpush1.bf16.msra.mxu0 %v10094_v31  ;;  %v10148_v40 = vld [vmem:[#allocation4 + $0x968] ss:$16 sps:$4 sm:$0xff]   ;;  %v10156_v31 = vld [vmem:[#allocation4 + $0x94c] ss:$16 sps:$4 sm:$0xff]  }
 0x2ce   :  { %7181 = vmatpush1.bf16.msra.mxu1 %v10097_v29  ;;  %7141 = vmatprep.subr.bf16.mxu0 %v10102_v32  ;;  %v10151_v23 = vld [vmem:[#allocation4 + $0xb68] ss:$16 sps:$4 sm:$0xff]   ;;  %v10159_v29 = vld [vmem:[#allocation4 + $0xb4c] ss:$16 sps:$4 sm:$0xff]  }
 0x2cf   :  { %7182 = vmatprep.subr.bf16.mxu1 %v10105_v24  ;;  %v10154_v32 = vld [vmem:[#allocation4 + $0x948] ss:$16 sps:$4 sm:$0xff]  }
 0x2d0   :  { %v10157_v24 = vld [vmem:[#allocation4 + $0xb48] ss:$16 sps:$4 sm:$0xff]  }
 0x2d1   :  { %7142 = vmatpush1.bf16.msra.mxu0 %v10100_v27  ;;  %v10162_v27 = vld [vmem:[#allocation4 + $0x92c] ss:$16 sps:$4 sm:$0xff]  }
 0x2d2   :  { %7183 = vmatpush1.bf16.msra.mxu1 %v10103_v30  ;;  %7143 = vmatprep.subr.bf16.mxu0 %v10108_v33  ;;  %v10165_v30 = vld [vmem:[#allocation4 + $0xb2c] ss:$16 sps:$4 sm:$0xff]   ;;  %v10160_v33 = vld [vmem:[#allocation4 + $0x928] ss:$16 sps:$4 sm:$0xff]  }
 0x2d3   :  { %7184 = vmatprep.subr.bf16.mxu1 %v10111_v34  ;;  %v10163_v34 = vld [vmem:[#allocation4 + $0xb28] ss:$16 sps:$4 sm:$0xff]  }
 0x2d5   :  { %7144 = vmatpush1.bf16.msra.mxu0 %v10106_v35  ;;  %v10168_v35 = vld [vmem:[#allocation4 + $0x90c] ss:$16 sps:$4 sm:$0xff]  }
 0x2d6   :  { %7185 = vmatpush1.bf16.msra.mxu1 %v10109_v45  ;;  %7145 = vmatprep.subr.bf16.mxu0 %v10114_v38  ;;  %v10171_v45 = vld [vmem:[#allocation4 + $0xb0c] ss:$16 sps:$4 sm:$0xff]   ;;  %v10166_v38 = vld [vmem:[#allocation4 + $0x908] ss:$16 sps:$4 sm:$0xff]  }
 0x2d7   :  { %7186 = vmatprep.subr.bf16.mxu1 %v10117_v46  ;;  %v10169_v46 = vld [vmem:[#allocation4 + $0xb08] ss:$16 sps:$4 sm:$0xff]  }
 0x2d9   :  { %7146 = vmatpush1.bf16.msra.mxu0 %v10112_v28  ;;  %v10174_v28 = vld [vmem:[#allocation4 + $0xcec] ss:$16 sps:$4 sm:$0xff]  }
 0x2da   :  { %7187 = vmatpush1.bf16.msra.mxu1 %v10115_v62  ;;  %7147 = vmatprep.subr.bf16.mxu0 %v10120_v56  ;;  %v10177_v62 = vld [vmem:[#allocation4 + $0xeec] ss:$16 sps:$4 sm:$0xff]   ;;  %v10172_v56 = vld [vmem:[#allocation4 + $0xce8] ss:$16 sps:$4 sm:$0xff]  }
 0x2db   :  { %7188 = vmatprep.subr.bf16.mxu1 %v10123_v36  ;;  %v10175_v36 = vld [vmem:[#allocation4 + $0xee8] ss:$16 sps:$4 sm:$0xff]  }
 0x2dd   :  { %7148 = vmatpush1.bf16.msra.mxu0 %v10118_v58  ;;  %v10180_v58 = vld [vmem:[#allocation4 + $0xccc] ss:$16 sps:$4 sm:$0xff]  }
 0x2de   :  { %7189 = vmatpush1.bf16.msra.mxu1 %v10121_v59  ;;  %7149 = vmatprep.subr.bf16.mxu0 %v10126_v11  ;;  %v10183_v59 = vld [vmem:[#allocation4 + $0xecc] ss:$16 sps:$4 sm:$0xff]  }
 0x2df   :  { %7190 = vmatprep.subr.bf16.mxu1 %v10129_v60 }
 0x2e1   :  { %7150 = vmatpush2.bf16.msra.mxu0 %v10124_v49 }
 0x2e2   :  { %7191 = vmatpush2.bf16.msra.mxu1 %v10127_v52  ;;  %7151 = vmatprep.subr.bf16.mxu0 %v10132_v61  ;;  %v10178_v52 = vld [vmem:[#allocation4 + $0xcc8] ss:$16 sps:$4 sm:$0xff]  }
 0x2e3   :  { %7192 = vmatprep.subr.bf16.mxu1 %v10135_v0  ;;  %v10181_v61 = vld [vmem:[#allocation4 + $0xec8] ss:$16 sps:$4 sm:$0xff]  }
 0x2e5   :  { %7152 = vmatpush2.bf16.msra.mxu0 %v10130_v3 }
 0x2e6   :  { %7193 = vmatpush2.bf16.msra.mxu1 %v10133_v4  ;;  %7153 = vmatprep.subr.bf16.mxu0 %v10138_v8  ;;  %v10186_v4 = vld [vmem:[#allocation4 + $0xcac] ss:$16 sps:$4 sm:$0xff]  }
 0x2e7   :  { %7194 = vmatprep.subr.bf16.mxu1 %v10141_v9  ;;  %v10189_v8 = vld [vmem:[#allocation4 + $0xeac] ss:$16 sps:$4 sm:$0xff]  }
 0x2e9   :  { %7154 = vmatpush2.bf16.msra.mxu0 %v10136_v41 }
 0x2ea   :  { %7195 = vmatpush2.bf16.msra.mxu1 %v10139_v19  ;;  %7155 = vmatprep.subr.bf16.mxu0 %v10144_v20  ;;  %v10184_v19 = vld [vmem:[#allocation4 + $0xca8] ss:$16 sps:$4 sm:$0xff]  }
 0x2eb   :  { %7196 = vmatprep.subr.bf16.mxu1 %v10147_v21  ;;  %v10187_v20 = vld [vmem:[#allocation4 + $0xea8] ss:$16 sps:$4 sm:$0xff]  }
 0x2ed   :  { %7156 = vmatpush2.bf16.msra.mxu0 %v10142_v47 }
 0x2ee   :  { %7197 = vmatpush2.bf16.msra.mxu1 %v10145_v55  ;;  %7157 = vmatprep.subr.bf16.mxu0 %v10150_v22  ;;  %v10192_v55 = vld [vmem:[#allocation4 + $0xc8c] ss:$16 sps:$4 sm:$0xff]  }
 0x2ef   :  { %7198 = vmatprep.subr.bf16.mxu1 %v10153_v37  ;;  %v10195_v22 = vld [vmem:[#allocation4 + $0xe8c] ss:$16 sps:$4 sm:$0xff]  }
 0x2f0   :  { %v10201_v37 = vld [vmem:[#allocation4 + $0xe6c] ss:$16 sps:$4 sm:$0xff]  }
 0x2f1   :  { %7158 = vmatpush2.bf16.msra.mxu0 %v10148_v40  ;;  %v10196_v40 = vld [vmem:[#allocation4 + $0xc68] ss:$16 sps:$4 sm:$0xff]  }
 0x2f2   :  { %7199 = vmatpush2.bf16.msra.mxu1 %v10151_v23  ;;  %7159 = vmatprep.subr.bf16.mxu0 %v10156_v31  ;;  %v10199_v23 = vld [vmem:[#allocation4 + $0xe68] ss:$16 sps:$4 sm:$0xff]   ;;  %v10204_v31 = vld [vmem:[#allocation4 + $0xc4c] ss:$16 sps:$4 sm:$0xff]  }
 0x2f3   :  { %7200 = vmatprep.subr.bf16.mxu1 %v10159_v29  ;;  %v10207_v29 = vld [vmem:[#allocation4 + $0xe4c] ss:$16 sps:$4 sm:$0xff]  }
 0x2f5   :  { %7160 = vmatpush2.bf16.msra.mxu0 %v10154_v32  ;;  %v10202_v32 = vld [vmem:[#allocation4 + $0xc48] ss:$16 sps:$4 sm:$0xff]  }
 0x2f6   :  { %7201 = vmatpush2.bf16.msra.mxu1 %v10157_v24  ;;  %7161 = vmatprep.subr.bf16.mxu0 %v10162_v27  ;;  %v10205_v24 = vld [vmem:[#allocation4 + $0xe48] ss:$16 sps:$4 sm:$0xff]   ;;  %v10210_v27 = vld [vmem:[#allocation4 + $0xc2c] ss:$16 sps:$4 sm:$0xff]  }
 0x2f7   :  { %7202 = vmatprep.subr.bf16.mxu1 %v10165_v30  ;;  %v10213_v30 = vld [vmem:[#allocation4 + $0xe2c] ss:$16 sps:$4 sm:$0xff]  }
 0x2f9   :  { %7162 = vmatpush2.bf16.msra.mxu0 %v10160_v33  ;;  %v10208_v33 = vld [vmem:[#allocation4 + $0xc28] ss:$16 sps:$4 sm:$0xff]  }
 0x2fa   :  { %7203 = vmatpush2.bf16.msra.mxu1 %v10163_v34  ;;  %7163 = vmatprep.subr.bf16.mxu0 %v10168_v35  ;;  %v10211_v34 = vld [vmem:[#allocation4 + $0xe28] ss:$16 sps:$4 sm:$0xff]   ;;  %v10216_v35 = vld [vmem:[#allocation4 + $0xc0c] ss:$16 sps:$4 sm:$0xff]  }
 0x2fb   :  { %7204 = vmatprep.subr.bf16.mxu1 %v10171_v45  ;;  %v10219_v45 = vld [vmem:[#allocation4 + $0xe0c] ss:$16 sps:$4 sm:$0xff]  }
 0x2fd   :  { %7164 = vmatpush2.bf16.msra.mxu0 %v10166_v38  ;;  %v10214_v38 = vld [vmem:[#allocation4 + $0xc08] ss:$16 sps:$4 sm:$0xff]  }
 0x2fe   :  { %7205 = vmatpush2.bf16.msra.mxu1 %v10169_v46  ;;  %7215 = vmatprep.subr.bf16.mxu0 %v10174_v28  ;;  %v10217_v46 = vld [vmem:[#allocation4 + $0xe08] ss:$16 sps:$4 sm:$0xff]   ;;  %v10222_v28 = vld [vmem:[#allocation4 + $0xdec] ss:$16 sps:$4 sm:$0xff]  }
 0x2ff   :  { %7256 = vmatprep.subr.bf16.mxu1 %v10177_v62  ;;  %v10225_v62 = vld [vmem:[#allocation4 + $0xfec] ss:$16 sps:$4 sm:$0xff]  }
 0x300   :  { %v6921_v11 = vpop.f32.mrf.mxu0  ;;  %7166 = vmatmul.mubr.bf16.vlgmr.msra.gmra.mxu0 %v10882_v42 }
 0x301   :  { %v6962_v60 = vpop.f32.mrf.mxu1  ;;  %7207 = vmatmul.mubr.bf16.vlgmr.msra.gmra.mxu1 %v10884_v43  ;;  %v6922_v49 = vadd.f32 %v6921_v11, %v10996_v14  ;;  %7216 = vmatpush1.bf16.msra.mxu0 %v10172_v56  ;;  %v10220_v56 = vld [vmem:[#allocation4 + $0xde8] ss:$16 sps:$4 sm:$0xff]  }
 0x302   :  { %7257 = vmatpush1.bf16.msra.mxu1 %v10175_v36  ;;  %v6923_v0 = vpop.f32.mrf.mxu0  ;;  %7217 = vmatprep.subr.bf16.mxu0 %v10180_v58  ;;  %v10223_v36 = vld [vmem:[#allocation4 + $0xfe8] ss:$16 sps:$4 sm:$0xff]   ;;  %v10228_v58 = vld [vmem:[#allocation4 + $0xdcc] ss:$16 sps:$4 sm:$0xff]  }
 0x303   :  { %v6964_v3 = vpop.f32.mrf.mxu1  ;;  %7258 = vmatprep.subr.bf16.mxu1 %v10183_v59  ;;  %v11006_v9 = vadd.f32 %v6962_v60, %v6922_v49  ;;  %v6924_v41 = vadd.f32 %v6923_v0, %v11001_v63  ;;  %7247 = vmatprep.mubr.bf16.mxu0 %v10886_v48  ;;  %v10190_v63 = vld [vmem:[#allocation4 + $0xc88] ss:$16 sps:$4 sm:$0xff]   ;;  %v10231_v59 = vld [vmem:[#allocation4 + $0xfcc] ss:$16 sps:$4 sm:$0xff]  }
 0x304   :  { %7288 = vmatprep.mubr.bf16.mxu1 %v10888_v50  ;;  %v6925_v42 = vpop.f32.mrf.mxu0  ;;  %v10193_v48 = vld [vmem:[#allocation4 + $0xe88] ss:$16 sps:$4 sm:$0xff]   ;;  %v10198_v50 = vld [vmem:[#allocation4 + $0xc6c] ss:$16 sps:$4 sm:$0xff]  }
 0x305   :  { %v6966_v43 = vpop.f32.mrf.mxu1  ;;  %v11011_v14 = vadd.f32 %v6964_v3, %v6924_v41  ;;  %7218 = vmatpush1.bf16.msra.mxu0 %v10178_v52  ;;  %v10226_v11 = vld [vmem:[#allocation4 + $0xdc8] ss:$16 sps:$4 sm:$0xff]   ;;  %v10234_v49 = vld [vmem:[#allocation4 + $0xdac] ss:$16 sps:$4 sm:$0xff]  }
 0x306   :  { %7259 = vmatpush1.bf16.msra.mxu1 %v10181_v61  ;;  %v6926_v21 = vpop.f32.mrf.mxu0  ;;  %7219 = vmatprep.subr.bf16.mxu0 %v10186_v4  ;;  %v10229_v60 = vld [vmem:[#allocation4 + $0xfc8] ss:$16 sps:$4 sm:$0xff]   ;;  %v10237_v52 = vld [vmem:[#allocation4 + $0xfac] ss:$16 sps:$4 sm:$0xff]  }
 0x307   :  { %v6967_v47 = vpop.f32.mrf.mxu1  ;;  %7260 = vmatprep.subr.bf16.mxu1 %v10189_v8  ;;  %v10232_v61 = vld [vmem:[#allocation4 + $0xda8] ss:$16 sps:$4 sm:$0xff]   ;;  %v10240_v3 = vld [vmem:[#allocation4 + $0xd8c] ss:$16 sps:$4 sm:$0xff]  }
 0x308   :  { %v10235_v0 = vld [vmem:[#allocation4 + $0xfa8] ss:$16 sps:$4 sm:$0xff]   ;;  %v10243_v4 = vld [vmem:[#allocation4 + $0xf8c] ss:$16 sps:$4 sm:$0xff]  }
 0x309   :  { %7220 = vmatpush1.bf16.msra.mxu0 %v10184_v19  ;;  %v10238_v8 = vld [vmem:[#allocation4 + $0xd88] ss:$16 sps:$4 sm:$0xff]   ;;  %v10246_v42 = vld [vmem:[#allocation4 + $0xd6c] ss:$16 sps:$4 sm:$0xff]  }
 0x30a   :  { %7261 = vmatpush1.bf16.msra.mxu1 %v10187_v20  ;;  %7221 = vmatprep.subr.bf16.mxu0 %v10192_v55  ;;  %v10241_v41 = vld [vmem:[#allocation4 + $0xf88] ss:$16 sps:$4 sm:$0xff]   ;;  %v10249_v43 = vld [vmem:[#allocation4 + $0xf6c] ss:$16 sps:$4 sm:$0xff]  }
 0x30b   :  { %7262 = vmatprep.subr.bf16.mxu1 %v10195_v22  ;;  %v10244_v19 = vld [vmem:[#allocation4 + $0xd68] ss:$16 sps:$4 sm:$0xff]   ;;  %v10252_v21 = vld [vmem:[#allocation4 + $0xd4c] ss:$16 sps:$4 sm:$0xff]  }
 0x30c   :  { %v10247_v20 = vld [vmem:[#allocation4 + $0xf68] ss:$16 sps:$4 sm:$0xff]   ;;  %v10255_v47 = vld [vmem:[#allocation4 + $0xf4c] ss:$16 sps:$4 sm:$0xff]  }
 0x30d   :  { %7222 = vmatpush1.bf16.msra.mxu0 %v10190_v63  ;;  %v10250_v55 = vld [vmem:[#allocation4 + $0xd48] ss:$16 sps:$4 sm:$0xff]   ;;  %v10258_v63 = vld [vmem:[#allocation4 + $0xd2c] ss:$16 sps:$4 sm:$0xff]  }
 0x30e   :  { %7263 = vmatpush1.bf16.msra.mxu1 %v10193_v48  ;;  %7223 = vmatprep.subr.bf16.mxu0 %v10198_v50  ;;  %v10253_v22 = vld [vmem:[#allocation4 + $0xf48] ss:$16 sps:$4 sm:$0xff]   ;;  %v10261_v48 = vld [vmem:[#allocation4 + $0xf2c] ss:$16 sps:$4 sm:$0xff]  }
 0x30f   :  { %7264 = vmatprep.subr.bf16.mxu1 %v10201_v37  ;;  %v10256_v50 = vld [vmem:[#allocation4 + $0xd28] ss:$16 sps:$4 sm:$0xff]  }
 0x310   :  { %v10259_v37 = vld [vmem:[#allocation4 + $0xf28] ss:$16 sps:$4 sm:$0xff]  }
 0x311   :  { %7224 = vmatpush1.bf16.msra.mxu0 %v10196_v40  ;;  %v10264_v40 = vld [vmem:[#allocation4 + $0xd0c] ss:$16 sps:$4 sm:$0xff]  }
 0x312   :  { %7265 = vmatpush1.bf16.msra.mxu1 %v10199_v23  ;;  %7225 = vmatprep.subr.bf16.mxu0 %v10204_v31  ;;  %v10267_v23 = vld [vmem:[#allocation4 + $0xf0c] ss:$16 sps:$4 sm:$0xff]   ;;  %v10262_v31 = vld [vmem:[#allocation4 + $0xd08] ss:$16 sps:$4 sm:$0xff]  }
 0x313   :  { %7266 = vmatprep.subr.bf16.mxu1 %v10207_v29  ;;  %v10265_v29 = vld [vmem:[#allocation4 + $0xf08] ss:$16 sps:$4 sm:$0xff]  }
 0x315   :  { %7226 = vmatpush1.bf16.msra.mxu0 %v10202_v32  ;;  %v1183_v32 = vsub.s32 2, %v10895_v57 }
 0x316   :  { %7267 = vmatpush1.bf16.msra.mxu1 %v10205_v24  ;;  %7227 = vmatprep.subr.bf16.mxu0 %v10210_v27  ;;  %v10270_v24 = vld [vmem:[#allocation4 + $0x10ec] ss:$16 sps:$4 sm:$0xff]  }
 0x317   :  { %7268 = vmatprep.subr.bf16.mxu1 %v10213_v30  ;;  %v10273_v27 = vld [vmem:[#allocation4 + $0x12ec] ss:$16 sps:$4 sm:$0xff]   ;;  %v1187_v30 = vsub.s32 3, %v10895_v57  ;;  %v10274_v57 = vld [vmem:[#allocation4 + $0x10c8] ss:$16 sps:$4 sm:$0xff]  }
 0x319   :  { %7228 = vmatpush1.bf16.msra.mxu0 %v10208_v33  ;;  %v10690_v33 = vld [vmem:[#allocation6] sm:$0xf] }
 0x31a   :  { %7269 = vmatpush1.bf16.msra.mxu1 %v10211_v34  ;;  %7229 = vmatprep.subr.bf16.mxu0 %v10216_v35  ;;  %v1184_v34 = vrot.slane %v10690_v33, %v1183_v32  ;;  %v10268_v35 = vld [vmem:[#allocation4 + $0x10e8] ss:$16 sps:$4 sm:$0xff]  }
 0x31b   :  { %7270 = vmatprep.subr.bf16.mxu1 %v10219_v45  ;;  %v10271_v45 = vld [vmem:[#allocation4 + $0x12e8] ss:$16 sps:$4 sm:$0xff]  }
 0x31c   :  { %v10310_v32 = vld [vmem:[#allocation4 + $0x1008] ss:$16 sps:$4 sm:$0xff]  }
 0x31d   :  { %7230 = vmatpush1.bf16.msra.mxu0 %v10214_v38  ;;  %v10276_v38 = vld [vmem:[#allocation4 + $0x10cc] ss:$16 sps:$4 sm:$0xff]  }
 0x31e   :  { %7271 = vmatpush1.bf16.msra.mxu1 %v10217_v46  ;;  %7231 = vmatprep.subr.bf16.mxu0 %v10222_v28  ;;  %v10279_v46 = vld [vmem:[#allocation4 + $0x12cc] ss:$16 sps:$4 sm:$0xff]   ;;  %v1188_v28 = vrot.slane %v10690_v33, %v1187_v30  ;;  %v10316_v33 = vld [vmem:[#allocation4 + $0x11e8] ss:$16 sps:$4 sm:$0xff]  }
 0x31f   :  { %7272 = vmatprep.subr.bf16.mxu1 %v10225_v62  ;;  %v10321_v30 = vld [vmem:[#allocation4 + $0x13ec] ss:$16 sps:$4 sm:$0xff]  }
 0x321   :  { %7232 = vmatpush2.bf16.msra.mxu0 %v10220_v56 }
 0x322   :  { %7273 = vmatpush2.bf16.msra.mxu1 %v10223_v36  ;;  %7233 = vmatprep.subr.bf16.mxu0 %v10228_v58  ;;  %v10277_v58 = vld [vmem:[#allocation4 + $0x12c8] ss:$16 sps:$4 sm:$0xff]  }
 0x323   :  { %7274 = vmatprep.subr.bf16.mxu1 %v10231_v59 }
 0x325   :  { %7234 = vmatpush2.bf16.msra.mxu0 %v10226_v11 }
 0x326   :  { %7275 = vmatpush2.bf16.msra.mxu1 %v10229_v60  ;;  %7235 = vmatprep.subr.bf16.mxu0 %v10234_v49  ;;  %v10282_v60 = vld [vmem:[#allocation4 + $0x10ac] ss:$16 sps:$4 sm:$0xff]  }
 0x327   :  { %7276 = vmatprep.subr.bf16.mxu1 %v10237_v52  ;;  %v10285_v49 = vld [vmem:[#allocation4 + $0x12ac] ss:$16 sps:$4 sm:$0xff]  }
 0x329   :  { %7236 = vmatpush2.bf16.msra.mxu0 %v10232_v61 }
 0x32a   :  { %7277 = vmatpush2.bf16.msra.mxu1 %v10235_v0  ;;  %7237 = vmatprep.subr.bf16.mxu0 %v10240_v3  ;;  %v10280_v3 = vld [vmem:[#allocation4 + $0x10a8] ss:$16 sps:$4 sm:$0xff]  }
 0x32b   :  { %7278 = vmatprep.subr.bf16.mxu1 %v10243_v4  ;;  %v10283_v4 = vld [vmem:[#allocation4 + $0x12a8] ss:$16 sps:$4 sm:$0xff]  }
 0x32d   :  { %7238 = vmatpush2.bf16.msra.mxu0 %v10238_v8 }
 0x32e   :  { %7279 = vmatpush2.bf16.msra.mxu1 %v10241_v41  ;;  %7239 = vmatprep.subr.bf16.mxu0 %v10246_v42  ;;  %v10288_v42 = vld [vmem:[#allocation4 + $0x108c] ss:$16 sps:$4 sm:$0xff]  }
 0x32f   :  { %7280 = vmatprep.subr.bf16.mxu1 %v10249_v43  ;;  %v10291_v43 = vld [vmem:[#allocation4 + $0x128c] ss:$16 sps:$4 sm:$0xff]  }
 0x331   :  { %7240 = vmatpush2.bf16.msra.mxu0 %v10244_v19  ;;  %v10286_v19 = vld [vmem:[#allocation4 + $0x1088] ss:$16 sps:$4 sm:$0xff]  }
 0x332   :  { %7281 = vmatpush2.bf16.msra.mxu1 %v10247_v20  ;;  %7241 = vmatprep.subr.bf16.mxu0 %v10252_v21  ;;  %v10297_v20 = vld [vmem:[#allocation4 + $0x126c] ss:$16 sps:$4 sm:$0xff]   ;;  %v10292_v21 = vld [vmem:[#allocation4 + $0x1068] ss:$16 sps:$4 sm:$0xff]  }
 0x333   :  { %7282 = vmatprep.subr.bf16.mxu1 %v10255_v47  ;;  %v10295_v47 = vld [vmem:[#allocation4 + $0x1268] ss:$16 sps:$4 sm:$0xff]  }
 0x335   :  { %7242 = vmatpush2.bf16.msra.mxu0 %v10250_v55  ;;  %v10300_v55 = vld [vmem:[#allocation4 + $0x104c] ss:$16 sps:$4 sm:$0xff]  }
 0x336   :  { %7283 = vmatpush2.bf16.msra.mxu1 %v10253_v22  ;;  %7243 = vmatprep.subr.bf16.mxu0 %v10258_v63  ;;  %v10303_v22 = vld [vmem:[#allocation4 + $0x124c] ss:$16 sps:$4 sm:$0xff]   ;;  %v10298_v63 = vld [vmem:[#allocation4 + $0x1048] ss:$16 sps:$4 sm:$0xff]  }
 0x337   :  { %7284 = vmatprep.subr.bf16.mxu1 %v10261_v48  ;;  %v10301_v48 = vld [vmem:[#allocation4 + $0x1248] ss:$16 sps:$4 sm:$0xff]  }
 0x339   :  { %7244 = vmatpush2.bf16.msra.mxu0 %v10256_v50  ;;  %v10306_v50 = vld [vmem:[#allocation4 + $0x102c] ss:$16 sps:$4 sm:$0xff]  }
 0x33a   :  { %7285 = vmatpush2.bf16.msra.mxu1 %v10259_v37  ;;  %7245 = vmatprep.subr.bf16.mxu0 %v10264_v40  ;;  %v10309_v37 = vld [vmem:[#allocation4 + $0x122c] ss:$16 sps:$4 sm:$0xff]   ;;  %v10304_v40 = vld [vmem:[#allocation4 + $0x1028] ss:$16 sps:$4 sm:$0xff]  }
 0x33b   :  { %7286 = vmatprep.subr.bf16.mxu1 %v10267_v23  ;;  %v10307_v23 = vld [vmem:[#allocation4 + $0x1228] ss:$16 sps:$4 sm:$0xff]  }
 0x33d   :  { %7246 = vmatpush2.bf16.msra.mxu0 %v10262_v31  ;;  %v10312_v31 = vld [vmem:[#allocation4 + $0x100c] ss:$16 sps:$4 sm:$0xff]  }
 0x33e   :  { %7287 = vmatpush2.bf16.msra.mxu1 %v10265_v29  ;;  %7297 = vmatprep.subr.bf16.mxu0 %v10270_v24  ;;  %v10315_v29 = vld [vmem:[#allocation4 + $0x120c] ss:$16 sps:$4 sm:$0xff]   ;;  %v10313_v24 = vld [vmem:[#allocation4 + $0x1208] ss:$16 sps:$4 sm:$0xff]  }
 0x33f   :  { %7338 = vmatprep.subr.bf16.mxu1 %v10273_v27  ;;  %v10318_v27 = vld [vmem:[#allocation4 + $0x11ec] ss:$16 sps:$4 sm:$0xff]  }
 0x340   :  { %v7003_v62 = vpop.f32.mrf.mxu0  ;;  %7248 = vmatmul.mubr.bf16.vlgmr.msra.gmra.mxu0 %v10899_v7 }
 0x341   :  { %v7044_v56 = vpop.f32.mrf.mxu1  ;;  %7289 = vmatmul.mubr.bf16.vlgmr.msra.gmra.mxu1 %v10901_v10  ;;  %v7004_v36 = vadd.f32 %v7003_v62, %v1184_v34  ;;  %7298 = vmatpush1.bf16.msra.mxu0 %v10268_v35  ;;  %v10319_v34 = vld [vmem:[#allocation4 + $0x13e8] ss:$16 sps:$4 sm:$0xff]   ;;  %v10324_v35 = vld [vmem:[#allocation4 + $0x11cc] ss:$16 sps:$4 sm:$0xff]  }
 0x342   :  { %7339 = vmatpush1.bf16.msra.mxu1 %v10271_v45  ;;  %v7005_v59 = vpop.f32.mrf.mxu0  ;;  %7299 = vmatprep.subr.bf16.mxu0 %v10276_v38  ;;  %v10327_v45 = vld [vmem:[#allocation4 + $0x13cc] ss:$16 sps:$4 sm:$0xff]   ;;  %v10322_v38 = vld [vmem:[#allocation4 + $0x11c8] ss:$16 sps:$4 sm:$0xff]  }
 0x343   :  { %v7046_v11 = vpop.f32.mrf.mxu1  ;;  %7340 = vmatprep.subr.bf16.mxu1 %v10279_v46  ;;  %v11017_v52 = vadd.f32 %v7044_v56, %v7004_v36  ;;  %v7006_v61 = vadd.f32 %v7005_v59, %v1188_v28  ;;  %7329 = vmatprep.mubr.bf16.mxu0 %v10903_v17  ;;  %v10289_v17 = vld [vmem:[#allocation4 + $0x1288] ss:$16 sps:$4 sm:$0xff]   ;;  %v10330_v28 = vld [vmem:[#allocation4 + $0x11ac] ss:$16 sps:$4 sm:$0xff]  }
 0x344   :  { %7370 = vmatprep.mubr.bf16.mxu1 %v10905_v18  ;;  %v7007_v7 = vpop.f32.mrf.mxu0  ;;  %v10294_v18 = vld [vmem:[#allocation4 + $0x106c] ss:$16 sps:$4 sm:$0xff]   ;;  %v10325_v46 = vld [vmem:[#allocation4 + $0x13c8] ss:$16 sps:$4 sm:$0xff]  }
 0x345   :  { %v7048_v10 = vpop.f32.mrf.mxu1  ;;  %v11021_v0 = vadd.f32 %v7046_v11, %v7006_v61  ;;  %7300 = vmatpush1.bf16.msra.mxu0 %v10274_v57  ;;  %v10333_v62 = vld [vmem:[#allocation4 + $0x13ac] ss:$16 sps:$4 sm:$0xff]   ;;  %v10328_v56 = vld [vmem:[#allocation4 + $0x11a8] ss:$16 sps:$4 sm:$0xff]  }
 0x346   :  { %7341 = vmatpush1.bf16.msra.mxu1 %v10277_v58  ;;  %v7008_v8 = vpop.f32.mrf.mxu0  ;;  %7301 = vmatprep.subr.bf16.mxu0 %v10282_v60  ;;  %v10331_v36 = vld [vmem:[#allocation4 + $0x13a8] ss:$16 sps:$4 sm:$0xff]   ;;  %v10336_v57 = vld [vmem:[#allocation4 + $0x118c] ss:$16 sps:$4 sm:$0xff]  }
 0x347   :  { %v7049_v41 = vpop.f32.mrf.mxu1  ;;  %7342 = vmatprep.subr.bf16.mxu1 %v10285_v49  ;;  %v10339_v58 = vld [vmem:[#allocation4 + $0x138c] ss:$16 sps:$4 sm:$0xff]   ;;  %v10334_v59 = vld [vmem:[#allocation4 + $0x1188] ss:$16 sps:$4 sm:$0xff]  }
 0x348   :  { %v10337_v11 = vld [vmem:[#allocation4 + $0x1388] ss:$16 sps:$4 sm:$0xff]   ;;  %v10342_v60 = vld [vmem:[#allocation4 + $0x116c] ss:$16 sps:$4 sm:$0xff]  }
 0x349   :  { %7302 = vmatpush1.bf16.msra.mxu0 %v10280_v3  ;;  %v10345_v49 = vld [vmem:[#allocation4 + $0x136c] ss:$16 sps:$4 sm:$0xff]   ;;  %v10340_v61 = vld [vmem:[#allocation4 + $0x1168] ss:$16 sps:$4 sm:$0xff]  }
 0x34a   :  { %7343 = vmatpush1.bf16.msra.mxu1 %v10283_v4  ;;  %7303 = vmatprep.subr.bf16.mxu0 %v10288_v42  ;;  %v10343_v7 = vld [vmem:[#allocation4 + $0x1368] ss:$16 sps:$4 sm:$0xff]   ;;  %v10348_v10 = vld [vmem:[#allocation4 + $0x114c] ss:$16 sps:$4 sm:$0xff]  }
 0x34b   :  { %7344 = vmatprep.subr.bf16.mxu1 %v10291_v43  ;;  %v10351_v3 = vld [vmem:[#allocation4 + $0x134c] ss:$16 sps:$4 sm:$0xff]   ;;  %v10346_v4 = vld [vmem:[#allocation4 + $0x1148] ss:$16 sps:$4 sm:$0xff]  }
 0x34c   :  { %v10349_v8 = vld [vmem:[#allocation4 + $0x1348] ss:$16 sps:$4 sm:$0xff]   ;;  %v10354_v41 = vld [vmem:[#allocation4 + $0x112c] ss:$16 sps:$4 sm:$0xff]  }
 0x34d   :  { %7304 = vmatpush1.bf16.msra.mxu0 %v10286_v19  ;;  %v10357_v42 = vld [vmem:[#allocation4 + $0x132c] ss:$16 sps:$4 sm:$0xff]   ;;  %v10352_v43 = vld [vmem:[#allocation4 + $0x1128] ss:$16 sps:$4 sm:$0xff]  }
 0x34e   :  { %7345 = vmatpush1.bf16.msra.mxu1 %v10289_v17  ;;  %7305 = vmatprep.subr.bf16.mxu0 %v10294_v18  ;;  %v10355_v19 = vld [vmem:[#allocation4 + $0x1328] ss:$16 sps:$4 sm:$0xff]   ;;  %v10360_v17 = vld [vmem:[#allocation4 + $0x110c] ss:$16 sps:$4 sm:$0xff]  }
 0x34f   :  { %7346 = vmatprep.subr.bf16.mxu1 %v10297_v20  ;;  %v10363_v18 = vld [vmem:[#allocation4 + $0x130c] ss:$16 sps:$4 sm:$0xff]   ;;  %v10358_v20 = vld [vmem:[#allocation4 + $0x1108] ss:$16 sps:$4 sm:$0xff]  }
 0x351   :  { %7306 = vmatpush1.bf16.msra.mxu0 %v10292_v21  ;;  %v10361_v21 = vld [vmem:[#allocation4 + $0x1308] ss:$16 sps:$4 sm:$0xff]  }
 0x352   :  { %7347 = vmatpush1.bf16.msra.mxu1 %v10295_v47  ;;  %7307 = vmatprep.subr.bf16.mxu0 %v10300_v55  ;;  %v10366_v47 = vld [vmem:[#allocation4 + $0x14ec] ss:$16 sps:$4 sm:$0xff]  }
 0x353   :  { %7348 = vmatprep.subr.bf16.mxu1 %v10303_v22  ;;  %v10369_v55 = vld [vmem:[#allocation4 + $0x16ec] ss:$16 sps:$4 sm:$0xff]   ;;  %v10364_v22 = vld [vmem:[#allocation4 + $0x14e8] ss:$16 sps:$4 sm:$0xff]  }
 0x355   :  { %7308 = vmatpush1.bf16.msra.mxu0 %v10298_v63  ;;  %v10367_v63 = vld [vmem:[#allocation4 + $0x16e8] ss:$16 sps:$4 sm:$0xff]  }
 0x356   :  { %7349 = vmatpush1.bf16.msra.mxu1 %v10301_v48  ;;  %7309 = vmatprep.subr.bf16.mxu0 %v10306_v50  ;;  %v10372_v48 = vld [vmem:[#allocation4 + $0x14cc] ss:$16 sps:$4 sm:$0xff]  }
 0x357   :  { %7350 = vmatprep.subr.bf16.mxu1 %v10309_v37  ;;  %v10375_v50 = vld [vmem:[#allocation4 + $0x16cc] ss:$16 sps:$4 sm:$0xff]  }
 0x359   :  { %7310 = vmatpush1.bf16.msra.mxu0 %v10304_v40 }
 0x35a   :  { %7351 = vmatpush1.bf16.msra.mxu1 %v10307_v23  ;;  %7311 = vmatprep.subr.bf16.mxu0 %v10312_v31  ;;  %v10370_v31 = vld [vmem:[#allocation4 + $0x14c8] ss:$16 sps:$4 sm:$0xff]  }
 0x35b   :  { %7352 = vmatprep.subr.bf16.mxu1 %v10315_v29  ;;  %v10373_v29 = vld [vmem:[#allocation4 + $0x16c8] ss:$16 sps:$4 sm:$0xff]  }
 0x35d   :  { %7312 = vmatpush1.bf16.msra.mxu0 %v10310_v32 }
 0x35e   :  { %7353 = vmatpush1.bf16.msra.mxu1 %v10313_v24  ;;  %7313 = vmatprep.subr.bf16.mxu0 %v10318_v27  ;;  %v10378_v27 = vld [vmem:[#allocation4 + $0x14ac] ss:$16 sps:$4 sm:$0xff]  }
 0x35f   :  { %7354 = vmatprep.subr.bf16.mxu1 %v10321_v30  ;;  %v10381_v30 = vld [vmem:[#allocation4 + $0x16ac] ss:$16 sps:$4 sm:$0xff]  }
 0x361   :  { %7314 = vmatpush2.bf16.msra.mxu0 %v10316_v33 }
 0x362   :  { %7355 = vmatpush2.bf16.msra.mxu1 %v10319_v34  ;;  %7315 = vmatprep.subr.bf16.mxu0 %v10324_v35  ;;  %v10376_v35 = vld [vmem:[#allocation4 + $0x14a8] ss:$16 sps:$4 sm:$0xff]  }
 0x363   :  { %7356 = vmatprep.subr.bf16.mxu1 %v10327_v45  ;;  %v10379_v45 = vld [vmem:[#allocation4 + $0x16a8] ss:$16 sps:$4 sm:$0xff]  }
 0x365   :  { %7316 = vmatpush2.bf16.msra.mxu0 %v10322_v38 }
 0x366   :  { %7357 = vmatpush2.bf16.msra.mxu1 %v10325_v46  ;;  %7317 = vmatprep.subr.bf16.mxu0 %v10330_v28  ;;  %v10384_v28 = vld [vmem:[#allocation4 + $0x148c] ss:$16 sps:$4 sm:$0xff]  }
 0x367   :  { %7358 = vmatprep.subr.bf16.mxu1 %v10333_v62  ;;  %v10387_v62 = vld [vmem:[#allocation4 + $0x168c] ss:$16 sps:$4 sm:$0xff]  }
 0x369   :  { %7318 = vmatpush2.bf16.msra.mxu0 %v10328_v56  ;;  %v10393_v56 = vld [vmem:[#allocation4 + $0x166c] ss:$16 sps:$4 sm:$0xff]  }
 0x36a   :  { %7359 = vmatpush2.bf16.msra.mxu1 %v10331_v36  ;;  %7319 = vmatprep.subr.bf16.mxu0 %v10336_v57  ;;  %v10388_v36 = vld [vmem:[#allocation4 + $0x1468] ss:$16 sps:$4 sm:$0xff]  }
 0x36b   :  { %7360 = vmatprep.subr.bf16.mxu1 %v10339_v58  ;;  %v10391_v57 = vld [vmem:[#allocation4 + $0x1668] ss:$16 sps:$4 sm:$0xff]   ;;  %v10396_v58 = vld [vmem:[#allocation4 + $0x144c] ss:$16 sps:$4 sm:$0xff]  }
 0x36d   :  { %7320 = vmatpush2.bf16.msra.mxu0 %v10334_v59  ;;  %v10399_v59 = vld [vmem:[#allocation4 + $0x164c] ss:$16 sps:$4 sm:$0xff]  }
 0x36e   :  { %7361 = vmatpush2.bf16.msra.mxu1 %v10337_v11  ;;  %7321 = vmatprep.subr.bf16.mxu0 %v10342_v60  ;;  %v10394_v11 = vld [vmem:[#allocation4 + $0x1448] ss:$16 sps:$4 sm:$0xff]  }
 0x36f   :  { %7362 = vmatprep.subr.bf16.mxu1 %v10345_v49  ;;  %v10397_v60 = vld [vmem:[#allocation4 + $0x1648] ss:$16 sps:$4 sm:$0xff]   ;;  %v10402_v49 = vld [vmem:[#allocation4 + $0x142c] ss:$16 sps:$4 sm:$0xff]  }
 0x371   :  { %7322 = vmatpush2.bf16.msra.mxu0 %v10340_v61  ;;  %v10405_v61 = vld [vmem:[#allocation4 + $0x162c] ss:$16 sps:$4 sm:$0xff]  }
 0x372   :  { %7363 = vmatpush2.bf16.msra.mxu1 %v10343_v7  ;;  %7323 = vmatprep.subr.bf16.mxu0 %v10348_v10  ;;  %v10400_v7 = vld [vmem:[#allocation4 + $0x1428] ss:$16 sps:$4 sm:$0xff]  }
 0x373   :  { %7364 = vmatprep.subr.bf16.mxu1 %v10351_v3  ;;  %v10403_v10 = vld [vmem:[#allocation4 + $0x1628] ss:$16 sps:$4 sm:$0xff]   ;;  %v10408_v3 = vld [vmem:[#allocation4 + $0x140c] ss:$16 sps:$4 sm:$0xff]  }
 0x375   :  { %7324 = vmatpush2.bf16.msra.mxu0 %v10346_v4  ;;  %v10411_v4 = vld [vmem:[#allocation4 + $0x160c] ss:$16 sps:$4 sm:$0xff]  }
 0x376   :  { %7365 = vmatpush2.bf16.msra.mxu1 %v10349_v8  ;;  %7325 = vmatprep.subr.bf16.mxu0 %v10354_v41  ;;  %v10406_v8 = vld [vmem:[#allocation4 + $0x1408] ss:$16 sps:$4 sm:$0xff]  }
 0x377   :  { %7366 = vmatprep.subr.bf16.mxu1 %v10357_v42  ;;  %v10409_v41 = vld [vmem:[#allocation4 + $0x1608] ss:$16 sps:$4 sm:$0xff]   ;;  %v10414_v42 = vld [vmem:[#allocation4 + $0x15ec] ss:$16 sps:$4 sm:$0xff]  }
 0x379   :  { %7326 = vmatpush2.bf16.msra.mxu0 %v10352_v43  ;;  %v10417_v43 = vld [vmem:[#allocation4 + $0x17ec] ss:$16 sps:$4 sm:$0xff]  }
 0x37a   :  { %7367 = vmatpush2.bf16.msra.mxu1 %v10355_v19  ;;  %7327 = vmatprep.subr.bf16.mxu0 %v10360_v17  ;;  %v10412_v19 = vld [vmem:[#allocation4 + $0x15e8] ss:$16 sps:$4 sm:$0xff]  }
 0x37b   :  { %7368 = vmatprep.subr.bf16.mxu1 %v10363_v18  ;;  %v10415_v17 = vld [vmem:[#allocation4 + $0x17e8] ss:$16 sps:$4 sm:$0xff]   ;;  %v10420_v18 = vld [vmem:[#allocation4 + $0x15cc] ss:$16 sps:$4 sm:$0xff]  }
 0x37d   :  { %7328 = vmatpush2.bf16.msra.mxu0 %v10358_v20  ;;  %v10423_v20 = vld [vmem:[#allocation4 + $0x17cc] ss:$16 sps:$4 sm:$0xff]  }
 0x37e   :  { %7369 = vmatpush2.bf16.msra.mxu1 %v10361_v21  ;;  %7379 = vmatprep.subr.bf16.mxu0 %v10366_v47  ;;  %v10418_v21 = vld [vmem:[#allocation4 + $0x15c8] ss:$16 sps:$4 sm:$0xff]  }
 0x37f   :  { %7420 = vmatprep.subr.bf16.mxu1 %v10369_v55  ;;  %v10421_v47 = vld [vmem:[#allocation4 + $0x17c8] ss:$16 sps:$4 sm:$0xff]   ;;  %v10426_v55 = vld [vmem:[#allocation4 + $0x15ac] ss:$16 sps:$4 sm:$0xff]  }
 0x380   :  { %v7085_v37 = vpop.f32.mrf.mxu0  ;;  %7330 = vmatmul.mubr.bf16.vlgmr.msra.gmra.mxu0 %v10915_v1 }
 0x381   :  { %v7126_v40 = vpop.f32.mrf.mxu1  ;;  %7371 = vmatmul.mubr.bf16.vlgmr.msra.gmra.mxu1 %v10917_v2  ;;  %v7086_v23 = vadd.f32 %v7085_v37, %v11017_v52  ;;  %7380 = vmatpush1.bf16.msra.mxu0 %v10364_v22  ;;  %v10429_v22 = vld [vmem:[#allocation4 + $0x17ac] ss:$16 sps:$4 sm:$0xff]  }
 0x382   :  { %7421 = vmatpush1.bf16.msra.mxu1 %v10367_v63  ;;  %v7087_v32 = vpop.f32.mrf.mxu0  ;;  %7381 = vmatprep.subr.bf16.mxu0 %v10372_v48  ;;  %v10424_v63 = vld [vmem:[#allocation4 + $0x15a8] ss:$16 sps:$4 sm:$0xff]   ;;  %v10435_v37 = vld [vmem:[#allocation4 + $0x178c] ss:$16 sps:$4 sm:$0xff]  }
 0x383   :  { %v7128_v24 = vpop.f32.mrf.mxu1  ;;  %7422 = vmatprep.subr.bf16.mxu1 %v10375_v50  ;;  %v11026_v33 = vadd.f32 %v7126_v40, %v7086_v23  ;;  %v7088_v34 = vadd.f32 %v7087_v32, %v11021_v0  ;;  %7411 = vmatprep.mubr.bf16.mxu0 %v10919_v15  ;;  %v10382_v0 = vld [vmem:[#allocation4 + $0x1488] ss:$16 sps:$4 sm:$0xff]   ;;  %v10432_v50 = vld [vmem:[#allocation4 + $0x158c] ss:$16 sps:$4 sm:$0xff]  }
 0x384   :  { %7452 = vmatprep.mubr.bf16.mxu1 %v10921_v16  ;;  %v7089_v1 = vpop.f32.mrf.mxu0  ;;  %v10385_v15 = vld [vmem:[#allocation4 + $0x1688] ss:$16 sps:$4 sm:$0xff]   ;;  %v10390_v16 = vld [vmem:[#allocation4 + $0x146c] ss:$16 sps:$4 sm:$0xff]  }
 0x385   :  { %v7130_v2 = vpop.f32.mrf.mxu1  ;;  %v11031_v52 = vadd.f32 %v7128_v24, %v7088_v34  ;;  %7382 = vmatpush1.bf16.msra.mxu0 %v10370_v31  ;;  %v10427_v48 = vld [vmem:[#allocation4 + $0x17a8] ss:$16 sps:$4 sm:$0xff]   ;;  %v10438_v31 = vld [vmem:[#allocation4 + $0x156c] ss:$16 sps:$4 sm:$0xff]  }
 0x386   :  { %7423 = vmatpush1.bf16.msra.mxu1 %v10373_v29  ;;  %v7090_v38 = vpop.f32.mrf.mxu0  ;;  %7383 = vmatprep.subr.bf16.mxu0 %v10378_v27  ;;  %v10430_v40 = vld [vmem:[#allocation4 + $0x1588] ss:$16 sps:$4 sm:$0xff]   ;;  %v10441_v29 = vld [vmem:[#allocation4 + $0x176c] ss:$16 sps:$4 sm:$0xff]  }
 0x387   :  { %v7131_v46 = vpop.f32.mrf.mxu1  ;;  %7424 = vmatprep.subr.bf16.mxu1 %v10381_v30  ;;  %v10433_v23 = vld [vmem:[#allocation4 + $0x1788] ss:$16 sps:$4 sm:$0xff]   ;;  %v10444_v27 = vld [vmem:[#allocation4 + $0x154c] ss:$16 sps:$4 sm:$0xff]  }
 0x388   :  { %v10436_v32 = vld [vmem:[#allocation4 + $0x1568] ss:$16 sps:$4 sm:$0xff]   ;;  %v10447_v30 = vld [vmem:[#allocation4 + $0x174c] ss:$16 sps:$4 sm:$0xff]  }
 0x389   :  { %7384 = vmatpush1.bf16.msra.mxu0 %v10376_v35  ;;  %v10439_v24 = vld [vmem:[#allocation4 + $0x1768] ss:$16 sps:$4 sm:$0xff]   ;;  %v10450_v2 = vld [vmem:[#allocation4 + $0x152c] ss:$16 sps:$4 sm:$0xff]  }
 0x38a   :  { %7425 = vmatpush1.bf16.msra.mxu1 %v10379_v45  ;;  %7385 = vmatprep.subr.bf16.mxu0 %v10384_v28  ;;  %v10442_v34 = vld [vmem:[#allocation4 + $0x1548] ss:$16 sps:$4 sm:$0xff]   ;;  %v10453_v35 = vld [vmem:[#allocation4 + $0x172c] ss:$16 sps:$4 sm:$0xff]  }
 0x38b   :  { %7426 = vmatprep.subr.bf16.mxu1 %v10387_v62  ;;  %v10445_v1 = vld [vmem:[#allocation4 + $0x1748] ss:$16 sps:$4 sm:$0xff]   ;;  %v10456_v46 = vld [vmem:[#allocation4 + $0x150c] ss:$16 sps:$4 sm:$0xff]  }
 0x38c   :  { %v10448_v45 = vld [vmem:[#allocation4 + $0x1528] ss:$16 sps:$4 sm:$0xff]   ;;  %v10459_v28 = vld [vmem:[#allocation4 + $0x170c] ss:$16 sps:$4 sm:$0xff]  }
 0x38d   :  { %7386 = vmatpush1.bf16.msra.mxu0 %v10382_v0  ;;  %v10451_v38 = vld [vmem:[#allocation4 + $0x1728] ss:$16 sps:$4 sm:$0xff]  }
 0x38e   :  { %7427 = vmatpush1.bf16.msra.mxu1 %v10385_v15  ;;  %7387 = vmatprep.subr.bf16.mxu0 %v10390_v16  ;;  %v10454_v62 = vld [vmem:[#allocation4 + $0x1508] ss:$16 sps:$4 sm:$0xff]   ;;  %v10462_v15 = vld [vmem:[#allocation4 + $0x18ec] ss:$16 sps:$4 sm:$0xff]  }
 0x38f   :  { %7428 = vmatprep.subr.bf16.mxu1 %v10393_v56  ;;  %v10457_v0 = vld [vmem:[#allocation4 + $0x1708] ss:$16 sps:$4 sm:$0xff]   ;;  %v10465_v16 = vld [vmem:[#allocation4 + $0x1aec] ss:$16 sps:$4 sm:$0xff]  }
 0x390   :  { %v10460_v56 = vld [vmem:[#allocation4 + $0x18e8] ss:$16 sps:$4 sm:$0xff]  }
 0x391   :  { %7388 = vmatpush1.bf16.msra.mxu0 %v10388_v36  ;;  %v10463_v36 = vld [vmem:[#allocation4 + $0x1ae8] ss:$16 sps:$4 sm:$0xff]  }
 0x392   :  { %7429 = vmatpush1.bf16.msra.mxu1 %v10391_v57  ;;  %7389 = vmatprep.subr.bf16.mxu0 %v10396_v58  ;;  %v10468_v57 = vld [vmem:[#allocation4 + $0x18cc] ss:$16 sps:$4 sm:$0xff]  }
 0x393   :  { %7430 = vmatprep.subr.bf16.mxu1 %v10399_v59  ;;  %v10471_v58 = vld [vmem:[#allocation4 + $0x1acc] ss:$16 sps:$4 sm:$0xff]  }
 0x395   :  { %7390 = vmatpush1.bf16.msra.mxu0 %v10394_v11 }
 0x396   :  { %7431 = vmatpush1.bf16.msra.mxu1 %v10397_v60  ;;  %7391 = vmatprep.subr.bf16.mxu0 %v10402_v49  ;;  %v10466_v49 = vld [vmem:[#allocation4 + $0x18c8] ss:$16 sps:$4 sm:$0xff]  }
 0x397   :  { %7432 = vmatprep.subr.bf16.mxu1 %v10405_v61  ;;  %v10469_v61 = vld [vmem:[#allocation4 + $0x1ac8] ss:$16 sps:$4 sm:$0xff]  }
 0x399   :  { %7392 = vmatpush1.bf16.msra.mxu0 %v10400_v7 }
 0x39a   :  { %7433 = vmatpush1.bf16.msra.mxu1 %v10403_v10  ;;  %7393 = vmatprep.subr.bf16.mxu0 %v10408_v3  ;;  %v10474_v3 = vld [vmem:[#allocation4 + $0x18ac] ss:$16 sps:$4 sm:$0xff]  }
 0x39b   :  { %7434 = vmatprep.subr.bf16.mxu1 %v10411_v4  ;;  %v10477_v4 = vld [vmem:[#allocation4 + $0x1aac] ss:$16 sps:$4 sm:$0xff]  }
 0x39d   :  { %7394 = vmatpush1.bf16.msra.mxu0 %v10406_v8 }
 0x39e   :  { %7435 = vmatpush1.bf16.msra.mxu1 %v10409_v41  ;;  %7395 = vmatprep.subr.bf16.mxu0 %v10414_v42  ;;  %v10472_v42 = vld [vmem:[#allocation4 + $0x18a8] ss:$16 sps:$4 sm:$0xff]  }
 0x39f   :  { %7436 = vmatprep.subr.bf16.mxu1 %v10417_v43  ;;  %v10475_v43 = vld [vmem:[#allocation4 + $0x1aa8] ss:$16 sps:$4 sm:$0xff]  }
 0x3a1   :  { %7396 = vmatpush2.bf16.msra.mxu0 %v10412_v19 }
 0x3a2   :  { %7437 = vmatpush2.bf16.msra.mxu1 %v10415_v17  ;;  %7397 = vmatprep.subr.bf16.mxu0 %v10420_v18  ;;  %v10480_v18 = vld [vmem:[#allocation4 + $0x188c] ss:$16 sps:$4 sm:$0xff]  }
 0x3a3   :  { %7438 = vmatprep.subr.bf16.mxu1 %v10423_v20  ;;  %v10483_v20 = vld [vmem:[#allocation4 + $0x1a8c] ss:$16 sps:$4 sm:$0xff]  }
 0x3a5   :  { %7398 = vmatpush2.bf16.msra.mxu0 %v10418_v21  ;;  %v10489_v21 = vld [vmem:[#allocation4 + $0x1a6c] ss:$16 sps:$4 sm:$0xff]  }
 0x3a6   :  { %7439 = vmatpush2.bf16.msra.mxu1 %v10421_v47  ;;  %7399 = vmatprep.subr.bf16.mxu0 %v10426_v55  ;;  %v10484_v47 = vld [vmem:[#allocation4 + $0x1868] ss:$16 sps:$4 sm:$0xff]  }
 0x3a7   :  { %7440 = vmatprep.subr.bf16.mxu1 %v10429_v22  ;;  %v10487_v55 = vld [vmem:[#allocation4 + $0x1a68] ss:$16 sps:$4 sm:$0xff]   ;;  %v10492_v22 = vld [vmem:[#allocation4 + $0x184c] ss:$16 sps:$4 sm:$0xff]  }
 0x3a9   :  { %7400 = vmatpush2.bf16.msra.mxu0 %v10424_v63  ;;  %v10495_v63 = vld [vmem:[#allocation4 + $0x1a4c] ss:$16 sps:$4 sm:$0xff]  }
 0x3aa   :  { %7441 = vmatpush2.bf16.msra.mxu1 %v10427_v48  ;;  %7401 = vmatprep.subr.bf16.mxu0 %v10432_v50  ;;  %v10490_v48 = vld [vmem:[#allocation4 + $0x1848] ss:$16 sps:$4 sm:$0xff]  }
 0x3ab   :  { %7442 = vmatprep.subr.bf16.mxu1 %v10435_v37  ;;  %v10493_v50 = vld [vmem:[#allocation4 + $0x1a48] ss:$16 sps:$4 sm:$0xff]   ;;  %v10498_v37 = vld [vmem:[#allocation4 + $0x182c] ss:$16 sps:$4 sm:$0xff]  }
 0x3ad   :  { %7402 = vmatpush2.bf16.msra.mxu0 %v10430_v40  ;;  %v10501_v40 = vld [vmem:[#allocation4 + $0x1a2c] ss:$16 sps:$4 sm:$0xff]  }
 0x3ae   :  { %7443 = vmatpush2.bf16.msra.mxu1 %v10433_v23  ;;  %7403 = vmatprep.subr.bf16.mxu0 %v10438_v31  ;;  %v10496_v23 = vld [vmem:[#allocation4 + $0x1828] ss:$16 sps:$4 sm:$0xff]  }
 0x3af   :  { %7444 = vmatprep.subr.bf16.mxu1 %v10441_v29  ;;  %v10499_v31 = vld [vmem:[#allocation4 + $0x1a28] ss:$16 sps:$4 sm:$0xff]   ;;  %v10504_v29 = vld [vmem:[#allocation4 + $0x180c] ss:$16 sps:$4 sm:$0xff]  }
 0x3b1   :  { %7404 = vmatpush2.bf16.msra.mxu0 %v10436_v32  ;;  %v10507_v32 = vld [vmem:[#allocation4 + $0x1a0c] ss:$16 sps:$4 sm:$0xff]  }
 0x3b2   :  { %7445 = vmatpush2.bf16.msra.mxu1 %v10439_v24  ;;  %7405 = vmatprep.subr.bf16.mxu0 %v10444_v27  ;;  %v10502_v24 = vld [vmem:[#allocation4 + $0x1808] ss:$16 sps:$4 sm:$0xff]  }
 0x3b3   :  { %7446 = vmatprep.subr.bf16.mxu1 %v10447_v30  ;;  %v10505_v27 = vld [vmem:[#allocation4 + $0x1a08] ss:$16 sps:$4 sm:$0xff]   ;;  %v10510_v30 = vld [vmem:[#allocation4 + $0x19ec] ss:$16 sps:$4 sm:$0xff]  }
 0x3b5   :  { %7406 = vmatpush2.bf16.msra.mxu0 %v10442_v34  ;;  %v10513_v34 = vld [vmem:[#allocation4 + $0x1bec] ss:$16 sps:$4 sm:$0xff]  }
 0x3b6   :  { %7447 = vmatpush2.bf16.msra.mxu1 %v10445_v1  ;;  %7407 = vmatprep.subr.bf16.mxu0 %v10450_v2  ;;  %v10508_v1 = vld [vmem:[#allocation4 + $0x19e8] ss:$16 sps:$4 sm:$0xff]  }
 0x3b7   :  { %7448 = vmatprep.subr.bf16.mxu1 %v10453_v35  ;;  %v10511_v2 = vld [vmem:[#allocation4 + $0x1be8] ss:$16 sps:$4 sm:$0xff]   ;;  %v10516_v35 = vld [vmem:[#allocation4 + $0x19cc] ss:$16 sps:$4 sm:$0xff]  }
 0x3b9   :  { %7408 = vmatpush2.bf16.msra.mxu0 %v10448_v45  ;;  %v10519_v45 = vld [vmem:[#allocation4 + $0x1bcc] ss:$16 sps:$4 sm:$0xff]  }
 0x3ba   :  { %7449 = vmatpush2.bf16.msra.mxu1 %v10451_v38  ;;  %7409 = vmatprep.subr.bf16.mxu0 %v10456_v46  ;;  %v10514_v38 = vld [vmem:[#allocation4 + $0x19c8] ss:$16 sps:$4 sm:$0xff]  }
 0x3bb   :  { %7450 = vmatprep.subr.bf16.mxu1 %v10459_v28  ;;  %v10517_v46 = vld [vmem:[#allocation4 + $0x1bc8] ss:$16 sps:$4 sm:$0xff]   ;;  %v10522_v28 = vld [vmem:[#allocation4 + $0x19ac] ss:$16 sps:$4 sm:$0xff]  }
 0x3bd   :  { %7410 = vmatpush2.bf16.msra.mxu0 %v10454_v62  ;;  %v10525_v62 = vld [vmem:[#allocation4 + $0x1bac] ss:$16 sps:$4 sm:$0xff]  }
 0x3be   :  { %7451 = vmatpush2.bf16.msra.mxu1 %v10457_v0  ;;  %7461 = vmatprep.subr.bf16.mxu0 %v10462_v15  ;;  %v10520_v0 = vld [vmem:[#allocation4 + $0x19a8] ss:$16 sps:$4 sm:$0xff]  }
 0x3bf   :  { %7502 = vmatprep.subr.bf16.mxu1 %v10465_v16  ;;  %v10523_v15 = vld [vmem:[#allocation4 + $0x1ba8] ss:$16 sps:$4 sm:$0xff]   ;;  %v10528_v16 = vld [vmem:[#allocation4 + $0x198c] ss:$16 sps:$4 sm:$0xff]  }
 0x3c0   :  { %v7167_v59 = vpop.f32.mrf.mxu0  ;;  %7412 = vmatmul.mubr.bf16.vlgmr.msra.gmra.mxu0 %v10933_v5 }
 0x3c1   :  { %v7208_v11 = vpop.f32.mrf.mxu1  ;;  %7453 = vmatmul.mubr.bf16.vlgmr.msra.gmra.mxu1 %v10935_v6  ;;  %v7168_v60 = vadd.f32 %v7167_v59, %v11026_v33  ;;  %7462 = vmatpush1.bf16.msra.mxu0 %v10460_v56  ;;  %v10531_v56 = vld [vmem:[#allocation4 + $0x1b8c] ss:$16 sps:$4 sm:$0xff]  }
 0x3c2   :  { %7503 = vmatpush1.bf16.msra.mxu1 %v10463_v36  ;;  %v7169_v7 = vpop.f32.mrf.mxu0  ;;  %7463 = vmatprep.subr.bf16.mxu0 %v10468_v57  ;;  %v10526_v36 = vld [vmem:[#allocation4 + $0x1988] ss:$16 sps:$4 sm:$0xff]   ;;  %v10537_v59 = vld [vmem:[#allocation4 + $0x1b6c] ss:$16 sps:$4 sm:$0xff]  }
 0x3c3   :  { %v7210_v10 = vpop.f32.mrf.mxu1  ;;  %7504 = vmatprep.subr.bf16.mxu1 %v10471_v58  ;;  %v11036_v8 = vadd.f32 %v7208_v11, %v7168_v60  ;;  %v7170_v41 = vadd.f32 %v7169_v7, %v11031_v52  ;;  %7493 = vmatprep.mubr.bf16.mxu0 %v10937_v25  ;;  %v10478_v52 = vld [vmem:[#allocation4 + $0x1888] ss:$16 sps:$4 sm:$0xff]   ;;  %v10534_v58 = vld [vmem:[#allocation4 + $0x196c] ss:$16 sps:$4 sm:$0xff]  }
 0x3c4   :  { %7534 = vmatprep.mubr.bf16.mxu1 %v10939_v26  ;;  %v7171_v5 = vpop.f32.mrf.mxu0  ;;  %v10481_v25 = vld [vmem:[#allocation4 + $0x1a88] ss:$16 sps:$4 sm:$0xff]   ;;  %v10486_v26 = vld [vmem:[#allocation4 + $0x186c] ss:$16 sps:$4 sm:$0xff]  }
 0x3c5   :  { %v7212_v6 = vpop.f32.mrf.mxu1  ;;  %v11041_v33 = vadd.f32 %v7210_v10, %v7170_v41  ;;  %7464 = vmatpush1.bf16.msra.mxu0 %v10466_v49  ;;  %v10529_v57 = vld [vmem:[#allocation4 + $0x1b88] ss:$16 sps:$4 sm:$0xff]   ;;  %v10540_v49 = vld [vmem:[#allocation4 + $0x194c] ss:$16 sps:$4 sm:$0xff]  }
 0x3c6   :  { %7505 = vmatpush1.bf16.msra.mxu1 %v10469_v61  ;;  %v7172_v19 = vpop.f32.mrf.mxu0  ;;  %7465 = vmatprep.subr.bf16.mxu0 %v10474_v3  ;;  %v10532_v11 = vld [vmem:[#allocation4 + $0x1968] ss:$16 sps:$4 sm:$0xff]   ;;  %v10543_v61 = vld [vmem:[#allocation4 + $0x1b4c] ss:$16 sps:$4 sm:$0xff]  }
 0x3c7   :  { %v7213_v17 = vpop.f32.mrf.mxu1  ;;  %7506 = vmatprep.subr.bf16.mxu1 %v10477_v4  ;;  %v10535_v60 = vld [vmem:[#allocation4 + $0x1b68] ss:$16 sps:$4 sm:$0xff]   ;;  %v10546_v3 = vld [vmem:[#allocation4 + $0x192c] ss:$16 sps:$4 sm:$0xff]  }
 0x3c8   :  { %v10538_v7 = vld [vmem:[#allocation4 + $0x1948] ss:$16 sps:$4 sm:$0xff]   ;;  %v10549_v4 = vld [vmem:[#allocation4 + $0x1b2c] ss:$16 sps:$4 sm:$0xff]  }
 0x3c9   :  { %7466 = vmatpush1.bf16.msra.mxu0 %v10472_v42  ;;  %v10541_v10 = vld [vmem:[#allocation4 + $0x1b48] ss:$16 sps:$4 sm:$0xff]   ;;  %v10552_v6 = vld [vmem:[#allocation4 + $0x190c] ss:$16 sps:$4 sm:$0xff]  }
 0x3ca   :  { %7507 = vmatpush1.bf16.msra.mxu1 %v10475_v43  ;;  %7467 = vmatprep.subr.bf16.mxu0 %v10480_v18  ;;  %v10544_v41 = vld [vmem:[#allocation4 + $0x1928] ss:$16 sps:$4 sm:$0xff]   ;;  %v10555_v42 = vld [vmem:[#allocation4 + $0x1b0c] ss:$16 sps:$4 sm:$0xff]  }
 0x3cb   :  { %7508 = vmatprep.subr.bf16.mxu1 %v10483_v20  ;;  %v10547_v5 = vld [vmem:[#allocation4 + $0x1b28] ss:$16 sps:$4 sm:$0xff]   ;;  %v10558_v17 = vld [vmem:[#allocation4 + $0x1cec] ss:$16 sps:$4 sm:$0xff]  }
 0x3cc   :  { %v10550_v43 = vld [vmem:[#allocation4 + $0x1908] ss:$16 sps:$4 sm:$0xff]   ;;  %v10561_v18 = vld [vmem:[#allocation4 + $0x1eec] ss:$16 sps:$4 sm:$0xff]  }
 0x3cd   :  { %7468 = vmatpush1.bf16.msra.mxu0 %v10478_v52  ;;  %v10553_v19 = vld [vmem:[#allocation4 + $0x1b08] ss:$16 sps:$4 sm:$0xff]  }
 0x3ce   :  { %7509 = vmatpush1.bf16.msra.mxu1 %v10481_v25  ;;  %7469 = vmatprep.subr.bf16.mxu0 %v10486_v26  ;;  %v10556_v20 = vld [vmem:[#allocation4 + $0x1ce8] ss:$16 sps:$4 sm:$0xff]   ;;  %v10564_v25 = vld [vmem:[#allocation4 + $0x1ccc] ss:$16 sps:$4 sm:$0xff]  }
 0x3cf   :  { %7510 = vmatprep.subr.bf16.mxu1 %v10489_v21  ;;  %v10559_v52 = vld [vmem:[#allocation4 + $0x1ee8] ss:$16 sps:$4 sm:$0xff]   ;;  %v10567_v26 = vld [vmem:[#allocation4 + $0x1ecc] ss:$16 sps:$4 sm:$0xff]  }
 0x3d1   :  { %7470 = vmatpush1.bf16.msra.mxu0 %v10484_v47 }
 0x3d2   :  { %7511 = vmatpush1.bf16.msra.mxu1 %v10487_v55  ;;  %7471 = vmatprep.subr.bf16.mxu0 %v10492_v22  ;;  %v10562_v22 = vld [vmem:[#allocation4 + $0x1cc8] ss:$16 sps:$4 sm:$0xff]  }
 0x3d3   :  { %7512 = vmatprep.subr.bf16.mxu1 %v10495_v63  ;;  %v10565_v63 = vld [vmem:[#allocation4 + $0x1ec8] ss:$16 sps:$4 sm:$0xff]  }
 0x3d5   :  { %7472 = vmatpush1.bf16.msra.mxu0 %v10490_v48 }
 0x3d6   :  { %7513 = vmatpush1.bf16.msra.mxu1 %v10493_v50  ;;  %7473 = vmatprep.subr.bf16.mxu0 %v10498_v37  ;;  %v10570_v37 = vld [vmem:[#allocation4 + $0x1cac] ss:$16 sps:$4 sm:$0xff]  }
 0x3d7   :  { %7514 = vmatprep.subr.bf16.mxu1 %v10501_v40  ;;  %v10573_v40 = vld [vmem:[#allocation4 + $0x1eac] ss:$16 sps:$4 sm:$0xff]  }
 0x3d9   :  { %7474 = vmatpush1.bf16.msra.mxu0 %v10496_v23 }
 0x3da   :  { %7515 = vmatpush1.bf16.msra.mxu1 %v10499_v31  ;;  %7475 = vmatprep.subr.bf16.mxu0 %v10504_v29  ;;  %v10568_v29 = vld [vmem:[#allocation4 + $0x1ca8] ss:$16 sps:$4 sm:$0xff]  }
 0x3db   :  { %7516 = vmatprep.subr.bf16.mxu1 %v10507_v32  ;;  %v10571_v32 = vld [vmem:[#allocation4 + $0x1ea8] ss:$16 sps:$4 sm:$0xff]  }
 0x3dd   :  { %7476 = vmatpush1.bf16.msra.mxu0 %v10502_v24 }
 0x3de   :  { %7517 = vmatpush1.bf16.msra.mxu1 %v10505_v27  ;;  %7477 = vmatprep.subr.bf16.mxu0 %v10510_v30  ;;  %v10576_v30 = vld [vmem:[#allocation4 + $0x1c8c] ss:$16 sps:$4 sm:$0xff]  }
 0x3df   :  { %7518 = vmatprep.subr.bf16.mxu1 %v10513_v34  ;;  %v10579_v34 = vld [vmem:[#allocation4 + $0x1e8c] ss:$16 sps:$4 sm:$0xff]  }
 0x3e1   :  { %7478 = vmatpush2.bf16.msra.mxu0 %v10508_v1  ;;  %v10585_v1 = vld [vmem:[#allocation4 + $0x1e6c] ss:$16 sps:$4 sm:$0xff]  }
 0x3e2   :  { %7519 = vmatpush2.bf16.msra.mxu1 %v10511_v2  ;;  %7479 = vmatprep.subr.bf16.mxu0 %v10516_v35  ;;  %v10580_v2 = vld [vmem:[#allocation4 + $0x1c68] ss:$16 sps:$4 sm:$0xff]  }
 0x3e3   :  { %7520 = vmatprep.subr.bf16.mxu1 %v10519_v45  ;;  %v10583_v35 = vld [vmem:[#allocation4 + $0x1e68] ss:$16 sps:$4 sm:$0xff]   ;;  %v10588_v45 = vld [vmem:[#allocation4 + $0x1c4c] ss:$16 sps:$4 sm:$0xff]  }
 0x3e5   :  { %7480 = vmatpush2.bf16.msra.mxu0 %v10514_v38  ;;  %v10591_v38 = vld [vmem:[#allocation4 + $0x1e4c] ss:$16 sps:$4 sm:$0xff]  }
 0x3e6   :  { %7521 = vmatpush2.bf16.msra.mxu1 %v10517_v46  ;;  %7481 = vmatprep.subr.bf16.mxu0 %v10522_v28  ;;  %v10586_v46 = vld [vmem:[#allocation4 + $0x1c48] ss:$16 sps:$4 sm:$0xff]  }
 0x3e7   :  { %7522 = vmatprep.subr.bf16.mxu1 %v10525_v62  ;;  %v10589_v28 = vld [vmem:[#allocation4 + $0x1e48] ss:$16 sps:$4 sm:$0xff]   ;;  %v10594_v62 = vld [vmem:[#allocation4 + $0x1c2c] ss:$16 sps:$4 sm:$0xff]  }
 0x3e9   :  { %7482 = vmatpush2.bf16.msra.mxu0 %v10520_v0  ;;  %v10597_v0 = vld [vmem:[#allocation4 + $0x1e2c] ss:$16 sps:$4 sm:$0xff]  }
 0x3ea   :  { %7523 = vmatpush2.bf16.msra.mxu1 %v10523_v15  ;;  %7483 = vmatprep.subr.bf16.mxu0 %v10528_v16  ;;  %v10592_v15 = vld [vmem:[#allocation4 + $0x1c28] ss:$16 sps:$4 sm:$0xff]  }
 0x3eb   :  { %7524 = vmatprep.subr.bf16.mxu1 %v10531_v56  ;;  %v10595_v16 = vld [vmem:[#allocation4 + $0x1e28] ss:$16 sps:$4 sm:$0xff]   ;;  %v10600_v56 = vld [vmem:[#allocation4 + $0x1c0c] ss:$16 sps:$4 sm:$0xff]  }
 0x3ed   :  { %7484 = vmatpush2.bf16.msra.mxu0 %v10526_v36  ;;  %v10603_v36 = vld [vmem:[#allocation4 + $0x1e0c] ss:$16 sps:$4 sm:$0xff]  }
 0x3ee   :  { %7525 = vmatpush2.bf16.msra.mxu1 %v10529_v57  ;;  %7485 = vmatprep.subr.bf16.mxu0 %v10534_v58  ;;  %v10598_v57 = vld [vmem:[#allocation4 + $0x1c08] ss:$16 sps:$4 sm:$0xff]  }
 0x3ef   :  { %7526 = vmatprep.subr.bf16.mxu1 %v10537_v59  ;;  %v10601_v58 = vld [vmem:[#allocation4 + $0x1e08] ss:$16 sps:$4 sm:$0xff]   ;;  %v10606_v59 = vld [vmem:[#allocation4 + $0x1dec] ss:$16 sps:$4 sm:$0xff]  }
 0x3f1   :  { %7486 = vmatpush2.bf16.msra.mxu0 %v10532_v11  ;;  %v10609_v11 = vld [vmem:[#allocation4 + $0x1fec] ss:$16 sps:$4 sm:$0xff]  }
 0x3f2   :  { %7527 = vmatpush2.bf16.msra.mxu1 %v10535_v60  ;;  %7487 = vmatprep.subr.bf16.mxu0 %v10540_v49  ;;  %v10604_v60 = vld [vmem:[#allocation4 + $0x1de8] ss:$16 sps:$4 sm:$0xff]  }
 0x3f3   :  { %7528 = vmatprep.subr.bf16.mxu1 %v10543_v61  ;;  %v10607_v49 = vld [vmem:[#allocation4 + $0x1fe8] ss:$16 sps:$4 sm:$0xff]   ;;  %v10612_v61 = vld [vmem:[#allocation4 + $0x1dcc] ss:$16 sps:$4 sm:$0xff]  }
 0x3f5   :  { %7488 = vmatpush2.bf16.msra.mxu0 %v10538_v7  ;;  %v10615_v7 = vld [vmem:[#allocation4 + $0x1fcc] ss:$16 sps:$4 sm:$0xff]  }
 0x3f6   :  { %7529 = vmatpush2.bf16.msra.mxu1 %v10541_v10  ;;  %7489 = vmatprep.subr.bf16.mxu0 %v10546_v3  ;;  %v10610_v10 = vld [vmem:[#allocation4 + $0x1dc8] ss:$16 sps:$4 sm:$0xff]  }
 0x3f7   :  { %7530 = vmatprep.subr.bf16.mxu1 %v10549_v4  ;;  %v10613_v3 = vld [vmem:[#allocation4 + $0x1fc8] ss:$16 sps:$4 sm:$0xff]   ;;  %v10618_v4 = vld [vmem:[#allocation4 + $0x1dac] ss:$16 sps:$4 sm:$0xff]  }
 0x3f9   :  { %7490 = vmatpush2.bf16.msra.mxu0 %v10544_v41  ;;  %v10621_v41 = vld [vmem:[#allocation4 + $0x1fac] ss:$16 sps:$4 sm:$0xff]  }
 0x3fa   :  { %7531 = vmatpush2.bf16.msra.mxu1 %v10547_v5  ;;  %7491 = vmatprep.subr.bf16.mxu0 %v10552_v6  ;;  %v10616_v5 = vld [vmem:[#allocation4 + $0x1da8] ss:$16 sps:$4 sm:$0xff]  }
 0x3fb   :  { %7532 = vmatprep.subr.bf16.mxu1 %v10555_v42  ;;  %v10619_v6 = vld [vmem:[#allocation4 + $0x1fa8] ss:$16 sps:$4 sm:$0xff]   ;;  %v10624_v42 = vld [vmem:[#allocation4 + $0x1d8c] ss:$16 sps:$4 sm:$0xff]  }
 0x3fd   :  { %7492 = vmatpush2.bf16.msra.mxu0 %v10550_v43  ;;  %v10627_v43 = vld [vmem:[#allocation4 + $0x1f8c] ss:$16 sps:$4 sm:$0xff]  }
 0x3fe   :  { %7533 = vmatpush2.bf16.msra.mxu1 %v10553_v19  ;;  %7543 = vmatprep.subr.bf16.mxu0 %v10558_v17  ;;  %v10622_v19 = vld [vmem:[#allocation4 + $0x1d88] ss:$16 sps:$4 sm:$0xff]  }
 0x3ff   :  { %7584 = vmatprep.subr.bf16.mxu1 %v10561_v18  ;;  %v10625_v17 = vld [vmem:[#allocation4 + $0x1f88] ss:$16 sps:$4 sm:$0xff]   ;;  %v10630_v18 = vld [vmem:[#allocation4 + $0x1d6c] ss:$16 sps:$4 sm:$0xff]  }
 0x400   :  { %v7249_v21 = vpop.f32.mrf.mxu0  ;;  %7494 = vmatmul.mubr.bf16.vlgmr.msra.gmra.mxu0 %v10951_v39 }
 0x401   :  { %v7290_v47 = vpop.f32.mrf.mxu1  ;;  %7535 = vmatmul.mubr.bf16.vlgmr.msra.gmra.mxu1 %v10953_v44  ;;  %v7250_v55 = vadd.f32 %v7249_v21, %v11036_v8  ;;  %7544 = vmatpush1.bf16.msra.mxu0 %v10556_v20  ;;  %v10633_v20 = vld [vmem:[#allocation4 + $0x1f6c] ss:$16 sps:$4 sm:$0xff]  }
 0x402   :  { %7585 = vmatpush1.bf16.msra.mxu1 %v10559_v52  ;;  %v7251_v48 = vpop.f32.mrf.mxu0  ;;  %7545 = vmatprep.subr.bf16.mxu0 %v10564_v25  ;;  %v10628_v52 = vld [vmem:[#allocation4 + $0x1d68] ss:$16 sps:$4 sm:$0xff]   ;;  %v10639_v21 = vld [vmem:[#allocation4 + $0x1f4c] ss:$16 sps:$4 sm:$0xff]  }
 0x403   :  { %v7292_v50 = vpop.f32.mrf.mxu1  ;;  %7586 = vmatprep.subr.bf16.mxu1 %v10567_v26  ;;  %v11046_v23 = vadd.f32 %v7290_v47, %v7250_v55  ;;  %v7252_v31 = vadd.f32 %v7251_v48, %v11041_v33  ;;  %7575 = vmatprep.mubr.bf16.mxu0 %v10955_v53  ;;  %v10574_v33 = vld [vmem:[#allocation4 + $0x1c88] ss:$16 sps:$4 sm:$0xff]   ;;  %v10636_v26 = vld [vmem:[#allocation4 + $0x1d4c] ss:$16 sps:$4 sm:$0xff]  }
 0x404   :  { %7616 = vmatprep.mubr.bf16.mxu1 %v10957_v54  ;;  %v7253_v39 = vpop.f32.mrf.mxu0  ;;  %v10577_v53 = vld [vmem:[#allocation4 + $0x1e88] ss:$16 sps:$4 sm:$0xff]   ;;  %v10582_v54 = vld [vmem:[#allocation4 + $0x1c6c] ss:$16 sps:$4 sm:$0xff]  }
 0x405   :  { %v7294_v44 = vpop.f32.mrf.mxu1  ;;  %v11051_v8 = vadd.f32 %v7292_v50, %v7252_v31  ;;  %7546 = vmatpush1.bf16.msra.mxu0 %v10562_v22  ;;  %v10631_v25 = vld [vmem:[#allocation4 + $0x1f68] ss:$16 sps:$4 sm:$0xff]   ;;  %v10642_v22 = vld [vmem:[#allocation4 + $0x1d2c] ss:$16 sps:$4 sm:$0xff]  }
 0x406   :  { %7587 = vmatpush1.bf16.msra.mxu1 %v10565_v63  ;;  %v7254_v24 = vpop.f32.mrf.mxu0  ;;  %7547 = vmatprep.subr.bf16.mxu0 %v10570_v37  ;;  %v10634_v47 = vld [vmem:[#allocation4 + $0x1d48] ss:$16 sps:$4 sm:$0xff]   ;;  %v10645_v63 = vld [vmem:[#allocation4 + $0x1f2c] ss:$16 sps:$4 sm:$0xff]  }
 0x407   :  { %v7295_v27 = vpop.f32.mrf.mxu1  ;;  %7588 = vmatprep.subr.bf16.mxu1 %v10573_v40  ;;  %v10637_v55 = vld [vmem:[#allocation4 + $0x1f48] ss:$16 sps:$4 sm:$0xff]   ;;  %v10648_v37 = vld [vmem:[#allocation4 + $0x1d0c] ss:$16 sps:$4 sm:$0xff]  }
 0x408   :  { %v10640_v48 = vld [vmem:[#allocation4 + $0x1d28] ss:$16 sps:$4 sm:$0xff]   ;;  %v10651_v40 = vld [vmem:[#allocation4 + $0x1f0c] ss:$16 sps:$4 sm:$0xff]  }
 0x409   :  { %7548 = vmatpush1.bf16.msra.mxu0 %v10568_v29  ;;  %v10643_v50 = vld [vmem:[#allocation4 + $0x1f28] ss:$16 sps:$4 sm:$0xff]   ;;  %v10652_v44 = vld [vmem:[#allocation7 + $0x78] sm:$0xff]   ;;  %v7626_v29 = vmax.f32 %v11011_v14, 0.0  ;;  %v10656_v14 = vld [vmem:[#allocation7 + $0x68] sm:$0xff]  }
 0x40a   :  { %7589 = vmatpush1.bf16.msra.mxu1 %v10571_v32  ;;  %7549 = vmatprep.subr.bf16.mxu0 %v10576_v30  ;;  %v10646_v31 = vld [vmem:[#allocation4 + $0x1d08] ss:$16 sps:$4 sm:$0xff]   ;;  %v10653_v32 = vld [vmem:[#allocation7 + $0x38] sm:$0xff]  }
 0x40b   :  { %7590 = vmatprep.subr.bf16.mxu1 %v10579_v34  ;;  %v10649_v39 = vld [vmem:[#allocation4 + $0x1f08] ss:$16 sps:$4 sm:$0xff]   ;;  %v7630_v27 = vpack.c.bf16 %v7626_v29, %v7626_v29 }
 0x40c   :  { %v10654_v24 = vld [vmem:[#allocation7 + $0x70] sm:$0xff]  }
 0x40d   :  { %7550 = vmatpush1.bf16.msra.mxu0 %v10574_v33 }
 0x40e   :  { %7591 = vmatpush1.bf16.msra.mxu1 %v10577_v53  ;;  %7551 = vmatprep.subr.bf16.mxu0 %v10582_v54  ;;  %v10655_v53 = vld [vmem:[#allocation7 + $0x30] sm:$0xff]  }
 0x40f   :  { %7592 = vmatprep.subr.bf16.mxu1 %v10585_v1 }
 0x411   :  { %7552 = vmatpush1.bf16.msra.mxu0 %v10580_v2 }
 0x412   :  { %7593 = vmatpush1.bf16.msra.mxu1 %v10583_v35  ;;  %7553 = vmatprep.subr.bf16.mxu0 %v10588_v45 }
 0x413   :  { %7594 = vmatprep.subr.bf16.mxu1 %v10591_v38 }
 0x415   :  { %7554 = vmatpush1.bf16.msra.mxu0 %v10586_v46 }
 0x416   :  { %7595 = vmatpush1.bf16.msra.mxu1 %v10589_v28  ;;  %7555 = vmatprep.subr.bf16.mxu0 %v10594_v62  ;;  %v10657_v28 = vld [vmem:[#allocation7 + $0x28] sm:$0xff]  }
 0x417   :  { %7596 = vmatprep.subr.bf16.mxu1 %v10597_v0  ;;  %v10669_v0 = vld [vmem:[#allocation7 + $0xb8] sm:$0xff]  }
 0x419   :  { %7556 = vmatpush1.bf16.msra.mxu0 %v10592_v15  ;;  %v10670_v15 = vld [vmem:[#allocation7 + $0xf0] sm:$0xff]  }
 0x41a   :  { %7597 = vmatpush1.bf16.msra.mxu1 %v10595_v16  ;;  %7557 = vmatprep.subr.bf16.mxu0 %v10600_v56  ;;  %v10659_v16 = vld [vmem:[#allocation7 + $0x20] sm:$0xff]   ;;  %v10671_v56 = vld [vmem:[#allocation7 + $0xb0] sm:$0xff]  }
 0x41b   :  { %7598 = vmatprep.subr.bf16.mxu1 %v10603_v36  ;;  %v10660_v36 = vld [vmem:[#allocation7 + $0x58] sm:$0xff]  }
 0x41d   :  { %7558 = vmatpush1.bf16.msra.mxu0 %v10598_v57  ;;  %v10661_v57 = vld [vmem:[#allocation7 + $0x18] sm:$0xff]  }
 0x41e   :  { %7599 = vmatpush1.bf16.msra.mxu1 %v10601_v58  ;;  %7559 = vmatprep.subr.bf16.mxu0 %v10606_v59  ;;  %v10673_v58 = vld [vmem:[#allocation7 + $0xa8] sm:$0xff]   ;;  %v10662_v59 = vld [vmem:[#allocation7 + $0x50] sm:$0xff]  }
 0x41f   :  { %7600 = vmatprep.subr.bf16.mxu1 %v10609_v11  ;;  %v10674_v11 = vld [vmem:[#allocation7 + $0xe0] sm:$0xff]  }
 0x421   :  { %7560 = vmatpush2.bf16.msra.mxu0 %v10604_v60  ;;  %v10663_v60 = vld [vmem:[#allocation7 + $0x10] sm:$0xff]  }
 0x422   :  { %7601 = vmatpush2.bf16.msra.mxu1 %v10607_v49  ;;  %7561 = vmatprep.subr.bf16.mxu0 %v10612_v61  ;;  %v10675_v49 = vld [vmem:[#allocation7 + $0xa0] sm:$0xff]   ;;  %v10664_v61 = vld [vmem:[#allocation7 + $0x48] sm:$0xff]  }
 0x423   :  { %7602 = vmatprep.subr.bf16.mxu1 %v10615_v7  ;;  %v10676_v7 = vld [vmem:[#allocation7 + $0xd8] sm:$0xff]  }
 0x425   :  { %7562 = vmatpush2.bf16.msra.mxu0 %v10610_v10  ;;  %v10665_v10 = vld [vmem:[#allocation7 + $0x8] sm:$0xff]  }
 0x426   :  { %7603 = vmatpush2.bf16.msra.mxu1 %v10613_v3  ;;  %7563 = vmatprep.subr.bf16.mxu0 %v10618_v4  ;;  %v10677_v3 = vld [vmem:[#allocation7 + $0x98] sm:$0xff]   ;;  %v10666_v4 = vld [vmem:[#allocation7 + $0x40] sm:$0xff]  }
 0x427   :  { %7604 = vmatprep.subr.bf16.mxu1 %v10621_v41  ;;  %v10667_v41 = vld [vmem:[#allocation7] sm:$0xff]  }
 0x429   :  { %7564 = vmatpush2.bf16.msra.mxu0 %v10616_v5  ;;  %v7625_v5 = vmax.f32 %v11006_v9, 0.0 }
 0x42a   :  { %7605 = vmatpush2.bf16.msra.mxu1 %v10619_v6  ;;  %7565 = vmatprep.subr.bf16.mxu0 %v10624_v42  ;;  %v10678_v42 = vld [vmem:[#allocation7 + $0xd0] sm:$0xff]  }
 0x42b   :  { %7606 = vmatprep.subr.bf16.mxu1 %v10627_v43  ;;  %v7629_v6 = vpack.c.bf16 %v7625_v5, %v7625_v5  ;;  %v10679_v43 = vld [vmem:[#allocation7 + $0x90] sm:$0xff]  }
 0x42d   :  { %7566 = vmatpush2.bf16.msra.mxu0 %v10622_v19 }
 0x42e   :  { %7607 = vmatpush2.bf16.msra.mxu1 %v10625_v17  ;;  %7567 = vmatprep.subr.bf16.mxu0 %v10630_v18 }
 0x42f   :  { %7608 = vmatprep.subr.bf16.mxu1 %v10633_v20 }
 0x431   :  { %7568 = vmatpush2.bf16.msra.mxu0 %v10628_v52 }
 0x432   :  { %7609 = vmatpush2.bf16.msra.mxu1 %v10631_v25  ;;  %7569 = vmatprep.subr.bf16.mxu0 %v10636_v26  ;;  %v10680_v25 = vld [vmem:[#allocation7 + $0xc8] sm:$0xff]  }
 0x433   :  { %7610 = vmatprep.subr.bf16.mxu1 %v10639_v21 }
 0x435   :  { %7570 = vmatpush2.bf16.msra.mxu0 %v10634_v47  ;;  %v10681_v47 = vld [vmem:[#allocation7 + $0x88] sm:$0xff]  }
 0x436   :  { %7611 = vmatpush2.bf16.msra.mxu1 %v10637_v55  ;;  %7571 = vmatprep.subr.bf16.mxu0 %v10642_v22 }
 0x437   :  { %7612 = vmatprep.subr.bf16.mxu1 %v10645_v63 }
 0x439   :  { %7572 = vmatpush2.bf16.msra.mxu0 %v10640_v48 }
 0x43a   :  { %7613 = vmatpush2.bf16.msra.mxu1 %v10643_v50  ;;  %7573 = vmatprep.subr.bf16.mxu0 %v10648_v37  ;;  %v10682_v50 = vld [vmem:[#allocation7 + $0xc0] sm:$0xff]  }
 0x43b   :  { %7614 = vmatprep.subr.bf16.mxu1 %v10651_v40  ;;  %v10683_v37 = vld [vmem:[#allocation7 + $0x80] sm:$0xff]  }
 0x43d   :  { %7574 = vmatpush2.bf16.msra.mxu0 %v10646_v31 }
 0x43e   :  { %7615 = vmatpush2.bf16.msra.mxu1 %v10649_v39  ;;  %9062 = vmatprep.subr.bf16.mxu0 %v10652_v44 }
 0x440   :  { %v7331_v30 = vpop.f32.mrf.mxu0  ;;  %7576 = vmatmul.mubr.bf16.vlgmr.msra.gmra.mxu0 %v10969_v12  ;;  %v10658_v12 = vld [vmem:[#allocation7 + $0x60] sm:$0xff]  }
 0x441   :  { %v7372_v34 = vpop.f32.mrf.mxu1  ;;  %7617 = vmatmul.mubr.bf16.vlgmr.msra.gmra.mxu1 %v10971_v13  ;;  %v7332_v33 = vadd.f32 %v7331_v30, %v11046_v23  ;;  %9063 = vmatpush3.bf16.msra.mxu0 %v10653_v32  ;;  %v10668_v23 = vld [vmem:[#allocation7 + $0xf8] sm:$0xff]  }
 0x442   :  { %7928 = vmatprep.mubr.bf16.mxu0 %v7630_v27  ;;  %v7333_v54 = vpop.f32.mrf.mxu0  ;;  %9064 = vmatprep.subr.bf16.mxu0 %v10654_v24 }
 0x443   :  { %v7374_v1 = vpop.f32.mrf.mxu1  ;;  %v7373_v2 = vadd.f32 %v7372_v34, %v7332_v33  ;;  %v7334_v35 = vadd.f32 %v7333_v54, %v11051_v8  ;;  %9084 = vmatprep.subr.bf16.mxu1 %v10668_v23  ;;  %v10672_v8 = vld [vmem:[#allocation7 + $0xe8] sm:$0xff]  }
 0x444   :  { %v7335_v45 = vpop.f32.mrf.mxu0  ;;  %9085 = vmatpush3.bf16.msra.mxu1 %v10669_v0 }
 0x445   :  { %v7376_v38 = vpop.f32.mrf.mxu1  ;;  %v7375_v46 = vadd.f32 %v7374_v1, %v7334_v35  ;;  %9065 = vmatpush3.bf16.msra.mxu0 %v10655_v53  ;;  %9086 = vmatprep.subr.bf16.mxu1 %v10670_v15 }
 0x446   :  { %v7336_v62 = vpop.f32.mrf.mxu0  ;;  %9066 = vmatprep.subr.bf16.mxu0 %v10656_v14 }
 0x447   :  { %v7377_v13 = vpop.f32.mrf.mxu1 }
 0x448   :  { %9087 = vmatpush3.bf16.msra.mxu1 %v10671_v56 }
 0x449   :  { %9067 = vmatpush3.bf16.msra.mxu0 %v10657_v28  ;;  %9088 = vmatprep.subr.bf16.mxu1 %v10672_v8 }
 0x44a   :  { %9068 = vmatprep.subr.bf16.mxu0 %v10658_v12 }
 0x44c   :  { %9089 = vmatpush3.bf16.msra.mxu1 %v10673_v58 }
 0x44d   :  { %9069 = vmatpush3.bf16.msra.mxu0 %v10659_v16  ;;  %9090 = vmatprep.subr.bf16.mxu1 %v10674_v11 }
 0x44e   :  { %9070 = vmatprep.subr.bf16.mxu0 %v10660_v36 }
 0x450   :  { %9091 = vmatpush3.bf16.msra.mxu1 %v10675_v49 }
 0x451   :  { %9071 = vmatpush3.bf16.msra.mxu0 %v10661_v57  ;;  %9092 = vmatprep.subr.bf16.mxu1 %v10676_v7 }
 0x452   :  { %9072 = vmatprep.subr.bf16.mxu0 %v10662_v59  ;;  %v9029_v59 = vld [vmem:[#allocation9] ss:$0 sm:$0xff] }
 0x454   :  { %9093 = vmatpush3.bf16.msra.mxu1 %v10677_v3 }
 0x455   :  { %9073 = vmatpush3.bf16.msra.mxu0 %v10663_v60  ;;  %9094 = vmatprep.subr.bf16.mxu1 %v10678_v42  ;;  %v7977_v60 = vand.u32 127, %v1173_v51 }
 0x456   :  { %9074 = vmatprep.subr.bf16.mxu0 %v10664_v61 }
 0x457   :  { %vm7978_vm0 = vcmp.lt.s32.totalorder %v7977_v60, 2 }
 0x458   :  { %9095 = vmatpush3.bf16.msra.mxu1 %v10679_v43 }
 0x459   :  { %9075 = vmatpush3.bf16.msra.mxu0 %v10665_v10  ;;  %9096 = vmatprep.subr.bf16.mxu1 %v10680_v25 }
 0x45a   :  { %9076 = vmatprep.subr.bf16.mxu0 %v10666_v4 }
 0x45c   :  { %9097 = vmatpush3.bf16.msra.mxu1 %v10681_v47 }
 0x45d   :  { %9077 = vmatpush3.bf16.msra.mxu0 %v10667_v41  ;;  %9098 = vmatprep.subr.bf16.mxu1 %v10682_v50 }
 0x460   :  { %7929 = vmatmul.mubr.bf16.vlgmr.msra.gmra.mxu0 %v7629_v6  ;;  %9099 = vmatpush3.bf16.msra.mxu1 %v10683_v37 }
 0x480   :  { %v7413_v19 = vpop.f32.mrf.mxu0 }
 0x481   :  { %v7454_v17 = vpop.f32.mrf.mxu1  ;;  %v7414_v18 = vadd.f32 %v7413_v19, %v7373_v2 }
 0x482   :  { %v7415_v20 = vpop.f32.mrf.mxu0 }
 0x483   :  { %v7456_v52 = vpop.f32.mrf.mxu1  ;;  %v7455_v26 = vadd.f32 %v7454_v17, %v7414_v18  ;;  %v7416_v21 = vadd.f32 %v7415_v20, %v7375_v46 }
 0x484   :  { %v7417_v55 = vpop.f32.mrf.mxu0 }
 0x485   :  { %v7458_v22 = vpop.f32.mrf.mxu1  ;;  %v7457_v9 = vadd.f32 %v7456_v52, %v7416_v21 }
 0x486   :  { %v7418_v63 = vpop.f32.mrf.mxu0 }
 0x487   :  { %v7459_v48 = vpop.f32.mrf.mxu1 }
 0x4c0   :  { %v7495_v40 = vpop.f32.mrf.mxu0 }
 0x4c1   :  { %v7536_v31 = vpop.f32.mrf.mxu1  ;;  %v7496_v39 = vadd.f32 %v7495_v40, %v7455_v26 }
 0x4c2   :  { %v7497_v44 = vpop.f32.mrf.mxu0 }
 0x4c3   :  { %v7538_v29 = vpop.f32.mrf.mxu1  ;;  %v7537_v32 = vadd.f32 %v7536_v31, %v7496_v39  ;;  %v7498_v33 = vadd.f32 %v7497_v44, %v7457_v9 }
 0x4c4   :  { %v7499_v24 = vpop.f32.mrf.mxu0 }
 0x4c5   :  { %v7540_v27 = vpop.f32.mrf.mxu1  ;;  %v7539_v1 = vadd.f32 %v7538_v29, %v7498_v33 }
 0x4c6   :  { %v7500_v30 = vpop.f32.mrf.mxu0 }
 0x4c7   :  { %v7541_v34 = vpop.f32.mrf.mxu1 }
 0x500   :  { %v7577_v53 = vpop.f32.mrf.mxu0 }
 0x501   :  { %v7618_v54 = vpop.f32.mrf.mxu1  ;;  %v7578_v14 = vadd.f32 %v7577_v53, %v7537_v32 }
 0x502   :  { %v7579_v2 = vpop.f32.mrf.mxu0 }
 0x503   :  { %v7620_v35 = vpop.f32.mrf.mxu1  ;;  %v7619_v45 = vadd.f32 %v7618_v54, %v7578_v14  ;;  %v7580_v38 = vadd.f32 %v7579_v2, %v7539_v1 }
 0x504   :  { %v7581_v46 = vpop.f32.mrf.mxu0 }
 0x505   :  { %v7622_v28 = vpop.f32.mrf.mxu1  ;;  %v7621_v12 = vadd.f32 %v7620_v35, %v7580_v38  ;;  %v7627_v62 = vmax.f32 %v7619_v45, 0.0 }
 0x506   :  { %v7582_v13 = vpop.f32.mrf.mxu0 }
 0x507   :  { %v7623_v23 = vpop.f32.mrf.mxu1  ;;  %v7628_v0 = vmax.f32 %v7621_v12, 0.0  ;;  %v7631_v16 = vpack.c.bf16 %v7627_v62, %v7627_v62 }
 0x509   :  { %v7632_v15 = vpack.c.bf16 %v7628_v0, %v7628_v0 }
 0x50b   :  { %7968 = vmatprep.mubr.bf16.mxu1 %v7632_v15 }
 0x50c   :  { %7969 = vmatmul.mubr.bf16.vlgmr.msra.gmra.mxu1 %v7631_v16 }
 0x520   :  { %v9078_v56 = vpop.f32.mrf.mxu0 }
 0x522   :  { %v9079_v36 = vpop.f32.mrf.mxu0 }
 0x523   :  { %v9080_v8 = vadd.f32 %v9079_v36, %v9078_v56 }
 0x524   :  { %v9081_v57 = vpop.f32.mrf.mxu0 }
 0x525   :  { %v7931_v61 = vadd.f32 %v9080_v8, %v9029_v59 }
 0x526   :  { %v9082_v58 = vpop.f32.mrf.mxu0 }
 0x5cc   :  { %v9100_v11 = vpop.f32.mrf.mxu1 }
 0x5ce   :  { %v9101_v49 = vpop.f32.mrf.mxu1 }
 0x5cf   :  { %v9102_v7 = vadd.f32 %v9101_v49, %v9100_v11 }
 0x5d0   :  { %v9103_v10 = vpop.f32.mrf.mxu1 }
 0x5d1   :  { %v7971_v3 = vadd.f32 %v9102_v7, %v7931_v61 }
 0x5d2   :  { %v9104_v4 = vpop.f32.mrf.mxu1 }
 0x5d3   :  { %v7979_v41 = vsel %vm7978_vm0, %v7971_v3, -1e+30 }
 0x5d4   :  { %7980 = vmax.xlane.f32.xlu0 %v7979_v41 }
 0x65d   :  { %v7981_v5 = vpop.xlane.xlu0 %7980 }
 0x65e   :  { %v7982_v6 = vsub.f32 %v7979_v41, %v7981_v5 }
 0x660   :  { %v7983_v42 = vmul.f32 1.442695, %v7982_v6 }
 0x662   :  { %10684 = vpow2.f32 %v7983_v42 }
 0x66f   :  { %v10685_v43 = vpop.eup %10684 }
 0x670   :  { %7985 = vadd.xlane.f32.xlu0 %v10685_v43 }
 0x6f9   :  { %v7986_v19 = vpop.xlane.xlu0 %7985 }
 0x6fa   :  { %10686 = vrcp.f32 %v7986_v19 }
 0x6fb   :  { %10688 = vlog2.f32 %v7986_v19 }
 0x707   :  { %v10687_v51 = vpop.eup %10686 }
 0x708   :  { %v10689_v17 = vpop.eup %10688  ;;  %v7988_v18 = vmul.f32 %v10687_v51, %v10685_v43 }
 0x709   :  { %v7990_v20 = vmul.f32 0.6931472, %v10689_v17 }
 0x70a   :  { %v7992_v52 = vsub.f32 0.0, %v7988_v18 }
 0x70b   :  { %v7991_v25 = vsub.f32 %v7982_v6, %v7990_v20 }
 0x70d   :  { %v7993_v26 = vmul.f32 %v7992_v52, %v7991_v25 }
 0x70f   :  { %7994 = vrot.lane.b32.xlu1 %v7993_v26, %s10806_s2 }
 0x781   :  { %v7995_v21 = vpop.permute.xlu1 %7994 }
 0x782   :  { %v7996_v47 = vsel %vm7978_vm0, %v7988_v18, %v7995_v21 }
 0x783   :  { %7997 = vst [vmem:[%s11070_s5] sm:$0xff] %v7996_v47 }
 0x784   :  { %8002 = vsyncpa [#allocation3], 1 }
 0x785   :  { %8003 = vsyncpa [#allocation5], 1 }
 0x786   :  { %8004 = vsyncpa [#allocation8], 1 }

</bundles_post_ra>
